<compile_context>
chip_gen: v5e
topology: v5e:2x2
jax: 0.10.0
libtpu: 0.0.40
codegen_flags: <defaults>
</compile_context>

<pallas_src>
import jax
import jax.numpy as jnp
from jax.experimental import pallas as pl
from jax.experimental.pallas import tpu as pltpu

COMMON_DIM = 192
LN_EPS = 1e-5


def _round_up(x, m):
    return (x + m - 1) // m * m


def mma_kernel(text_ref, vision_ref, audio_ref,
               wt_ref, bt_ref, wv_ref, bv_ref, wa_ref, ba_ref,
               wq_ref, bq_ref, wk_ref, bk_ref, wvv_ref, bvv_ref,
               wo_ref, bo_ref, gamma_ref, beta_ref,
               hmask_ref, hmaskT_ref,
               out_ref):
    f32 = jnp.float32

    # ---- modality projections -> common dim: (B_TILE, 192) each ----
    t = jnp.dot(text_ref[...], wt_ref[...], preferred_element_type=f32) + bt_ref[...]
    v = jnp.dot(vision_ref[...], wv_ref[...], preferred_element_type=f32) + bv_ref[...]
    a = jnp.dot(audio_ref[...], wa_ref[...], preferred_element_type=f32) + ba_ref[...]

    b_tile, e = t.shape
    x = jnp.concatenate([t, v, a], axis=0)                 # (3B, E) token slab

    # ---- fused (tokens x heads) QKV projections; 1/sqrt(hd) folded in Wq ----
    q = jnp.dot(x, wq_ref[...], preferred_element_type=f32) + bq_ref[...]
    k = jnp.dot(x, wk_ref[...], preferred_element_type=f32) + bk_ref[...]
    vv = jnp.dot(x, wvv_ref[...], preferred_element_type=f32) + bvv_ref[...]

    hmask = hmask_ref[...]      # (E, H) 0/1: column h selects head h's 48 lanes
    hmaskT = hmaskT_ref[...]    # (H, E) 0/1: broadcasts per-head prob to lanes

    qs = [q[s * b_tile:(s + 1) * b_tile] for s in range(3)]
    ks = [k[s * b_tile:(s + 1) * b_tile] for s in range(3)]
    vs = [vv[s * b_tile:(s + 1) * b_tile] for s in range(3)]

    outs = []
    for s in range(3):                                     # query token (static)
        # per-head scores against the 3 key tokens -> (B, H) each
        sc = [jnp.dot(qs[s] * ks[u], hmask, preferred_element_type=f32)
              for u in range(3)]
        m = jnp.maximum(jnp.maximum(sc[0], sc[1]), sc[2])
        ex = [jnp.exp(c - m) for c in sc]
        denom = ex[0] + ex[1] + ex[2]
        inv = pl.reciprocal(denom, approx=True)            # EUP
        inv = inv * (2.0 - denom * inv)                    # one Newton step
        o_s = jnp.zeros((b_tile, e), f32)
        for u in range(3):
            # expand (B, H) head probabilities back to (B, E) lanes
            pe = jnp.dot(ex[u] * inv, hmaskT, preferred_element_type=f32)
            o_s = o_s + pe * vs[u]
        outs.append(o_s)

    # ---- output projection over the whole (3B, E) slab ----
    o = jnp.concatenate(outs, axis=0)
    o = jnp.dot(o, wo_ref[...], preferred_element_type=f32) + bo_ref[...]

    # ---- fused LayerNorm over the slab (biased var, eps inside sqrt) ----
    mu = jnp.mean(o, axis=-1, keepdims=True)
    mu2 = jnp.mean(o * o, axis=-1, keepdims=True)
    var = mu2 - mu * mu
    y = (o - mu) * jax.lax.rsqrt(var + LN_EPS) * gamma_ref[...] + beta_ref[...]
    # TODO(synk): nn.Dropout(0.1) is treated as identity (eval mode).
    out_ref[...] = y.reshape(3, b_tile, e).astype(out_ref.dtype)


def multimodal_attention(text, vision, audio, params, *, num_heads):
    B, Dt = text.shape
    Dv = vision.shape[1]
    Da = audio.shape[1]
    E = COMMON_DIM
    assert E % num_heads == 0
    hd = E // num_heads
    scale = 1.0 / (hd ** 0.5)
    f32 = jnp.float32

    # ---- glue: kernel-friendly weight layouts (no in-kernel transposes) ----
    wt_k = params["wt"].T                       # (Dt, E)
    wv_k = params["wv"].T                       # (Dv, E)
    wa_k = params["wa"].T                       # (Da, E)
    bt_k = params["bt"].reshape(1, E)
    bv_k = params["bv"].reshape(1, E)
    ba_k = params["ba"].reshape(1, E)

    in_w, in_b = params["in_w"], params["in_b"]
    wq_k = in_w[:E].T * scale                   # (E, E), scale folded in
    bq_k = (in_b[:E] * scale).reshape(1, E)
    wk_k = in_w[E:2 * E].T
    bk_k = in_b[E:2 * E].reshape(1, E)
    wvv_k = in_w[2 * E:].T
    bvv_k = in_b[2 * E:].reshape(1, E)

    wo_k = params["out_w"].T                    # (E, E)
    bo_k = params["out_b"].reshape(1, E)
    gamma_k = params["norm_w"].reshape(1, E)
    beta_k = params["norm_b"].reshape(1, E)

    # 0/1 head-selection masks (exact in bf16).
    hmask = (jnp.arange(E)[:, None] // hd ==
             jnp.arange(num_heads)[None, :]).astype(f32)   # (E, H)
    hmaskT = hmask.T                                       # (H, E)

    # ---- batch tiling: large 8-aligned tiles, pad batch if needed ----
    B_TILE = min(256, _round_up(B, 8))
    B_pad = _round_up(B, B_TILE)
    if B_pad != B:
        pad = lambda z: jnp.pad(z, ((0, B_pad - B), (0, 0)))
        text, vision, audio = pad(text), pad(vision), pad(audio)
    grid = (B_pad // B_TILE,)

    rep2 = lambda i: (0, 0)
    in_specs = [
        pl.BlockSpec((B_TILE, Dt), lambda i: (i, 0)),
        pl.BlockSpec((B_TILE, Dv), lambda i: (i, 0)),
        pl.BlockSpec((B_TILE, Da), lambda i: (i, 0)),
        pl.BlockSpec((Dt, E), rep2),
        pl.BlockSpec((1, E), rep2),
        pl.BlockSpec((Dv, E), rep2),
        pl.BlockSpec((1, E), rep2),
        pl.BlockSpec((Da, E), rep2),
        pl.BlockSpec((1, E), rep2),
        pl.BlockSpec((E, E), rep2),             # wq
        pl.BlockSpec((1, E), rep2),
        pl.BlockSpec((E, E), rep2),             # wk
        pl.BlockSpec((1, E), rep2),
        pl.BlockSpec((E, E), rep2),             # wv (values)
        pl.BlockSpec((1, E), rep2),
        pl.BlockSpec((E, E), rep2),             # wo
        pl.BlockSpec((1, E), rep2),
        pl.BlockSpec((1, E), rep2),             # gamma
        pl.BlockSpec((1, E), rep2),             # beta
        pl.BlockSpec((E, num_heads), rep2),     # head mask
        pl.BlockSpec((num_heads, E), rep2),     # head mask (transposed)
    ]
    out_specs = pl.BlockSpec((3, B_TILE, E), lambda i: (0, i, 0))

    out = pl.pallas_call(
        mma_kernel,
        out_shape=jax.ShapeDtypeStruct((3, B_pad, E), f32),
        grid_spec=pltpu.PrefetchScalarGridSpec(
            num_scalar_prefetch=0,
            grid=grid,
            in_specs=in_specs,
            out_specs=out_specs,
        ),
        compiler_params=pltpu.CompilerParams(
            dimension_semantics=("parallel",)),
    )(text, vision, audio,
      wt_k, bt_k, wv_k, bv_k, wa_k, ba_k,
      wq_k, bq_k, wk_k, bk_k, wvv_k, bvv_k,
      wo_k, bo_k, gamma_k, beta_k,
      hmask, hmaskT)
    return out[:, :B, :]


def init_params(key, text_dim, vision_dim, audio_dim, common_dim=COMMON_DIM):
    E = common_dim
    ks = jax.random.split(key, 12)

    def w(k, shape, scale=0.05):
        return jax.random.normal(k, shape, jnp.float32) * scale

    return dict(
        wt=w(ks[0], (E, text_dim)),   bt=w(ks[1], (E,), 0.02),
        wv=w(ks[2], (E, vision_dim)), bv=w(ks[3], (E,), 0.02),
        wa=w(ks[4], (E, audio_dim)),  ba=w(ks[5], (E,), 0.02),
        in_w=w(ks[6], (3 * E, E)),    in_b=w(ks[7], (3 * E,), 0.02),
        out_w=w(ks[8], (E, E)),       out_b=w(ks[9], (E,), 0.02),
        norm_w=1.0 + w(ks[10], (E,), 0.1), norm_b=w(ks[11], (E,), 0.1),
    )


def reference_forward(text, vision, audio, p, *, num_heads):
    """Pure-JAX mirror of the PyTorch forward (eval mode), default precision."""
    E = COMMON_DIM
    hd = E // num_heads
    t = text @ p["wt"].T + p["bt"]
    v = vision @ p["wv"].T + p["bv"]
    a = audio @ p["wa"].T + p["ba"]
    x = jnp.stack([t, v, a], axis=0)                     # (L=3, B, E)
    L, B, _ = x.shape
    qkv = jnp.einsum("lbe,fe->lbf", x, p["in_w"]) + p["in_b"]
    q, k, vv = qkv[..., :E], qkv[..., E:2 * E], qkv[..., 2 * E:]

    def heads(z):
        return z.reshape(L, B, num_heads, hd).transpose(1, 2, 0, 3)

    qh, kh, vh = heads(q), heads(k), heads(vv)
    sc = jnp.einsum("bhld,bhmd->bhlm", qh, kh) / jnp.sqrt(float(hd))
    pw = jax.nn.softmax(sc, axis=-1)
    oh = jnp.einsum("bhlm,bhmd->bhld", pw, vh)
    o = oh.transpose(2, 0, 1, 3).reshape(L, B, E)
    o = jnp.einsum("lbe,fe->lbf", o, p["out_w"]) + p["out_b"]
    mu = o.mean(-1, keepdims=True)
    var = ((o - mu) ** 2).mean(-1, keepdims=True)
    return (o - mu) / jnp.sqrt(var + LN_EPS) * p["norm_w"] + p["norm_b"]


if __name__ == "__main__":
    B, Dt, Dv, Da, H = 16, 48, 64, 32, 4

    key = jax.random.PRNGKey(0)
    k_in, k_par = jax.random.split(key)
    kt, kv, ka = jax.random.split(k_in, 3)
    text = jax.random.normal(kt, (B, Dt), jnp.float32)
    vision = jax.random.normal(kv, (B, Dv), jnp.float32)
    audio = jax.random.normal(ka, (B, Da), jnp.float32)
    params = init_params(k_par, Dt, Dv, Da)

    out = multimodal_attention(text, vision, audio, params, num_heads=H)
    out = jax.block_until_ready(out)
    assert out.shape == (3, B, COMMON_DIM), out.shape

    ref = reference_forward(text, vision, audio, params, num_heads=H)
    err = float(jnp.max(jnp.abs(out - ref)))
    # Both kernel and reference run default (bf16 MXU) matmul precision but
    # with different fusion structure, so allow a few e-3 of drift.
    if err > 5e-3:
        raise AssertionError(f"kernel/reference mismatch, max abs err = {err}")

    print("KERNEL_OK")
</pallas_src>

<mosaic_0001>
module attributes {stable_mosaic.version = 11 : i64} {
  func.func @mma_kernel(%arg0: i32, %arg1: memref<16x48xf32, #tpu.memory_space<vmem>>, %arg2: memref<16x64xf32, #tpu.memory_space<vmem>>, %arg3: memref<16x32xf32, #tpu.memory_space<vmem>>, %arg4: memref<48x192xf32, #tpu.memory_space<vmem>>, %arg5: memref<1x192xf32, #tpu.memory_space<vmem>>, %arg6: memref<64x192xf32, #tpu.memory_space<vmem>>, %arg7: memref<1x192xf32, #tpu.memory_space<vmem>>, %arg8: memref<32x192xf32, #tpu.memory_space<vmem>>, %arg9: memref<1x192xf32, #tpu.memory_space<vmem>>, %arg10: memref<192x192xf32, #tpu.memory_space<vmem>>, %arg11: memref<1x192xf32, #tpu.memory_space<vmem>>, %arg12: memref<192x192xf32, #tpu.memory_space<vmem>>, %arg13: memref<1x192xf32, #tpu.memory_space<vmem>>, %arg14: memref<192x192xf32, #tpu.memory_space<vmem>>, %arg15: memref<1x192xf32, #tpu.memory_space<vmem>>, %arg16: memref<192x192xf32, #tpu.memory_space<vmem>>, %arg17: memref<1x192xf32, #tpu.memory_space<vmem>>, %arg18: memref<1x192xf32, #tpu.memory_space<vmem>>, %arg19: memref<1x192xf32, #tpu.memory_space<vmem>>, %arg20: memref<192x4xf32, #tpu.memory_space<vmem>>, %arg21: memref<4x192xf32, #tpu.memory_space<vmem>>, %arg22: memref<3x16x192xf32, #tpu.memory_space<vmem>>) attributes {dimension_semantics = [#tpu.dimension_semantics<parallel>], iteration_bounds = array<i64: 1>, scalar_prefetch = 0 : i64, scratch_operands = 0 : i64, tpu.core_type = #tpu.core_type<tc>, window_params = [{transform_indices = @transform_0, window_bounds = array<i64: 16, 48>}, {transform_indices = @transform_1, window_bounds = array<i64: 16, 64>}, {transform_indices = @transform_2, window_bounds = array<i64: 16, 32>}, {pipeline_mode = #tpu.pipeline_mode<synchronous>, transform_indices = @transform_3, window_bounds = array<i64: 48, 192>}, {pipeline_mode = #tpu.pipeline_mode<synchronous>, transform_indices = @transform_4, window_bounds = array<i64: 1, 192>}, {pipeline_mode = #tpu.pipeline_mode<synchronous>, transform_indices = @transform_5, window_bounds = array<i64: 64, 192>}, {pipeline_mode = #tpu.pipeline_mode<synchronous>, transform_indices = @transform_6, window_bounds = array<i64: 1, 192>}, {pipeline_mode = #tpu.pipeline_mode<synchronous>, transform_indices = @transform_7, window_bounds = array<i64: 32, 192>}, {pipeline_mode = #tpu.pipeline_mode<synchronous>, transform_indices = @transform_8, window_bounds = array<i64: 1, 192>}, {pipeline_mode = #tpu.pipeline_mode<synchronous>, transform_indices = @transform_9, window_bounds = array<i64: 192, 192>}, {pipeline_mode = #tpu.pipeline_mode<synchronous>, transform_indices = @transform_10, window_bounds = array<i64: 1, 192>}, {pipeline_mode = #tpu.pipeline_mode<synchronous>, transform_indices = @transform_11, window_bounds = array<i64: 192, 192>}, {pipeline_mode = #tpu.pipeline_mode<synchronous>, transform_indices = @transform_12, window_bounds = array<i64: 1, 192>}, {pipeline_mode = #tpu.pipeline_mode<synchronous>, transform_indices = @transform_13, window_bounds = array<i64: 192, 192>}, {pipeline_mode = #tpu.pipeline_mode<synchronous>, transform_indices = @transform_14, window_bounds = array<i64: 1, 192>}, {pipeline_mode = #tpu.pipeline_mode<synchronous>, transform_indices = @transform_15, window_bounds = array<i64: 192, 192>}, {pipeline_mode = #tpu.pipeline_mode<synchronous>, transform_indices = @transform_16, window_bounds = array<i64: 1, 192>}, {pipeline_mode = #tpu.pipeline_mode<synchronous>, transform_indices = @transform_17, window_bounds = array<i64: 1, 192>}, {pipeline_mode = #tpu.pipeline_mode<synchronous>, transform_indices = @transform_18, window_bounds = array<i64: 1, 192>}, {pipeline_mode = #tpu.pipeline_mode<synchronous>, transform_indices = @transform_19, window_bounds = array<i64: 192, 4>}, {pipeline_mode = #tpu.pipeline_mode<synchronous>, transform_indices = @transform_20, window_bounds = array<i64: 4, 192>}, {transform_indices = @transform_21, window_bounds = array<i64: 3, 16, 192>}]} {
    %c0 = arith.constant 0 : index
    %c0_0 = arith.constant 0 : index
    %0 = vector.load %arg1[%c0, %c0_0] : memref<16x48xf32, #tpu.memory_space<vmem>>, vector<16x48xf32>
    %c0_1 = arith.constant 0 : index
    %c0_2 = arith.constant 0 : index
    %1 = vector.load %arg4[%c0_1, %c0_2] : memref<48x192xf32, #tpu.memory_space<vmem>>, vector<48x192xf32>
    %cst = arith.constant dense<0.000000e+00> : vector<16x192xf32>
    %2 = tpu.matmul %0, %1, %cst {dimension_numbers = #tpu.dot_dimension_numbers<[1], [0], [0], [1], [0, 0, 1, 1], [], []>} : vector<16x48xf32>, vector<48x192xf32>, vector<16x192xf32> -> vector<16x192xf32>
    %c0_3 = arith.constant 0 : index
    %c0_4 = arith.constant 0 : index
    %3 = vector.load %arg5[%c0_3, %c0_4] : memref<1x192xf32, #tpu.memory_space<vmem>>, vector<1x192xf32>
    %4 = vector.broadcast %3 : vector<1x192xf32> to vector<16x192xf32>
    %5 = arith.addf %2, %4 : vector<16x192xf32>
    %c0_5 = arith.constant 0 : index
    %c0_6 = arith.constant 0 : index
    %6 = vector.load %arg2[%c0_5, %c0_6] : memref<16x64xf32, #tpu.memory_space<vmem>>, vector<16x64xf32>
    %c0_7 = arith.constant 0 : index
    %c0_8 = arith.constant 0 : index
    %7 = vector.load %arg6[%c0_7, %c0_8] : memref<64x192xf32, #tpu.memory_space<vmem>>, vector<64x192xf32>
    %cst_9 = arith.constant dense<0.000000e+00> : vector<16x192xf32>
    %8 = tpu.matmul %6, %7, %cst_9 {dimension_numbers = #tpu.dot_dimension_numbers<[1], [0], [0], [1], [0, 0, 1, 1], [], []>} : vector<16x64xf32>, vector<64x192xf32>, vector<16x192xf32> -> vector<16x192xf32>
    %c0_10 = arith.constant 0 : index
    %c0_11 = arith.constant 0 : index
    %9 = vector.load %arg7[%c0_10, %c0_11] : memref<1x192xf32, #tpu.memory_space<vmem>>, vector<1x192xf32>
    %10 = vector.broadcast %9 : vector<1x192xf32> to vector<16x192xf32>
    %11 = arith.addf %8, %10 : vector<16x192xf32>
    %c0_12 = arith.constant 0 : index
    %c0_13 = arith.constant 0 : index
    %12 = vector.load %arg3[%c0_12, %c0_13] : memref<16x32xf32, #tpu.memory_space<vmem>>, vector<16x32xf32>
    %c0_14 = arith.constant 0 : index
    %c0_15 = arith.constant 0 : index
    %13 = vector.load %arg8[%c0_14, %c0_15] : memref<32x192xf32, #tpu.memory_space<vmem>>, vector<32x192xf32>
    %cst_16 = arith.constant dense<0.000000e+00> : vector<16x192xf32>
    %14 = tpu.matmul %12, %13, %cst_16 {dimension_numbers = #tpu.dot_dimension_numbers<[1], [0], [0], [1], [0, 0, 1, 1], [], []>} : vector<16x32xf32>, vector<32x192xf32>, vector<16x192xf32> -> vector<16x192xf32>
    %c0_17 = arith.constant 0 : index
    %c0_18 = arith.constant 0 : index
    %15 = vector.load %arg9[%c0_17, %c0_18] : memref<1x192xf32, #tpu.memory_space<vmem>>, vector<1x192xf32>
    %16 = vector.broadcast %15 : vector<1x192xf32> to vector<16x192xf32>
    %17 = arith.addf %14, %16 : vector<16x192xf32>
    %18 = tpu.concatenate %5, %11, %17 in 0 : vector<16x192xf32>, vector<16x192xf32>, vector<16x192xf32> -> vector<48x192xf32>
    %c0_19 = arith.constant 0 : index
    %c0_20 = arith.constant 0 : index
    %19 = vector.load %arg10[%c0_19, %c0_20] : memref<192x192xf32, #tpu.memory_space<vmem>>, vector<192x192xf32>
    %cst_21 = arith.constant dense<0.000000e+00> : vector<48x192xf32>
    %20 = tpu.matmul %18, %19, %cst_21 {dimension_numbers = #tpu.dot_dimension_numbers<[1], [0], [0], [1], [0, 0, 1, 1], [], []>} : vector<48x192xf32>, vector<192x192xf32>, vector<48x192xf32> -> vector<48x192xf32>
    %c0_22 = arith.constant 0 : index
    %c0_23 = arith.constant 0 : index
    %21 = vector.load %arg11[%c0_22, %c0_23] : memref<1x192xf32, #tpu.memory_space<vmem>>, vector<1x192xf32>
    %22 = vector.broadcast %21 : vector<1x192xf32> to vector<48x192xf32>
    %23 = arith.addf %20, %22 : vector<48x192xf32>
    %c0_24 = arith.constant 0 : index
    %c0_25 = arith.constant 0 : index
    %24 = vector.load %arg12[%c0_24, %c0_25] : memref<192x192xf32, #tpu.memory_space<vmem>>, vector<192x192xf32>
    %cst_26 = arith.constant dense<0.000000e+00> : vector<48x192xf32>
    %25 = tpu.matmul %18, %24, %cst_26 {dimension_numbers = #tpu.dot_dimension_numbers<[1], [0], [0], [1], [0, 0, 1, 1], [], []>} : vector<48x192xf32>, vector<192x192xf32>, vector<48x192xf32> -> vector<48x192xf32>
    %c0_27 = arith.constant 0 : index
    %c0_28 = arith.constant 0 : index
    %26 = vector.load %arg13[%c0_27, %c0_28] : memref<1x192xf32, #tpu.memory_space<vmem>>, vector<1x192xf32>
    %27 = vector.broadcast %26 : vector<1x192xf32> to vector<48x192xf32>
    %28 = arith.addf %25, %27 : vector<48x192xf32>
    %c0_29 = arith.constant 0 : index
    %c0_30 = arith.constant 0 : index
    %29 = vector.load %arg14[%c0_29, %c0_30] : memref<192x192xf32, #tpu.memory_space<vmem>>, vector<192x192xf32>
    %cst_31 = arith.constant dense<0.000000e+00> : vector<48x192xf32>
    %30 = tpu.matmul %18, %29, %cst_31 {dimension_numbers = #tpu.dot_dimension_numbers<[1], [0], [0], [1], [0, 0, 1, 1], [], []>} : vector<48x192xf32>, vector<192x192xf32>, vector<48x192xf32> -> vector<48x192xf32>
    %c0_32 = arith.constant 0 : index
    %c0_33 = arith.constant 0 : index
    %31 = vector.load %arg15[%c0_32, %c0_33] : memref<1x192xf32, #tpu.memory_space<vmem>>, vector<1x192xf32>
    %32 = vector.broadcast %31 : vector<1x192xf32> to vector<48x192xf32>
    %33 = arith.addf %30, %32 : vector<48x192xf32>
    %c0_34 = arith.constant 0 : index
    %c0_35 = arith.constant 0 : index
    %34 = vector.load %arg20[%c0_34, %c0_35] : memref<192x4xf32, #tpu.memory_space<vmem>>, vector<192x4xf32>
    %c0_36 = arith.constant 0 : index
    %c0_37 = arith.constant 0 : index
    %35 = vector.load %arg21[%c0_36, %c0_37] : memref<4x192xf32, #tpu.memory_space<vmem>>, vector<4x192xf32>
    %36 = vector.extract_strided_slice %23 {offsets = [0, 0], sizes = [16, 192], strides = [1, 1]} : vector<48x192xf32> to vector<16x192xf32>
    %37 = vector.extract_strided_slice %23 {offsets = [16, 0], sizes = [16, 192], strides = [1, 1]} : vector<48x192xf32> to vector<16x192xf32>
    %38 = vector.extract_strided_slice %23 {offsets = [32, 0], sizes = [16, 192], strides = [1, 1]} : vector<48x192xf32> to vector<16x192xf32>
    %39 = vector.extract_strided_slice %28 {offsets = [0, 0], sizes = [16, 192], strides = [1, 1]} : vector<48x192xf32> to vector<16x192xf32>
    %40 = vector.extract_strided_slice %28 {offsets = [16, 0], sizes = [16, 192], strides = [1, 1]} : vector<48x192xf32> to vector<16x192xf32>
    %41 = vector.extract_strided_slice %28 {offsets = [32, 0], sizes = [16, 192], strides = [1, 1]} : vector<48x192xf32> to vector<16x192xf32>
    %42 = vector.extract_strided_slice %33 {offsets = [0, 0], sizes = [16, 192], strides = [1, 1]} : vector<48x192xf32> to vector<16x192xf32>
    %43 = vector.extract_strided_slice %33 {offsets = [16, 0], sizes = [16, 192], strides = [1, 1]} : vector<48x192xf32> to vector<16x192xf32>
    %44 = vector.extract_strided_slice %33 {offsets = [32, 0], sizes = [16, 192], strides = [1, 1]} : vector<48x192xf32> to vector<16x192xf32>
    %45 = arith.mulf %36, %39 : vector<16x192xf32>
    %cst_38 = arith.constant dense<0.000000e+00> : vector<16x4xf32>
    %46 = tpu.matmul %45, %34, %cst_38 {dimension_numbers = #tpu.dot_dimension_numbers<[1], [0], [0], [1], [0, 0, 1, 1], [], []>} : vector<16x192xf32>, vector<192x4xf32>, vector<16x4xf32> -> vector<16x4xf32>
    %47 = arith.mulf %36, %40 : vector<16x192xf32>
    %cst_39 = arith.constant dense<0.000000e+00> : vector<16x4xf32>
    %48 = tpu.matmul %47, %34, %cst_39 {dimension_numbers = #tpu.dot_dimension_numbers<[1], [0], [0], [1], [0, 0, 1, 1], [], []>} : vector<16x192xf32>, vector<192x4xf32>, vector<16x4xf32> -> vector<16x4xf32>
    %49 = arith.mulf %36, %41 : vector<16x192xf32>
    %cst_40 = arith.constant dense<0.000000e+00> : vector<16x4xf32>
    %50 = tpu.matmul %49, %34, %cst_40 {dimension_numbers = #tpu.dot_dimension_numbers<[1], [0], [0], [1], [0, 0, 1, 1], [], []>} : vector<16x192xf32>, vector<192x4xf32>, vector<16x4xf32> -> vector<16x4xf32>
    %51 = arith.maximumf %46, %48 : vector<16x4xf32>
    %52 = arith.maximumf %51, %50 : vector<16x4xf32>
    %53 = arith.subf %46, %52 : vector<16x4xf32>
    %54 = math.exp %53 : vector<16x4xf32>
    %55 = arith.subf %48, %52 : vector<16x4xf32>
    %56 = math.exp %55 : vector<16x4xf32>
    %57 = arith.subf %50, %52 : vector<16x4xf32>
    %58 = math.exp %57 : vector<16x4xf32>
    %59 = arith.addf %54, %56 : vector<16x4xf32>
    %60 = arith.addf %59, %58 : vector<16x4xf32>
    %61 = tpu.reciprocal %60 {approx = true} : vector<16x4xf32> -> vector<16x4xf32>
    %62 = arith.mulf %60, %61 : vector<16x4xf32>
    %cst_41 = arith.constant 2.000000e+00 : f32
    %63 = vector.broadcast %cst_41 : f32 to vector<16x4xf32>
    %64 = arith.subf %63, %62 : vector<16x4xf32>
    %65 = arith.mulf %61, %64 : vector<16x4xf32>
    %cst_42 = arith.constant 0.000000e+00 : f32
    %66 = vector.broadcast %cst_42 : f32 to vector<16x192xf32>
    %67 = arith.mulf %54, %65 : vector<16x4xf32>
    %cst_43 = arith.constant dense<0.000000e+00> : vector<16x192xf32>
    %68 = tpu.matmul %67, %35, %cst_43 {dimension_numbers = #tpu.dot_dimension_numbers<[1], [0], [0], [1], [0, 0, 1, 1], [], []>} : vector<16x4xf32>, vector<4x192xf32>, vector<16x192xf32> -> vector<16x192xf32>
    %69 = arith.mulf %68, %42 : vector<16x192xf32>
    %70 = arith.addf %66, %69 : vector<16x192xf32>
    %71 = arith.mulf %56, %65 : vector<16x4xf32>
    %cst_44 = arith.constant dense<0.000000e+00> : vector<16x192xf32>
    %72 = tpu.matmul %71, %35, %cst_44 {dimension_numbers = #tpu.dot_dimension_numbers<[1], [0], [0], [1], [0, 0, 1, 1], [], []>} : vector<16x4xf32>, vector<4x192xf32>, vector<16x192xf32> -> vector<16x192xf32>
    %73 = arith.mulf %72, %43 : vector<16x192xf32>
    %74 = arith.addf %70, %73 : vector<16x192xf32>
    %75 = arith.mulf %58, %65 : vector<16x4xf32>
    %cst_45 = arith.constant dense<0.000000e+00> : vector<16x192xf32>
    %76 = tpu.matmul %75, %35, %cst_45 {dimension_numbers = #tpu.dot_dimension_numbers<[1], [0], [0], [1], [0, 0, 1, 1], [], []>} : vector<16x4xf32>, vector<4x192xf32>, vector<16x192xf32> -> vector<16x192xf32>
    %77 = arith.mulf %76, %44 : vector<16x192xf32>
    %78 = arith.addf %74, %77 : vector<16x192xf32>
    %79 = arith.mulf %37, %39 : vector<16x192xf32>
    %cst_46 = arith.constant dense<0.000000e+00> : vector<16x4xf32>
    %80 = tpu.matmul %79, %34, %cst_46 {dimension_numbers = #tpu.dot_dimension_numbers<[1], [0], [0], [1], [0, 0, 1, 1], [], []>} : vector<16x192xf32>, vector<192x4xf32>, vector<16x4xf32> -> vector<16x4xf32>
    %81 = arith.mulf %37, %40 : vector<16x192xf32>
    %cst_47 = arith.constant dense<0.000000e+00> : vector<16x4xf32>
    %82 = tpu.matmul %81, %34, %cst_47 {dimension_numbers = #tpu.dot_dimension_numbers<[1], [0], [0], [1], [0, 0, 1, 1], [], []>} : vector<16x192xf32>, vector<192x4xf32>, vector<16x4xf32> -> vector<16x4xf32>
    %83 = arith.mulf %37, %41 : vector<16x192xf32>
    %cst_48 = arith.constant dense<0.000000e+00> : vector<16x4xf32>
    %84 = tpu.matmul %83, %34, %cst_48 {dimension_numbers = #tpu.dot_dimension_numbers<[1], [0], [0], [1], [0, 0, 1, 1], [], []>} : vector<16x192xf32>, vector<192x4xf32>, vector<16x4xf32> -> vector<16x4xf32>
    %85 = arith.maximumf %80, %82 : vector<16x4xf32>
    %86 = arith.maximumf %85, %84 : vector<16x4xf32>
    %87 = arith.subf %80, %86 : vector<16x4xf32>
    %88 = math.exp %87 : vector<16x4xf32>
    %89 = arith.subf %82, %86 : vector<16x4xf32>
    %90 = math.exp %89 : vector<16x4xf32>
    %91 = arith.subf %84, %86 : vector<16x4xf32>
    %92 = math.exp %91 : vector<16x4xf32>
    %93 = arith.addf %88, %90 : vector<16x4xf32>
    %94 = arith.addf %93, %92 : vector<16x4xf32>
    %95 = tpu.reciprocal %94 {approx = true} : vector<16x4xf32> -> vector<16x4xf32>
    %96 = arith.mulf %94, %95 : vector<16x4xf32>
    %cst_49 = arith.constant 2.000000e+00 : f32
    %97 = vector.broadcast %cst_49 : f32 to vector<16x4xf32>
    %98 = arith.subf %97, %96 : vector<16x4xf32>
    %99 = arith.mulf %95, %98 : vector<16x4xf32>
    %cst_50 = arith.constant 0.000000e+00 : f32
    %100 = vector.broadcast %cst_50 : f32 to vector<16x192xf32>
    %101 = arith.mulf %88, %99 : vector<16x4xf32>
    %cst_51 = arith.constant dense<0.000000e+00> : vector<16x192xf32>
    %102 = tpu.matmul %101, %35, %cst_51 {dimension_numbers = #tpu.dot_dimension_numbers<[1], [0], [0], [1], [0, 0, 1, 1], [], []>} : vector<16x4xf32>, vector<4x192xf32>, vector<16x192xf32> -> vector<16x192xf32>
    %103 = arith.mulf %102, %42 : vector<16x192xf32>
    %104 = arith.addf %100, %103 : vector<16x192xf32>
    %105 = arith.mulf %90, %99 : vector<16x4xf32>
    %cst_52 = arith.constant dense<0.000000e+00> : vector<16x192xf32>
    %106 = tpu.matmul %105, %35, %cst_52 {dimension_numbers = #tpu.dot_dimension_numbers<[1], [0], [0], [1], [0, 0, 1, 1], [], []>} : vector<16x4xf32>, vector<4x192xf32>, vector<16x192xf32> -> vector<16x192xf32>
    %107 = arith.mulf %106, %43 : vector<16x192xf32>
    %108 = arith.addf %104, %107 : vector<16x192xf32>
    %109 = arith.mulf %92, %99 : vector<16x4xf32>
    %cst_53 = arith.constant dense<0.000000e+00> : vector<16x192xf32>
    %110 = tpu.matmul %109, %35, %cst_53 {dimension_numbers = #tpu.dot_dimension_numbers<[1], [0], [0], [1], [0, 0, 1, 1], [], []>} : vector<16x4xf32>, vector<4x192xf32>, vector<16x192xf32> -> vector<16x192xf32>
    %111 = arith.mulf %110, %44 : vector<16x192xf32>
    %112 = arith.addf %108, %111 : vector<16x192xf32>
    %113 = arith.mulf %38, %39 : vector<16x192xf32>
    %cst_54 = arith.constant dense<0.000000e+00> : vector<16x4xf32>
    %114 = tpu.matmul %113, %34, %cst_54 {dimension_numbers = #tpu.dot_dimension_numbers<[1], [0], [0], [1], [0, 0, 1, 1], [], []>} : vector<16x192xf32>, vector<192x4xf32>, vector<16x4xf32> -> vector<16x4xf32>
    %115 = arith.mulf %38, %40 : vector<16x192xf32>
    %cst_55 = arith.constant dense<0.000000e+00> : vector<16x4xf32>
    %116 = tpu.matmul %115, %34, %cst_55 {dimension_numbers = #tpu.dot_dimension_numbers<[1], [0], [0], [1], [0, 0, 1, 1], [], []>} : vector<16x192xf32>, vector<192x4xf32>, vector<16x4xf32> -> vector<16x4xf32>
    %117 = arith.mulf %38, %41 : vector<16x192xf32>
    %cst_56 = arith.constant dense<0.000000e+00> : vector<16x4xf32>
    %118 = tpu.matmul %117, %34, %cst_56 {dimension_numbers = #tpu.dot_dimension_numbers<[1], [0], [0], [1], [0, 0, 1, 1], [], []>} : vector<16x192xf32>, vector<192x4xf32>, vector<16x4xf32> -> vector<16x4xf32>
    %119 = arith.maximumf %114, %116 : vector<16x4xf32>
    %120 = arith.maximumf %119, %118 : vector<16x4xf32>
    %121 = arith.subf %114, %120 : vector<16x4xf32>
    %122 = math.exp %121 : vector<16x4xf32>
    %123 = arith.subf %116, %120 : vector<16x4xf32>
    %124 = math.exp %123 : vector<16x4xf32>
    %125 = arith.subf %118, %120 : vector<16x4xf32>
    %126 = math.exp %125 : vector<16x4xf32>
    %127 = arith.addf %122, %124 : vector<16x4xf32>
    %128 = arith.addf %127, %126 : vector<16x4xf32>
    %129 = tpu.reciprocal %128 {approx = true} : vector<16x4xf32> -> vector<16x4xf32>
    %130 = arith.mulf %128, %129 : vector<16x4xf32>
    %cst_57 = arith.constant 2.000000e+00 : f32
    %131 = vector.broadcast %cst_57 : f32 to vector<16x4xf32>
    %132 = arith.subf %131, %130 : vector<16x4xf32>
    %133 = arith.mulf %129, %132 : vector<16x4xf32>
    %cst_58 = arith.constant 0.000000e+00 : f32
    %134 = vector.broadcast %cst_58 : f32 to vector<16x192xf32>
    %135 = arith.mulf %122, %133 : vector<16x4xf32>
    %cst_59 = arith.constant dense<0.000000e+00> : vector<16x192xf32>
    %136 = tpu.matmul %135, %35, %cst_59 {dimension_numbers = #tpu.dot_dimension_numbers<[1], [0], [0], [1], [0, 0, 1, 1], [], []>} : vector<16x4xf32>, vector<4x192xf32>, vector<16x192xf32> -> vector<16x192xf32>
    %137 = arith.mulf %136, %42 : vector<16x192xf32>
    %138 = arith.addf %134, %137 : vector<16x192xf32>
    %139 = arith.mulf %124, %133 : vector<16x4xf32>
    %cst_60 = arith.constant dense<0.000000e+00> : vector<16x192xf32>
    %140 = tpu.matmul %139, %35, %cst_60 {dimension_numbers = #tpu.dot_dimension_numbers<[1], [0], [0], [1], [0, 0, 1, 1], [], []>} : vector<16x4xf32>, vector<4x192xf32>, vector<16x192xf32> -> vector<16x192xf32>
    %141 = arith.mulf %140, %43 : vector<16x192xf32>
    %142 = arith.addf %138, %141 : vector<16x192xf32>
    %143 = arith.mulf %126, %133 : vector<16x4xf32>
    %cst_61 = arith.constant dense<0.000000e+00> : vector<16x192xf32>
    %144 = tpu.matmul %143, %35, %cst_61 {dimension_numbers = #tpu.dot_dimension_numbers<[1], [0], [0], [1], [0, 0, 1, 1], [], []>} : vector<16x4xf32>, vector<4x192xf32>, vector<16x192xf32> -> vector<16x192xf32>
    %145 = arith.mulf %144, %44 : vector<16x192xf32>
    %146 = arith.addf %142, %145 : vector<16x192xf32>
    %147 = tpu.concatenate %78, %112, %146 in 0 : vector<16x192xf32>, vector<16x192xf32>, vector<16x192xf32> -> vector<48x192xf32>
    %c0_62 = arith.constant 0 : index
    %c0_63 = arith.constant 0 : index
    %148 = vector.load %arg16[%c0_62, %c0_63] : memref<192x192xf32, #tpu.memory_space<vmem>>, vector<192x192xf32>
    %cst_64 = arith.constant dense<0.000000e+00> : vector<48x192xf32>
    %149 = tpu.matmul %147, %148, %cst_64 {dimension_numbers = #tpu.dot_dimension_numbers<[1], [0], [0], [1], [0, 0, 1, 1], [], []>} : vector<48x192xf32>, vector<192x192xf32>, vector<48x192xf32> -> vector<48x192xf32>
    %c0_65 = arith.constant 0 : index
    %c0_66 = arith.constant 0 : index
    %150 = vector.load %arg17[%c0_65, %c0_66] : memref<1x192xf32, #tpu.memory_space<vmem>>, vector<1x192xf32>
    %151 = vector.broadcast %150 : vector<1x192xf32> to vector<48x192xf32>
    %152 = arith.addf %149, %151 : vector<48x192xf32>
    %cst_67 = arith.constant dense<0.000000e+00> : vector<48xf32>
    %153 = vector.multi_reduction <add>, %152, %cst_67 [1] : vector<48x192xf32> to vector<48xf32>
    %154 = vector.shape_cast %153 : vector<48xf32> to vector<48x1xf32>
    %cst_68 = arith.constant 1.920000e+02 : f32
    %155 = vector.broadcast %cst_68 : f32 to vector<48x1xf32>
    %156 = arith.divf %154, %155 : vector<48x1xf32>
    %157 = arith.mulf %152, %152 : vector<48x192xf32>
    %cst_69 = arith.constant dense<0.000000e+00> : vector<48xf32>
    %158 = vector.multi_reduction <add>, %157, %cst_69 [1] : vector<48x192xf32> to vector<48xf32>
    %159 = vector.shape_cast %158 : vector<48xf32> to vector<48x1xf32>
    %cst_70 = arith.constant 1.920000e+02 : f32
    %160 = vector.broadcast %cst_70 : f32 to vector<48x1xf32>
    %161 = arith.divf %159, %160 : vector<48x1xf32>
    %162 = arith.mulf %156, %156 : vector<48x1xf32>
    %163 = arith.subf %161, %162 : vector<48x1xf32>
    %164 = vector.broadcast %156 : vector<48x1xf32> to vector<48x192xf32>
    %165 = arith.subf %152, %164 : vector<48x192xf32>
    %cst_71 = arith.constant 9.99999974E-6 : f32
    %166 = vector.broadcast %cst_71 : f32 to vector<48x1xf32>
    %167 = arith.addf %163, %166 : vector<48x1xf32>
    %168 = math.rsqrt %167 : vector<48x1xf32>
    %169 = vector.broadcast %168 : vector<48x1xf32> to vector<48x192xf32>
    %170 = arith.mulf %165, %169 : vector<48x192xf32>
    %c0_72 = arith.constant 0 : index
    %c0_73 = arith.constant 0 : index
    %171 = vector.load %arg18[%c0_72, %c0_73] : memref<1x192xf32, #tpu.memory_space<vmem>>, vector<1x192xf32>
    %172 = vector.broadcast %171 : vector<1x192xf32> to vector<48x192xf32>
    %173 = arith.mulf %170, %172 : vector<48x192xf32>
    %c0_74 = arith.constant 0 : index
    %c0_75 = arith.constant 0 : index
    %174 = vector.load %arg19[%c0_74, %c0_75] : memref<1x192xf32, #tpu.memory_space<vmem>>, vector<1x192xf32>
    %175 = vector.broadcast %174 : vector<1x192xf32> to vector<48x192xf32>
    %176 = arith.addf %173, %175 : vector<48x192xf32>
    %177 = vector.shape_cast %176 : vector<48x192xf32> to vector<3x16x192xf32>
    %c0_76 = arith.constant 0 : index
    %c0_77 = arith.constant 0 : index
    %c0_78 = arith.constant 0 : index
    %178 = vector.load %arg22[%c0_76, %c0_77, %c0_78] : memref<3x16x192xf32, #tpu.memory_space<vmem>>, vector<3x16x192xf32>
    tpu.vector_store %arg22[%c0_76, %c0_77, %c0_78], %177 {strides = array<i32>} : memref<3x16x192xf32, #tpu.memory_space<vmem>>, vector<3x16x192xf32>,
    return
  }
  func.func @transform_0(%arg0: i32) -> (i32, i32) {
    %c0_i32 = arith.constant 0 : i32
    %c0_i32_0 = arith.constant 0 : i32
    return %arg0, %c0_i32 : i32, i32
  }
  func.func @transform_1(%arg0: i32) -> (i32, i32) {
    %c0_i32 = arith.constant 0 : i32
    %c0_i32_0 = arith.constant 0 : i32
    return %arg0, %c0_i32 : i32, i32
  }
  func.func @transform_2(%arg0: i32) -> (i32, i32) {
    %c0_i32 = arith.constant 0 : i32
    %c0_i32_0 = arith.constant 0 : i32
    return %arg0, %c0_i32 : i32, i32
  }
  func.func @transform_3(%arg0: i32) -> (i32, i32) {
    %c0_i32 = arith.constant 0 : i32
    %c0_i32_0 = arith.constant 0 : i32
    %c0_i32_1 = arith.constant 0 : i32
    return %c0_i32, %c0_i32_0 : i32, i32
  }
  func.func @transform_4(%arg0: i32) -> (i32, i32) {
    %c0_i32 = arith.constant 0 : i32
    %c0_i32_0 = arith.constant 0 : i32
    %c0_i32_1 = arith.constant 0 : i32
    return %c0_i32, %c0_i32_0 : i32, i32
  }
  func.func @transform_5(%arg0: i32) -> (i32, i32) {
    %c0_i32 = arith.constant 0 : i32
    %c0_i32_0 = arith.constant 0 : i32
    %c0_i32_1 = arith.constant 0 : i32
    return %c0_i32, %c0_i32_0 : i32, i32
  }
  func.func @transform_6(%arg0: i32) -> (i32, i32) {
    %c0_i32 = arith.constant 0 : i32
    %c0_i32_0 = arith.constant 0 : i32
    %c0_i32_1 = arith.constant 0 : i32
    return %c0_i32, %c0_i32_0 : i32, i32
  }
  func.func @transform_7(%arg0: i32) -> (i32, i32) {
    %c0_i32 = arith.constant 0 : i32
    %c0_i32_0 = arith.constant 0 : i32
    %c0_i32_1 = arith.constant 0 : i32
    return %c0_i32, %c0_i32_0 : i32, i32
  }
  func.func @transform_8(%arg0: i32) -> (i32, i32) {
    %c0_i32 = arith.constant 0 : i32
    %c0_i32_0 = arith.constant 0 : i32
    %c0_i32_1 = arith.constant 0 : i32
    return %c0_i32, %c0_i32_0 : i32, i32
  }
  func.func @transform_9(%arg0: i32) -> (i32, i32) {
    %c0_i32 = arith.constant 0 : i32
    %c0_i32_0 = arith.constant 0 : i32
    %c0_i32_1 = arith.constant 0 : i32
    return %c0_i32, %c0_i32_0 : i32, i32
  }
  func.func @transform_10(%arg0: i32) -> (i32, i32) {
    %c0_i32 = arith.constant 0 : i32
    %c0_i32_0 = arith.constant 0 : i32
    %c0_i32_1 = arith.constant 0 : i32
    return %c0_i32, %c0_i32_0 : i32, i32
  }
  func.func @transform_11(%arg0: i32) -> (i32, i32) {
    %c0_i32 = arith.constant 0 : i32
    %c0_i32_0 = arith.constant 0 : i32
    %c0_i32_1 = arith.constant 0 : i32
    return %c0_i32, %c0_i32_0 : i32, i32
  }
  func.func @transform_12(%arg0: i32) -> (i32, i32) {
    %c0_i32 = arith.constant 0 : i32
    %c0_i32_0 = arith.constant 0 : i32
    %c0_i32_1 = arith.constant 0 : i32
    return %c0_i32, %c0_i32_0 : i32, i32
  }
  func.func @transform_13(%arg0: i32) -> (i32, i32) {
    %c0_i32 = arith.constant 0 : i32
    %c0_i32_0 = arith.constant 0 : i32
    %c0_i32_1 = arith.constant 0 : i32
    return %c0_i32, %c0_i32_0 : i32, i32
  }
  func.func @transform_14(%arg0: i32) -> (i32, i32) {
    %c0_i32 = arith.constant 0 : i32
    %c0_i32_0 = arith.constant 0 : i32
    %c0_i32_1 = arith.constant 0 : i32
    return %c0_i32, %c0_i32_0 : i32, i32
  }
  func.func @transform_15(%arg0: i32) -> (i32, i32) {
    %c0_i32 = arith.constant 0 : i32
    %c0_i32_0 = arith.constant 0 : i32
    %c0_i32_1 = arith.constant 0 : i32
    return %c0_i32, %c0_i32_0 : i32, i32
  }
  func.func @transform_16(%arg0: i32) -> (i32, i32) {
    %c0_i32 = arith.constant 0 : i32
    %c0_i32_0 = arith.constant 0 : i32
    %c0_i32_1 = arith.constant 0 : i32
    return %c0_i32, %c0_i32_0 : i32, i32
  }
  func.func @transform_17(%arg0: i32) -> (i32, i32) {
    %c0_i32 = arith.constant 0 : i32
    %c0_i32_0 = arith.constant 0 : i32
    %c0_i32_1 = arith.constant 0 : i32
    return %c0_i32, %c0_i32_0 : i32, i32
  }
  func.func @transform_18(%arg0: i32) -> (i32, i32) {
    %c0_i32 = arith.constant 0 : i32
    %c0_i32_0 = arith.constant 0 : i32
    %c0_i32_1 = arith.constant 0 : i32
    return %c0_i32, %c0_i32_0 : i32, i32
  }
  func.func @transform_19(%arg0: i32) -> (i32, i32) {
    %c0_i32 = arith.constant 0 : i32
    %c0_i32_0 = arith.constant 0 : i32
    %c0_i32_1 = arith.constant 0 : i32
    return %c0_i32, %c0_i32_0 : i32, i32
  }
  func.func @transform_20(%arg0: i32) -> (i32, i32) {
    %c0_i32 = arith.constant 0 : i32
    %c0_i32_0 = arith.constant 0 : i32
    %c0_i32_1 = arith.constant 0 : i32
    return %c0_i32, %c0_i32_0 : i32, i32
  }
  func.func @transform_21(%arg0: i32) -> (i32, i32, i32) {
    %c0_i32 = arith.constant 0 : i32
    %c0_i32_0 = arith.constant 0 : i32
    %c0_i32_1 = arith.constant 0 : i32
    return %c0_i32, %arg0, %c0_i32_0 : i32, i32, i32
  }
}

</mosaic_0001>

<bundles_post_ra>
// kernel: tpu_custom_call.1
= control target key start
LH: loop header
LB: loop body
LE: loop exit
PB: predicated region body
PF: predicated region fallthrough
CT: control target
= control target key end

     0   :  { %s4866_s0 = inlined_call_operand.hbm [shape: f32[16,48], index: 0, kind: input, shape index: {}]   ;;  %s4867_s1 = inlined_call_operand.hbm [shape: f32[16,64], index: 1, kind: input, shape index: {}]   ;;  %s4868_s2 = inlined_call_operand.hbm [shape: f32[16,32], index: 2, kind: input, shape index: {}]   ;;  %s4869_s3 = inlined_call_operand.hbm [shape: f32[48,192], index: 3, kind: input, shape index: {}]   ;;  %s4870_s4 = inlined_call_operand.vmem [shape: f32[1,192], index: 4, kind: input, shape index: {}]   ;;  %s4871_s5 = inlined_call_operand.vmem [shape: f32[64,192], index: 5, kind: input, shape index: {}]   ;;  %s4872_s6 = inlined_call_operand.vmem [shape: f32[1,192], index: 6, kind: input, shape index: {}]   ;;  %s4873_s7 = inlined_call_operand.vmem [shape: f32[32,192], index: 7, kind: input, shape index: {}]   ;;  %s4874_s8 = inlined_call_operand.hbm [shape: f32[1,192], index: 8, kind: input, shape index: {}]   ;;  %s4875_s9 = inlined_call_operand.hbm [shape: f32[192,192], index: 9, kind: input, shape index: {}]   ;;  %s4876_s10 = inlined_call_operand.vmem [shape: f32[1,192], index: 10, kind: input, shape index: {}]   ;;  %s4877_s11 = inlined_call_operand.hbm [shape: f32[192,192], index: 11, kind: input, shape index: {}]   ;;  %s4878_s12 = inlined_call_operand.vmem [shape: f32[1,192], index: 12, kind: input, shape index: {}]   ;;  %s4879_s13 = inlined_call_operand.hbm [shape: f32[192,192], index: 13, kind: input, shape index: {}]   ;;  %s4880_s14 = inlined_call_operand.hbm [shape: f32[1,192], index: 14, kind: input, shape index: {}]   ;;  %s4881_s15 = inlined_call_operand.hbm [shape: f32[192,192], index: 15, kind: input, shape index: {}]   ;;  %s4882_s16 = inlined_call_operand.hbm [shape: f32[1,192], index: 16, kind: input, shape index: {}]   ;;  %s4883_s17 = inlined_call_operand.hbm [shape: f32[1,192], index: 17, kind: input, shape index: {}]   ;;  %s4884_s18 = inlined_call_operand.hbm [shape: f32[1,192], index: 18, kind: input, shape index: {}]   ;;  %s4885_s19 = inlined_call_operand.vmem [shape: f32[192,4], index: 19, kind: input, shape index: {}]   ;;  %s4886_s20 = inlined_call_operand.vmem [shape: f32[4,192], index: 20, kind: input, shape index: {}]   ;;  %s4887_s21 = inlined_call_operand.hbm [shape: f32[3,16,192], index: 21, kind: output, shape index: {}]  }
   0x1   :  { %4899 = sst [smem:[#allocation62_spill]] %s4866_s0 }
   0x2   :  { %4900 = sst [smem:[#allocation63_spill]] %s4867_s1 }
   0x3   :  { %4901 = sst [smem:[#allocation64_spill]] %s4868_s2 }
   0x4   :  { %4902 = sst [smem:[#allocation65_spill]] %s4869_s3 }
   0x5   :  { %4903 = sst [smem:[#allocation66_spill]] %s4870_s4 }
   0x6   :  { %4904 = sst [smem:[#allocation67_spill]] %s4871_s5 }
   0x7   :  { %26 = vsyncpa [#allocation3], 0 }
   0x8   :  { %27 = vsyncpa [#allocation6], 0 }
   0x9   :  { %28 = vsyncpa [#allocation9], 0 }
   0xa   :  { %29 = vsyncpa [#allocation12], 0 }
   0xb   :  { %30 = vsyncpa [#allocation15], 0 }
   0xc   :  { %31 = vsyncpa [#allocation18], 0 }
   0xd   :  { %32 = vsyncpa [#allocation21], 0 }
   0xe   :  { %33 = vsyncpa [#allocation4], 0  ;;  %s4905_s26 = sld [smem:[#allocation63_spill]]  ;;  %s3390_s3 = smov [#allocation5]  }
   0xf   :  { %s53_s28 = sshll.u32 %s3390_s3, 4  ;;  %s4906_s4 = sld [smem:[#allocation65_spill]]  ;;  %s54_s28 = int_to_ptr.vmem [resolvable:$true] %s53_s28 }
  0x10   :  { %s4889_s5 = smov 128   ;;  %s3392_s22 = smov 8  }
  0x11   :  { %s3393_s23 = smov [#allocation8]   ;;  %s3394_s24 = smov 256  }
  0x12   :  { %s79_s1 = sshll.u32 %s3393_s23, 4  ;;  %s3395_s2 = smov 16   ;;  %s80_s1 = int_to_ptr.vmem [resolvable:$true] %s79_s1 }
  0x13   :  { %s109_s3 = sshll.u32 %s4875_s9, 4  ;;  %s3396_s29 = smov [#allocation11]   ;;  %s110_s3 = int_to_ptr.hbm [resolvable:$true] %s109_s3 }
  0x14   :  { %s51_s27 = sshll.u32 %s4905_s26, 4  ;;  %s111_s0 = sshll.u32 %s3396_s29, 4  ;;  %s52_s27 = int_to_ptr.hbm [resolvable:$true] %s51_s27  ;;  %s112_s0 = int_to_ptr.vmem [resolvable:$true] %s111_s0 }
  0x15   :  { %s77_s30 = sshll.u32 %s4906_s4, 4  ;;  %s3397_s23 = smov [#allocation14]   ;;  %s78_s30 = int_to_ptr.hbm [resolvable:$true] %s77_s30 }
  0x16   :  { %59 = dma.hbm_to_vmem [thread:$0]  %s52_s27, 256, %s54_s28, [#allocation6], %s4889_s5, %s4889_s5, %s3392_s22  }
  0x17   :  { %85 = dma.hbm_to_vmem [thread:$0]  %s78_s30, 1536, %s80_s1, [#allocation9], %s3394_s24, %s3394_s24, %s3395_s2  }
  0x18   :  { %s139_s28 = sshll.u32 %s4879_s13, 4  ;;  %s141_s5 = sshll.u32 %s3397_s23, 4  ;;  %s140_s28 = int_to_ptr.hbm [resolvable:$true] %s139_s28  ;;  %s142_s5 = int_to_ptr.vmem [resolvable:$true] %s141_s5 }
  0x19   :  { %117 = dma.hbm_to_vmem [thread:$0]  %s110_s3, 6144, %s112_s0, [#allocation12], %s3394_s24, %s3394_s24, %s3395_s2  }
  0x1a   :  { %s163_s25 = sshll.u32 %s4881_s15, 4  ;;  %s188_s13 = sshll.u32 %s4883_s17, 4  ;;  %s164_s25 = int_to_ptr.hbm [resolvable:$true] %s163_s25  ;;  %s189_s13 = int_to_ptr.hbm [resolvable:$true] %s188_s13 }
  0x1b   :  { %147 = dma.hbm_to_vmem [thread:$0]  %s140_s28, 6144, %s142_s5, [#allocation15], %s3394_s24, %s3394_s24, %s3395_s2  }
  0x1c   :  { %s3398_s29 = smov [#allocation17]   ;;  %s3399_s3 = smov [#allocation20]  }
  0x1d   :  { %s165_s4 = sshll.u32 %s3398_s29, 4  ;;  %s190_s15 = sshll.u32 %s3399_s3, 4  ;;  %s166_s4 = int_to_ptr.vmem [resolvable:$true] %s165_s4  ;;  %s191_s15 = int_to_ptr.vmem [resolvable:$true] %s190_s15 }
  0x1e   :  { %171 = dma.hbm_to_vmem [thread:$0]  %s164_s25, 6144, %s166_s4, [#allocation18], %s3394_s24, %s3394_s24, %s3395_s2  }
  0x1f   :  { %s4907_s23 = sld [smem:[#allocation62_spill]]  ;;  %s3400_s9 = smov [#allocation2]  }
  0x20   :  { %193 = dma.hbm_to_vmem [thread:$0]  %s189_s13, 32, %s191_s15, [#allocation21]  }
  0x21   :  { %s4908_s17 = sld [smem:[#allocation64_spill]]  ;;  %s40_s26 = sshll.u32 %s3400_s9, 4  ;;  %s41_s26 = int_to_ptr.vmem [resolvable:$true] %s40_s26 }
  0x22   :  { %s4909_s29 = smov 128   ;;  %s3401_s25 = smov [#allocation7]  }
  0x23   :  { %s66_s4 = sshll.u32 %s3401_s25, 4  ;;  %s99_s27 = sshll.u32 %s4874_s8, 4  ;;  %s67_s4 = int_to_ptr.vmem [resolvable:$true] %s66_s4  ;;  %s100_s27 = int_to_ptr.hbm [resolvable:$true] %s99_s27 }
  0x24   :  { %s3402_s5 = smov [#allocation10]   ;;  %s153_s8 = sshll.u32 %s4880_s14, 4  ;;  %s154_s8 = int_to_ptr.hbm [resolvable:$true] %s153_s8 }
  0x25   :  { %s38_s30 = sshll.u32 %s4907_s23, 4  ;;  %s124_s23 = sshll.u32 %s4877_s11, 4  ;;  %s39_s30 = int_to_ptr.hbm [resolvable:$true] %s38_s30  ;;  %s125_s23 = int_to_ptr.hbm [resolvable:$true] %s124_s23 }
  0x26   :  { %46 = dma.hbm_to_vmem [thread:$0]  %s39_s30, 256, %s41_s26, [#allocation3], %s4909_s29, %s4909_s29, %s3392_s22  }
  0x27   :  { %s64_s1 = sshll.u32 %s4908_s17, 4  ;;  %s101_s28 = sshll.u32 %s3402_s5, 4  ;;  %s65_s1 = int_to_ptr.hbm [resolvable:$true] %s64_s1  ;;  %s102_s28 = int_to_ptr.vmem [resolvable:$true] %s101_s28 }
  0x28   :  { %72 = dma.hbm_to_vmem [thread:$0]  %s65_s1, 256, %s67_s4, [#allocation6], %s4909_s29, %s4909_s29, %s3392_s22  }
  0x29   :  { %104 = dma.hbm_to_vmem [thread:$0]  %s100_s27, 32, %s102_s28, [#allocation9]  }
  0x2a   :  { %s3403_s30 = smov [#allocation13]   ;;  %s177_s11 = sshll.u32 %s4882_s16, 4  ;;  %s178_s11 = int_to_ptr.hbm [resolvable:$true] %s177_s11 }
  0x2b   :  { %s126_s17 = sshll.u32 %s3403_s30, 4  ;;  %s3404_s29 = smov [#allocation16]   ;;  %s127_s17 = int_to_ptr.vmem [resolvable:$true] %s126_s17 }
  0x2c   :  { %132 = dma.hbm_to_vmem [thread:$0]  %s125_s23, 6144, %s127_s17, [#allocation12], %s3394_s24, %s3394_s24, %s3395_s2  }
  0x2d   :  { %s155_s25 = sshll.u32 %s3404_s29, 4  ;;  %s3405_s4 = smov [#allocation19]   ;;  %s156_s25 = int_to_ptr.vmem [resolvable:$true] %s155_s25 }
  0x2e   :  { %158 = dma.hbm_to_vmem [thread:$0]  %s154_s8, 32, %s156_s25, [#allocation15]  }
  0x2f   :  { %s179_s3 = sshll.u32 %s3405_s4, 4  ;;  %s199_s14 = sshll.u32 %s4884_s18, 4  ;;  %s180_s3 = int_to_ptr.vmem [resolvable:$true] %s179_s3  ;;  %s200_s14 = int_to_ptr.hbm [resolvable:$true] %s199_s14 }
  0x30   :  { %182 = dma.hbm_to_vmem [thread:$0]  %s178_s11, 32, %s180_s3, [#allocation18]  }
  0x31   :  { %s3406_s13 = smov [#allocation22]  }
  0x32   :  { %s201_s15 = sshll.u32 %s3406_s13, 4  ;;  %s202_s15 = int_to_ptr.vmem [resolvable:$true] %s201_s15 }
  0x33   :  { %204 = dma.hbm_to_vmem [thread:$0]  %s200_s14, 32, %s202_s15, [#allocation21]  }
  0x34   :  { %3374 = dma.done.wait [#allocation3], 256  }
  0x35   :  { %3375 = vsyncadd [#allocation3], 4294967040 }
  0x36   :  { %3376 = dma.done.wait [#allocation6], 512  }
  0x37   :  { %3377 = vsyncadd [#allocation6], 4294966784 }
  0x38   :  { %3378 = dma.done.wait [#allocation9], 1568  }
  0x39   :  { %3379 = vsyncadd [#allocation9], 4294965728 }
  0x3a   :  { %3380 = dma.done.wait [#allocation12], 12288  }
  0x3b   :  { %3381 = vsyncadd [#allocation12], 4294955008 }
  0x3c   :  { %3382 = dma.done.wait [#allocation15], 6176  }
  0x3d   :  { %3383 = vsyncadd [#allocation15], 4294961120 }
  0x3e   :  { %3384 = dma.done.wait [#allocation18], 6176  }
  0x3f   :  { %3385 = vsyncadd [#allocation18], 4294961120 }
  0x40   :  { %3386 = dma.done.wait [#allocation21], 64  }
  0x41   :  { %3387 = vsyncadd [#allocation21], 4294967232  ;;  %v273_v0 = vld [vmem:[#allocation8 + $0x50] sm:$0xff]  ;;  %v271_v1 = vld [vmem:[#allocation8 + $0x40] sm:$0xff]  ;;  %s4910_s23 = sld [smem:[#allocation67_spill]]  ;;  %vm281_vm0 = vcmask 392192  }
  0x42   :  { %298 = vmatpush.msra.mxu3 %v273_v0  ;;  %v274_v2 = vld [vmem:[#allocation8 + $0x58] sm:$0xff]  ;;  %v269_v3 = vld [vmem:[#allocation8 + $0x30] sm:$0xff]  ;;  %v272_v4 = vld [vmem:[#allocation8 + $0x48] sm:$0xff]  ;;  %vm358_vm1 = vcmask 523264   ;;  %vm427_vm2 = vcmask 261120   ;;  %s4911_s9 = sld [smem:[#allocation66_spill]] }
  0x43   :  { %321 = vmatpush.msra.mxu1 %v274_v2  ;;  %v270_v5 = vld [vmem:[#allocation8 + $0x38] sm:$0xff]  ;;  %v267_v6 = vld [vmem:[#allocation8 + $0x20] sm:$0xff]  ;;  %v268_v8 = vld [vmem:[#allocation8 + $0x28] sm:$0xff]  ;;  %vm1320_vm3 = vcmask 1043456   ;;  %vm1313_vm4 = vcmask 31744   ;;  %s2782_s11 = sshll.u32 %s4887_s21, 4  ;;  %s2783_s11 = int_to_ptr.hbm [resolvable:$true] %s2782_s11 }
  0x44   :  { %299 = vmatpush.msra.mxu3 %v271_v1  ;;  %v265_v10 = vld [vmem:[#allocation8 + $0x10] sm:$0xff]  ;;  %v266_v12 = vld [vmem:[#allocation8 + $0x18] sm:$0xff]  ;;  %v263_v13 = vld [vmem:[#allocation8] sm:$0xff] }
  0x45   :  { %322 = vmatpush.msra.mxu1 %v272_v4  ;;  %v261_v15 = vld [vmem:[#allocation2] sm:$0xff]  ;;  %v264_v16 = vld [vmem:[#allocation8 + $0x8] sm:$0xff]  ;;  %v420_v19 = vld [vmem:[%s4873_s7 + $0x38] sm:$0xff] }
  0x46   :  { %300 = vmatpush.msra.mxu3 %v269_v3  ;;  %v419_v21 = vld [vmem:[%s4873_s7 + $0x30] sm:$0xff]  ;;  %v418_v23 = vld [vmem:[%s4873_s7 + $0x28] sm:$0xff]  ;;  %v417_v25 = vld [vmem:[%s4873_s7 + $0x20] sm:$0xff] }
  0x47   :  { %v350_v7 = vld [vmem:[%s4910_s23 + $0x70] sm:$0xff]  ;;  %v348_v9 = vld [vmem:[%s4910_s23 + $0x60] sm:$0xff]  ;;  %323 = vmatpush.msra.mxu1 %v270_v5  ;;  %v351_v17 = vld [vmem:[%s4910_s23 + $0x78] sm:$0xff]  ;;  %446 = vmatpush.msra.mxu0 %v419_v21 }
  0x48   :  { %373 = vmatpush.msra.mxu2 %v350_v7  ;;  %v346_v11 = vld [vmem:[%s4910_s23 + $0x50] sm:$0xff]  ;;  %301 = vmatpush.msra.mxu3 %v267_v6  ;;  %v344_v14 = vld [vmem:[%s4910_s23 + $0x40] sm:$0xff]  ;;  %v349_v20 = vld [vmem:[%s4910_s23 + $0x68] sm:$0xff] }
  0x49   :  { %324 = vmatpush.msra.mxu1 %v268_v8  ;;  %v342_v18 = vld [vmem:[%s4910_s23 + $0x30] sm:$0xff]  ;;  %v340_v22 = vld [vmem:[%s4910_s23 + $0x20] sm:$0xff]  ;;  %v347_v24 = vld [vmem:[%s4910_s23 + $0x58] sm:$0xff]  ;;  %447 = vmatpush.msra.mxu0 %v417_v25 }
  0x4a   :  { %374 = vmatpush.msra.mxu2 %v348_v9  ;;  %302 = vmatpush.msra.mxu3 %v265_v10  ;;  %v338_v26 = vld [vmem:[%s4910_s23 + $0x10] sm:$0xff]  ;;  %v416_v27 = vld [vmem:[%s4873_s7 + $0x18] sm:$0xff]  ;;  %v345_v28 = vld [vmem:[%s4910_s23 + $0x48] sm:$0xff] }
  0x4b   :  { %325 = vmatpush.msra.mxu1 %v266_v12  ;;  %v415_v29 = vld [vmem:[%s4873_s7 + $0x10] sm:$0xff]  ;;  %v336_v31 = vld [vmem:[%s4910_s23] sm:$0xff]  ;;  %v343_v32 = vld [vmem:[%s4910_s23 + $0x38] sm:$0xff] }
  0x4c   :  { %375 = vmatpush.msra.mxu2 %v346_v11  ;;  %303 = vmatpush.msra.mxu3 %v263_v13  ;;  %v262_v30 = vld [vmem:[#allocation2 + $0x8] sm:$0xff]  ;;  %v334_v33 = vld [vmem:[#allocation5] sm:$0xff]  ;;  %v414_v34 = vld [vmem:[%s4873_s7 + $0x8] sm:$0xff] }
  0x4d   :  { %2801 = vmatmul.msk.f32.vlgmr.msra.gmra.mxu3 %vm281_vm0, %v261_v15  ;;  %326 = vmatpush.msra.mxu1 %v264_v16  ;;  %v341_v35 = vld [vmem:[%s4910_s23 + $0x28] sm:$0xff]  ;;  %v413_v36 = vld [vmem:[%s4873_s7] sm:$0xff]  ;;  %v339_v39 = vld [vmem:[%s4910_s23 + $0x18] sm:$0xff] }
  0x4e   :  { %376 = vmatpush.msra.mxu2 %v344_v14  ;;  %396 = vmatpush.msrb.mxu3 %v351_v17  ;;  %v411_v37 = vld [vmem:[#allocation7] sm:$0xff]  ;;  %v511_v40 = vld [vmem:[#allocation11 + $0xf8] sm:$0xff]  ;;  %v508_v41 = vld [vmem:[#allocation11 + $0xe0] sm:$0xff] }
  0x4f   :  { %2803 = vmatmul.msk.f32.vlgmr.msra.gmra.mxu1 %vm281_vm0, %v261_v15  ;;  %448 = vmatpush.msra.mxu0 %v415_v29  ;;  %v510_v38 = vld [vmem:[#allocation11 + $0xf0] sm:$0xff]  ;;  %v527_v42 = vld [vmem:[#allocation11 + $0x178] sm:$0xff]  ;;  %v509_v44 = vld [vmem:[#allocation11 + $0xe8] sm:$0xff] }
  0x50   :  { %377 = vmatpush.msra.mxu2 %v342_v18  ;;  %469 = vmatpush.msrb.mxu1 %v420_v19  ;;  %v337_v43 = vld [vmem:[%s4910_s23 + $0x8] sm:$0xff]  ;;  %v507_v46 = vld [vmem:[#allocation11 + $0xd8] sm:$0xff]  ;;  %v335_v47 = vld [vmem:[#allocation5 + $0x8] sm:$0xff] }
  0x51   :  { %397 = vmatpush.msrb.mxu3 %v349_v20  ;;  %449 = vmatpush.msra.mxu0 %v413_v36  ;;  %v506_v45 = vld [vmem:[#allocation11 + $0xd0] sm:$0xff]  ;;  %v504_v49 = vld [vmem:[#allocation11 + $0xc0] sm:$0xff]  ;;  %v505_v50 = vld [vmem:[#allocation11 + $0xc8] sm:$0xff] }
  0x52   :  { %378 = vmatpush.msra.mxu2 %v340_v22  ;;  %470 = vmatpush.msrb.mxu1 %v418_v23  ;;  %v526_v48 = vld [vmem:[#allocation11 + $0x170] sm:$0xff]  ;;  %v524_v52 = vld [vmem:[#allocation11 + $0x160] sm:$0xff]  ;;  %v503_v54 = vld [vmem:[#allocation11 + $0xb8] sm:$0xff] }
  0x53   :  { %398 = vmatpush.msrb.mxu3 %v347_v24  ;;  %2809 = vmatmul.msk.f32.vlgmr.msra.gmra.mxu0 %vm427_vm2, %v411_v37  ;;  %v412_v51 = vld [vmem:[#allocation7 + $0x8] sm:$0xff]  ;;  %v525_v55 = vld [vmem:[#allocation11 + $0x168] sm:$0xff]  ;;  %v500_v57 = vld [vmem:[#allocation11 + $0xa0] sm:$0xff] }
  0x54   :  { %379 = vmatpush.msra.mxu2 %v338_v26  ;;  %471 = vmatpush.msrb.mxu1 %v416_v27  ;;  %v502_v53 = vld [vmem:[#allocation11 + $0xb0] sm:$0xff]  ;;  %v501_v58 = vld [vmem:[#allocation11 + $0xa8] sm:$0xff]  ;;  %v523_v59 = vld [vmem:[#allocation11 + $0x158] sm:$0xff] }
  0x55   :  { %399 = vmatpush.msrb.mxu3 %v345_v28  ;;  %622 = vmatpush.msrb.mxu0 %v511_v40  ;;  %v522_v56 = vld [vmem:[#allocation11 + $0x150] sm:$0xff]  ;;  %v499_v61 = vld [vmem:[#allocation11 + $0x98] sm:$0xff]  ;;  %v520_v62 = vld [vmem:[#allocation11 + $0x140] sm:$0xff] }
  0x56   :  { %2802 = vmatmul.msk.f32.gmra.mxu3 %vm281_vm0, %v262_v30  ;;  %380 = vmatpush.msra.mxu2 %v336_v31  ;;  %v498_v60 = vld [vmem:[#allocation11 + $0x90] sm:$0xff]  ;;  %v496_v63 = vld [vmem:[#allocation11 + $0x80] sm:$0xff]  ;;  %v521_v0 = vld [vmem:[#allocation11 + $0x148] sm:$0xff] }
  0x57   :  { %400 = vmatpush.msrb.mxu3 %v343_v32  ;;  %2804 = vmatmul.msk.f32.gmra.mxu1 %vm281_vm0, %v262_v30  ;;  %v497_v1 = vld [vmem:[#allocation11 + $0x88] sm:$0xff]  ;;  %v518_v2 = vld [vmem:[#allocation11 + $0x130] sm:$0xff]  ;;  %v519_v4 = vld [vmem:[#allocation11 + $0x138] sm:$0xff] }
  0x58   :  { %2805 = vmatmul.msk.f32.vlgmr.msra.gmra.mxu2 %vm358_vm1, %v334_v33  ;;  %472 = vmatpush.msrb.mxu1 %v414_v34  ;;  %v494_v3 = vld [vmem:[#allocation11 + $0x70] sm:$0xff]  ;;  %v495_v5 = vld [vmem:[#allocation11 + $0x78] sm:$0xff]  ;;  %v516_v6 = vld [vmem:[#allocation11 + $0x120] sm:$0xff] }
  0x59   :  { %401 = vmatpush.msrb.mxu3 %v341_v35  ;;  %552 = vmatpush.msrb.mxu2 %v510_v38  ;;  %v492_v7 = vld [vmem:[#allocation11 + $0x60] sm:$0xff]  ;;  %v517_v8 = vld [vmem:[#allocation11 + $0x128] sm:$0xff]  ;;  %v514_v10 = vld [vmem:[#allocation11 + $0x110] sm:$0xff] }
  0x5a   :  { %665 = vmatpush.msra.mxu1 %v527_v42  ;;  %623 = vmatpush.msrb.mxu0 %v509_v44  ;;  %v493_v9 = vld [vmem:[#allocation11 + $0x68] sm:$0xff]  ;;  %v490_v11 = vld [vmem:[#allocation11 + $0x50] sm:$0xff]  ;;  %v491_v12 = vld [vmem:[#allocation11 + $0x58] sm:$0xff] }
  0x5b   :  { %402 = vmatpush.msrb.mxu3 %v339_v39  ;;  %553 = vmatpush.msrb.mxu2 %v508_v41  ;;  %v488_v13 = vld [vmem:[#allocation11 + $0x40] sm:$0xff]  ;;  %v489_v14 = vld [vmem:[#allocation11 + $0x48] sm:$0xff]  ;;  %v486_v15 = vld [vmem:[#allocation11 + $0x30] sm:$0xff] }
  0x5c   :  { %624 = vmatpush.msrb.mxu0 %v507_v46  ;;  %666 = vmatpush.msra.mxu1 %v525_v55  ;;  %v487_v16 = vld [vmem:[#allocation11 + $0x38] sm:$0xff]  ;;  %v484_v17 = vld [vmem:[#allocation11 + $0x20] sm:$0xff]  ;;  %v485_v18 = vld [vmem:[#allocation11 + $0x28] sm:$0xff] }
  0x5d   :  { %403 = vmatpush.msrb.mxu3 %v337_v43  ;;  %554 = vmatpush.msrb.mxu2 %v506_v45  ;;  %v482_v19 = vld [vmem:[#allocation11 + $0x10] sm:$0xff]  ;;  %v483_v20 = vld [vmem:[#allocation11 + $0x18] sm:$0xff]  ;;  %v512_v22 = vld [vmem:[#allocation11 + $0x100] sm:$0xff] }
  0x5e   :  { %2807 = vmatmul.msk.f32.vlgmr.msrb.gmra.mxu3 %vm358_vm1, %v334_v33  ;;  %625 = vmatpush.msrb.mxu0 %v505_v50  ;;  %v515_v21 = vld [vmem:[#allocation11 + $0x118] sm:$0xff]  ;;  %v480_v23 = vld [vmem:[#allocation11] sm:$0xff]  ;;  %v481_v24 = vld [vmem:[#allocation11 + $0x8] sm:$0xff] }
  0x5f   :  { %2811 = vmatmul.msk.f32.vlgmr.msrb.gmra.mxu1 %vm427_vm2, %v411_v37  ;;  %595 = vmatpush.msra.mxu3 %v526_v48  ;;  %v513_v25 = vld [vmem:[#allocation11 + $0x108] sm:$0xff]  ;;  %v722_v26 = vld [vmem:[#allocation13 + $0xf0] sm:$0xff]  ;;  %v723_v27 = vld [vmem:[#allocation13 + $0xf8] sm:$0xff] }
  0x60   :  { %2806 = vmatmul.msk.f32.gmra.mxu2 %vm358_vm1, %v335_v47  ;;  %2810 = vmatmul.msk.f32.gmra.mxu0 %vm427_vm2, %v412_v51  ;;  %v720_v28 = vld [vmem:[#allocation13 + $0xe0] sm:$0xff]  ;;  %v721_v29 = vld [vmem:[#allocation13 + $0xe8] sm:$0xff]  ;;  %v718_v30 = vld [vmem:[#allocation13 + $0xd0] sm:$0xff] }
  0x61   :  { %555 = vmatpush.msrb.mxu2 %v504_v49  ;;  %596 = vmatpush.msra.mxu3 %v524_v52  ;;  %v719_v31 = vld [vmem:[#allocation13 + $0xd8] sm:$0xff]  ;;  %v738_v32 = vld [vmem:[#allocation13 + $0x170] sm:$0xff]  ;;  %v716_v34 = vld [vmem:[#allocation13 + $0xc0] sm:$0xff] }
  0x62   :  { %626 = vmatpush.msrb.mxu0 %v503_v54  ;;  %667 = vmatpush.msra.mxu1 %v523_v59  ;;  %v739_v33 = vld [vmem:[#allocation13 + $0x178] sm:$0xff]  ;;  %v717_v35 = vld [vmem:[#allocation13 + $0xc8] sm:$0xff]  ;;  %v714_v36 = vld [vmem:[#allocation13 + $0xb0] sm:$0xff] }
  0x63   :  { %556 = vmatpush.msrb.mxu2 %v502_v53  ;;  %597 = vmatpush.msra.mxu3 %v522_v56  ;;  %v715_v37 = vld [vmem:[#allocation13 + $0xb8] sm:$0xff]  ;;  %v736_v38 = vld [vmem:[#allocation13 + $0x160] sm:$0xff]  ;;  %v737_v39 = vld [vmem:[#allocation13 + $0x168] sm:$0xff] }
  0x64   :  { %627 = vmatpush.msrb.mxu0 %v501_v58  ;;  %668 = vmatpush.msra.mxu1 %v521_v0  ;;  %v712_v40 = vld [vmem:[#allocation13 + $0xa0] sm:$0xff]  ;;  %v713_v41 = vld [vmem:[#allocation13 + $0xa8] sm:$0xff]  ;;  %v710_v42 = vld [vmem:[#allocation13 + $0x90] sm:$0xff] }
  0x65   :  { %557 = vmatpush.msrb.mxu2 %v500_v57  ;;  %598 = vmatpush.msra.mxu3 %v520_v62  ;;  %v711_v43 = vld [vmem:[#allocation13 + $0x98] sm:$0xff]  ;;  %v734_v44 = vld [vmem:[#allocation13 + $0x150] sm:$0xff]  ;;  %v275_v45 = vld [vmem:[%s4911_s9] sm:$0x3] }
  0x66   :  { %2808 = vmatmul.msk.f32.gmra.mxu3 %vm358_vm1, %v335_v47  ;;  %628 = vmatpush.msrb.mxu0 %v499_v61  ;;  %v735_v46 = vld [vmem:[#allocation13 + $0x158] sm:$0xff]  ;;  %v278_v47 = vperm.slane %v275_v45, 1  ;;  %v708_v48 = vld [vmem:[#allocation13 + $0x80] sm:$0xff]  ;;  %v709_v49 = vld [vmem:[#allocation13 + $0x88] sm:$0xff]  ;;  %v277_v55 = vperm.slane %v275_v45, 0 }
  0x67   :  { %2812 = vmatmul.msk.f32.gmra.mxu1 %vm427_vm2, %v412_v51  ;;  %558 = vmatpush.msrb.mxu2 %v498_v60  ;;  %v706_v52 = vld [vmem:[#allocation13 + $0x70] sm:$0xff]  ;;  %v707_v53 = vld [vmem:[#allocation13 + $0x78] sm:$0xff]  ;;  %v732_v54 = vld [vmem:[#allocation13 + $0x140] sm:$0xff] }
  0x68   :  { %629 = vmatpush.msrb.mxu0 %v497_v1  ;;  %599 = vmatpush.msra.mxu3 %v518_v2  ;;  %v733_v56 = vld [vmem:[#allocation13 + $0x148] sm:$0xff]  ;;  %v704_v57 = vld [vmem:[#allocation13 + $0x60] sm:$0xff]  ;;  %v702_v59 = vld [vmem:[#allocation13 + $0x50] sm:$0xff] }
  0x69   :  { %559 = vmatpush.msrb.mxu2 %v496_v63  ;;  %669 = vmatpush.msra.mxu1 %v519_v4  ;;  %v705_v58 = vld [vmem:[#allocation13 + $0x68] sm:$0xff]  ;;  %v703_v60 = vld [vmem:[#allocation13 + $0x58] sm:$0xff]  ;;  %v730_v1 = vld [vmem:[#allocation13 + $0x130] sm:$0xff] }
  0x6a   :  { %630 = vmatpush.msrb.mxu0 %v495_v5  ;;  %600 = vmatpush.msra.mxu3 %v516_v6  ;;  %v731_v2 = vld [vmem:[#allocation13 + $0x138] sm:$0xff]  ;;  %v701_v4 = vld [vmem:[#allocation13 + $0x48] sm:$0xff]  ;;  %v698_v5 = vld [vmem:[#allocation13 + $0x30] sm:$0xff] }
  0x6b   :  { %560 = vmatpush.msrb.mxu2 %v494_v3  ;;  %670 = vmatpush.msra.mxu1 %v517_v8  ;;  %v700_v3 = vld [vmem:[#allocation13 + $0x40] sm:$0xff]  ;;  %v699_v6 = vld [vmem:[#allocation13 + $0x38] sm:$0xff]  ;;  %v729_v8 = vld [vmem:[#allocation13 + $0x128] sm:$0xff] }
  0x6c   :  { %631 = vmatpush.msrb.mxu0 %v493_v9  ;;  %601 = vmatpush.msra.mxu3 %v514_v10  ;;  %v352_v10 = vld [vmem:[%s4872_s6] sm:$0x3]  ;;  %v912_v45 = vld [vmem:[#allocation14 + $0xd0] sm:$0xff] }
  0x6d   :  { %561 = vmatpush.msrb.mxu2 %v492_v7  ;;  %671 = vmatpush.msra.mxu1 %v515_v21  ;;  %v728_v7 = vld [vmem:[#allocation13 + $0x120] sm:$0xff] }
  0x6e   :  { %632 = vmatpush.msrb.mxu0 %v491_v12  ;;  %602 = vmatpush.msra.mxu3 %v512_v22  ;;  %v696_v12 = vld [vmem:[#allocation13 + $0x20] sm:$0xff]  ;;  %v693_v22 = vld [vmem:[#allocation13 + $0x8] sm:$0xff] }
  0x6f   :  { %562 = vmatpush.msrb.mxu2 %v490_v11  ;;  %672 = vmatpush.msra.mxu1 %v513_v25  ;;  %v692_v21 = vld [vmem:[#allocation13] sm:$0xff] }
  0x70   :  { %633 = vmatpush.msrb.mxu0 %v489_v14  ;;  %746 = vmatpush.msrb.mxu3 %v722_v26 }
  0x71   :  { %563 = vmatpush.msrb.mxu2 %v488_v13  ;;  %789 = vmatpush.msrb.mxu1 %v738_v32  ;;  %v697_v13 = vld [vmem:[#allocation13 + $0x28] sm:$0xff] }
  0x72   :  { %634 = vmatpush.msrb.mxu0 %v487_v16  ;;  %747 = vmatpush.msrb.mxu3 %v720_v28  ;;  %v694_v16 = vld [vmem:[#allocation13 + $0x10] sm:$0xff] }
  0x73   :  { %564 = vmatpush.msrb.mxu2 %v486_v15  ;;  %790 = vmatpush.msrb.mxu1 %v736_v38  ;;  %v354_v15 = vperm.slane %v352_v10, 0 }
  0x74   :  { %635 = vmatpush.msrb.mxu0 %v485_v18  ;;  %748 = vmatpush.msrb.mxu3 %v718_v30  ;;  %v726_v18 = vld [vmem:[#allocation13 + $0x110] sm:$0xff] }
  0x75   :  { %565 = vmatpush.msrb.mxu2 %v484_v17  ;;  %791 = vmatpush.msrb.mxu1 %v734_v44  ;;  %v695_v17 = vld [vmem:[#allocation13 + $0x18] sm:$0xff]  ;;  %v915_v44 = vld [vmem:[#allocation14 + $0xe8] sm:$0xff] }
  0x76   :  { %636 = vmatpush.msrb.mxu0 %v483_v20  ;;  %749 = vmatpush.msrb.mxu3 %v716_v34  ;;  %v727_v20 = vld [vmem:[#allocation13 + $0x118] sm:$0xff] }
  0x77   :  { %566 = vmatpush.msrb.mxu2 %v482_v19  ;;  %792 = vmatpush.msrb.mxu1 %v732_v54  ;;  %v355_v19 = vperm.slane %v352_v10, 1  ;;  %v906_v54 = vld [vmem:[#allocation14 + $0xa0] sm:$0xff]  ;;  %v896_v10 = vld [vmem:[#allocation14 + $0x50] sm:$0xff] }
  0x78   :  { %637 = vmatpush.msrb.mxu0 %v481_v24  ;;  %750 = vmatpush.msrb.mxu3 %v714_v36  ;;  %v725_v24 = vld [vmem:[#allocation13 + $0x108] sm:$0xff] }
  0x79   :  { %567 = vmatpush.msrb.mxu2 %v480_v23  ;;  %793 = vmatpush.msrb.mxu1 %v730_v1  ;;  %v724_v23 = vld [vmem:[#allocation13 + $0x100] sm:$0xff]  ;;  %v900_v1 = vld [vmem:[#allocation14 + $0x70] sm:$0xff] }
  0x7a   :  { %859 = vmatpush.msra.mxu0 %v739_v33  ;;  %751 = vmatpush.msrb.mxu3 %v712_v40 }
  0x7b   :  { %816 = vmatpush.msra.mxu2 %v723_v27  ;;  %794 = vmatpush.msrb.mxu1 %v728_v7  ;;  %v899_v7 = vld [vmem:[#allocation14 + $0x68] sm:$0xff] }
  0x7c   :  { %860 = vmatpush.msra.mxu0 %v737_v39  ;;  %752 = vmatpush.msrb.mxu3 %v710_v42  ;;  %v917_v42 = vld [vmem:[#allocation14 + $0xf8] sm:$0xff] }
  0x7d   :  { %817 = vmatpush.msra.mxu2 %v721_v29  ;;  %795 = vmatpush.msrb.mxu1 %v726_v18  ;;  %v923_v18 = vld [vmem:[#allocation14 + $0x128] sm:$0xff] }
  0x7e   :  { %861 = vmatpush.msra.mxu0 %v735_v46  ;;  %753 = vmatpush.msrb.mxu3 %v708_v48  ;;  %v913_v46 = vld [vmem:[#allocation14 + $0xd8] sm:$0xff] }
  0x7f   :  { %818 = vmatpush.msra.mxu2 %v719_v31  ;;  %796 = vmatpush.msrb.mxu1 %v724_v23  ;;  %v421_v31 = vld [vmem:[#allocation10] sm:$0x3]  ;;  %v890_v23 = vld [vmem:[#allocation14 + $0x20] sm:$0xff] }
  0x80   :  { %754 = vmatpush.msrb.mxu3 %v706_v52  ;;  %862 = vmatpush.msra.mxu0 %v733_v56  ;;  %v424_v36 = vperm.slane %v421_v31, 1  ;;  %v908_v52 = vld [vmem:[#allocation14 + $0xb0] sm:$0xff] }
  0x81   :  { %819 = vmatpush.msra.mxu2 %v717_v35  ;;  %v423_v35 = vperm.slane %v421_v31, 0  ;;  %v904_v56 = vld [vmem:[#allocation14 + $0x90] sm:$0xff]  ;;  %v889_v31 = vld [vmem:[#allocation14 + $0x18] sm:$0xff] }
  0x82   :  { %755 = vmatpush.msrb.mxu3 %v704_v57  ;;  %863 = vmatpush.msra.mxu0 %v731_v2  ;;  %v905_v57 = vld [vmem:[#allocation14 + $0x98] sm:$0xff] }
  0x83   :  { %820 = vmatpush.msra.mxu2 %v715_v37  ;;  %v901_v2 = vld [vmem:[#allocation14 + $0x78] sm:$0xff] }
  0x84   :  { %756 = vmatpush.msrb.mxu3 %v702_v59  ;;  %864 = vmatpush.msra.mxu0 %v729_v8  ;;  %v903_v59 = vld [vmem:[#allocation14 + $0x88] sm:$0xff]  ;;  %v926_v8 = vld [vmem:[#allocation14 + $0x140] sm:$0xff] }
  0x85   :  { %821 = vmatpush.msra.mxu2 %v713_v41  ;;  %v916_v41 = vld [vmem:[#allocation14 + $0xf0] sm:$0xff] }
  0x86   :  { %757 = vmatpush.msrb.mxu3 %v700_v3  ;;  %865 = vmatpush.msra.mxu0 %v727_v20  ;;  %v931_v3 = vld [vmem:[#allocation14 + $0x168] sm:$0xff]  ;;  %v893_v20 = vld [vmem:[#allocation14 + $0x38] sm:$0xff] }
  0x87   :  { %822 = vmatpush.msra.mxu2 %v711_v43  ;;  %v914_v43 = vld [vmem:[#allocation14 + $0xe0] sm:$0xff] }
  0x88   :  { %758 = vmatpush.msrb.mxu3 %v698_v5  ;;  %866 = vmatpush.msra.mxu0 %v725_v24  ;;  %v929_v5 = vld [vmem:[#allocation14 + $0x158] sm:$0xff]  ;;  %v891_v24 = vld [vmem:[#allocation14 + $0x28] sm:$0xff] }
  0x89   :  { %823 = vmatpush.msra.mxu2 %v709_v49  ;;  %v910_v49 = vld [vmem:[#allocation14 + $0xc0] sm:$0xff] }
  0x8a   :  { %759 = vmatpush.msrb.mxu3 %v696_v12  ;;  %v897_v12 = vld [vmem:[#allocation14 + $0x58] sm:$0xff] }
  0x8b   :  { %824 = vmatpush.msra.mxu2 %v707_v53  ;;  %v909_v53 = vld [vmem:[#allocation14 + $0xb8] sm:$0xff] }
  0x8c   :  { %760 = vmatpush.msrb.mxu3 %v694_v16  ;;  %v895_v16 = vld [vmem:[#allocation14 + $0x48] sm:$0xff] }
  0x8d   :  { %825 = vmatpush.msra.mxu2 %v705_v58  ;;  %v902_v58 = vld [vmem:[#allocation14 + $0x80] sm:$0xff] }
  0x8e   :  { %761 = vmatpush.msrb.mxu3 %v692_v21  ;;  %v920_v21 = vld [vmem:[#allocation14 + $0x110] sm:$0xff] }
  0x8f   :  { %826 = vmatpush.msra.mxu2 %v703_v60  ;;  %v932_v60 = vld [vmem:[#allocation14 + $0x170] sm:$0xff] }
  0x91   :  { %827 = vmatpush.msra.mxu2 %v701_v4  ;;  %v928_v4 = vld [vmem:[#allocation14 + $0x150] sm:$0xff] }
  0x93   :  { %828 = vmatpush.msra.mxu2 %v699_v6  ;;  %v898_v6 = vld [vmem:[#allocation14 + $0x60] sm:$0xff] }
  0x95   :  { %829 = vmatpush.msra.mxu2 %v697_v13  ;;  %v924_v13 = vld [vmem:[#allocation14 + $0x130] sm:$0xff] }
  0x97   :  { %830 = vmatpush.msra.mxu2 %v695_v17  ;;  %v922_v17 = vld [vmem:[#allocation14 + $0x120] sm:$0xff] }
  0x99   :  { %831 = vmatpush.msra.mxu2 %v693_v22  ;;  %v921_v22 = vld [vmem:[#allocation14 + $0x118] sm:$0xff] }
  0xcc   :  { %v328_v50 = vpop.f32.mrf.mxu1 }
  0xcd   :  { %v3669_v51 = vadd.f32 %v328_v50, %v278_v47  ;;  %v911_v50 = vld [vmem:[#allocation14 + $0xc8] sm:$0xff] }
  0xcf   :  { %2813 = vmatmul.msk.f32.vlgmr.msra.gmra.mxu3 %vm358_vm1, %v3669_v51  ;;  %2819 = vmatmul.msk.f32.vlgmr.msra.gmra.mxu1 %vm358_vm1, %v3669_v51 }
  0xd0   :  { %v305_v61 = vpop.f32.mrf.mxu3  ;;  %v451_v33 = vpop.f32.mrf.mxu0  ;;  %940 = vmatpush.msra.mxu3 %v916_v41  ;;  %983 = vmatpush.msra.mxu1 %v932_v60  ;;  %v3872_v41 = vld [vmem:[%s4885_s19 + $0x48] sm:$0xff] }
  0xd1   :  { %v3675_v62 = vadd.f32 %v305_v61, %v277_v55  ;;  %v3712_v37 = vadd.f32 %v451_v33, %v423_v35  ;;  %v933_v61 = vld [vmem:[#allocation14 + $0x178] sm:$0xff]  ;;  %v886_v33 = vld [vmem:[#allocation14] sm:$0xff] }
  0xd2   :  { %941 = vmatpush.msra.mxu3 %v914_v43  ;;  %v3887_v43 = vld [vmem:[%s4885_s19 + $0xa8] sm:$0xff] }
  0xd3   :  { %568 = vmatmul.f32.vlgmr.msrb.gmra.mxu2 %v3675_v62  ;;  %638 = vmatmul.f32.vlgmr.msrb.gmra.mxu0 %v3675_v62 }
  0xd4   :  { %v331_v63 = vpop.f32.mrf.mxu1  ;;  %1010 = vmatpush.msrb.mxu2 %v917_v42  ;;  %942 = vmatpush.msra.mxu3 %v912_v45  ;;  %v3897_v45 = vld [vmem:[%s4885_s19 + $0x38] sm:$0xff] }
  0xd5   :  { %v3679_v0 = vadd.f32 %v331_v63, %v278_v47  ;;  %v930_v63 = vld [vmem:[#allocation14 + $0x160] sm:$0xff]  ;;  %1053 = vmatpush.msrb.mxu0 %v933_v61 }
  0xd6   :  { %1011 = vmatpush.msrb.mxu2 %v915_v44  ;;  %943 = vmatpush.msra.mxu3 %v910_v49  ;;  %v3892_v44 = vld [vmem:[%s4885_s19 + $0x40] sm:$0xff] }
  0xd7   :  { %2814 = vmatmul.msk.f32.gmra.mxu3 %vm358_vm1, %v3679_v0  ;;  %2820 = vmatmul.msk.f32.gmra.mxu1 %vm358_vm1, %v3679_v0 }
  0xd8   :  { %1012 = vmatpush.msrb.mxu2 %v913_v46  ;;  %944 = vmatpush.msra.mxu3 %v908_v52  ;;  %v3926_v52 = vld [vmem:[%s4885_s19 + $0x28] sm:$0xff] }
  0xd9   :  { %v308_v9 = vpop.f32.mrf.mxu3  ;;  %984 = vmatpush.msra.mxu1 %v930_v63  ;;  %1054 = vmatpush.msrb.mxu0 %v931_v3  ;;  %v3978_v63 = vld [vmem:[%s4885_s19 + $0x8] sm:$0xff]  ;;  %v3997_v3 = vld [vmem:[%s4885_s19 + $0x80] sm:$0xff] }
  0xda   :  { %v3688_v11 = vadd.f32 %v308_v9, %v277_v55  ;;  %1013 = vmatpush.msrb.mxu2 %v911_v50  ;;  %v907_v55 = vld [vmem:[#allocation14 + $0xa8] sm:$0xff]  ;;  %945 = vmatpush.msra.mxu3 %v906_v54  ;;  %v3937_v54 = vld [vmem:[%s4885_s19 + $0x98] sm:$0xff]  ;;  %4913 = vst [vmem:[#allocation33_spill] sm:$0xff] %v3978_v63 }
  0xdb   :  { %v382_v14 = vpop.f32.mrf.mxu2  ;;  %985 = vmatpush.msra.mxu1 %v928_v4  ;;  %1055 = vmatpush.msrb.mxu0 %v929_v5  ;;  %v927_v9 = vld [vmem:[#allocation14 + $0x148] sm:$0xff] }
  0xdc   :  { %571 = vmatmul.f32.gmra.mxu2 %v3688_v11  ;;  %641 = vmatmul.f32.gmra.mxu0 %v3688_v11  ;;  %v3692_v25 = vadd.f32 %v382_v14, %v354_v15  ;;  %v474_v34 = vpop.f32.mrf.mxu1  ;;  %v925_v14 = vld [vmem:[#allocation14 + $0x138] sm:$0xff]  ;;  %v3920_v50 = vld [vmem:[%s4885_s19 + $0xa0] sm:$0xff] }
  0xdd   :  { %v3714_v38 = vadd.f32 %v474_v34, %v424_v36  ;;  %v454_v39 = vpop.f32.mrf.mxu0  ;;  %1014 = vmatpush.msrb.mxu2 %v909_v53  ;;  %946 = vmatpush.msra.mxu3 %v904_v56  ;;  %v887_v34 = vld [vmem:[#allocation14 + $0x8] sm:$0xff] }
  0xde   :  { %v3722_v47 = vadd.f32 %v454_v39, %v423_v35  ;;  %986 = vmatpush.msra.mxu1 %v926_v8  ;;  %1056 = vmatpush.msrb.mxu0 %v927_v9  ;;  %v3844_v35 = vld [vmem:[%s4885_s19 + $0x58] sm:$0xff]  ;;  %v3932_v53 = vld [vmem:[%s4885_s19 + $0x20] sm:$0xff] }
  0xdf   :  { %1015 = vmatpush.msrb.mxu2 %v907_v55  ;;  %947 = vmatpush.msra.mxu3 %v902_v58  ;;  %v3961_v58 = vld [vmem:[%s4885_s19 + $0x10] sm:$0xff] }
  0xe0   :  { %987 = vmatpush.msra.mxu1 %v924_v13  ;;  %1057 = vmatpush.msrb.mxu0 %v925_v14  ;;  %4912 = vst [vmem:[#allocation32_spill] sm:$0xff] %v3961_v58  ;;  %v528_v13 = vld [vmem:[%s4876_s10] sm:$0x3] }
  0xe1   :  { %v405_v26 = vpop.f32.mrf.mxu3  ;;  %1016 = vmatpush.msrb.mxu2 %v905_v57  ;;  %948 = vmatpush.msra.mxu3 %v900_v1  ;;  %v3953_v57 = vld [vmem:[%s4885_s19 + $0x18] sm:$0xff]  ;;  %v3983_v1 = vld [vmem:[%s4885_s19 + $0x88] sm:$0xff] }
  0xe2   :  { %v3694_v27 = vadd.f32 %v405_v26, %v355_v19  ;;  %988 = vmatpush.msra.mxu1 %v922_v17  ;;  %1058 = vmatpush.msrb.mxu0 %v923_v18  ;;  %v918_v26 = vld [vmem:[#allocation14 + $0x100] sm:$0xff] }
  0xe3   :  { %v385_v28 = vpop.f32.mrf.mxu2  ;;  %1017 = vmatpush.msrb.mxu2 %v903_v59  ;;  %949 = vmatpush.msra.mxu3 %v898_v6  ;;  %v3966_v59 = vld [vmem:[%s4885_s19 + $0x90] sm:$0xff]  ;;  %v740_v17 = vld [vmem:[%s4878_s12] sm:$0x3] }
  0xe4   :  { %574 = vmatmul.f32.gmra.mxu2 %v3692_v25  ;;  %2815 = vmatmul.msk.f32.gmra.mxu3 %vm358_vm1, %v3694_v27  ;;  %v3702_v29 = vadd.f32 %v385_v28, %v354_v15  ;;  %v477_v40 = vpop.f32.mrf.mxu1  ;;  %v894_v15 = vld [vmem:[#allocation14 + $0x40] sm:$0xff]  ;;  %v919_v28 = vld [vmem:[#allocation14 + $0x108] sm:$0xff] }
  0xe5   :  { %644 = vmatmul.f32.gmra.mxu0 %v3692_v25  ;;  %2821 = vmatmul.msk.f32.gmra.mxu1 %vm358_vm1, %v3694_v27  ;;  %v3724_v48 = vadd.f32 %v477_v40, %v424_v36  ;;  %v3849_v36 = vld [vmem:[%s4885_s19 + $0xb0] sm:$0xff] }
  0xe6   :  { %1018 = vmatpush.msrb.mxu2 %v901_v2  ;;  %950 = vmatpush.msra.mxu3 %v896_v10  ;;  %v3992_v2 = vld [vmem:[%s4885_s19] sm:$0xff] }
  0xe7   :  { %989 = vmatpush.msra.mxu1 %v920_v21  ;;  %1059 = vmatpush.msrb.mxu0 %v921_v22  ;;  %4914 = vst [vmem:[#allocation34_spill] sm:$0xff] %v3992_v2  ;;  %v4034_v21 = vperm.slane %v740_v17, 0  ;;  %v4036_v22 = vperm.slane %v740_v17, 1 }
  0xe8   :  { %1019 = vmatpush.msrb.mxu2 %v899_v7  ;;  %951 = vmatpush.msra.mxu3 %v894_v15 }
  0xe9   :  { %v408_v30 = vpop.f32.mrf.mxu3  ;;  %990 = vmatpush.msra.mxu1 %v918_v26  ;;  %1060 = vmatpush.msrb.mxu0 %v919_v28 }
  0xea   :  { %v3704_v32 = vadd.f32 %v408_v30, %v355_v19  ;;  %1020 = vmatpush.msrb.mxu2 %v897_v12  ;;  %v892_v19 = vld [vmem:[#allocation14 + $0x30] sm:$0xff] }
  0xeb   :  { %952 = vmatpush.msra.mxu3 %v892_v19  ;;  %v888_v30 = vld [vmem:[#allocation14 + $0x10] sm:$0xff] }
  0xec   :  { %577 = vmatmul.f32.gmra.mxu2 %v3702_v29  ;;  %2816 = vmatmul.msk.f32.gmra.mxu3 %vm358_vm1, %v3704_v32 }
  0xed   :  { %647 = vmatmul.f32.gmra.mxu0 %v3702_v29  ;;  %2822 = vmatmul.msk.f32.gmra.mxu1 %vm358_vm1, %v3704_v32 }
  0xee   :  { %1021 = vmatpush.msrb.mxu2 %v895_v16  ;;  %953 = vmatpush.msra.mxu3 %v890_v23  ;;  %v531_v16 = vperm.slane %v528_v13, 1 }
  0xf0   :  { %1022 = vmatpush.msrb.mxu2 %v893_v20  ;;  %954 = vmatpush.msra.mxu3 %v888_v30  ;;  %v530_v20 = vperm.slane %v528_v13, 0 }
  0xf2   :  { %1023 = vmatpush.msrb.mxu2 %v891_v24  ;;  %955 = vmatpush.msra.mxu3 %v886_v33 }
  0xf4   :  { %580 = vmatmul.f32.gmra.mxu2 %v3712_v37  ;;  %2817 = vmatmul.msk.f32.gmra.mxu3 %vm358_vm1, %v3714_v38 }
  0xf5   :  { %650 = vmatmul.f32.gmra.mxu0 %v3712_v37  ;;  %2823 = vmatmul.msk.f32.gmra.mxu1 %vm358_vm1, %v3714_v38 }
  0xf6   :  { %1024 = vmatpush.msrb.mxu2 %v889_v31 }
  0xf8   :  { %1025 = vmatpush.msrb.mxu2 %v887_v34 }
  0xfc   :  { %583 = vmatmul.f32.gmra.mxu2 %v3722_v47  ;;  %2818 = vmatmul.msk.f32.gmra.mxu3 %vm358_vm1, %v3724_v48 }
  0xfd   :  { %653 = vmatmul.f32.gmra.mxu0 %v3722_v47  ;;  %2824 = vmatmul.msk.f32.gmra.mxu1 %vm358_vm1, %v3724_v48 }
 0x104   :  { %762 = vmatmul.f32.vlgmr.msrb.gmra.mxu3 %v3675_v62  ;;  %832 = vmatmul.f32.vlgmr.msra.gmra.mxu2 %v3675_v62 }
 0x105   :  { %2825 = vmatmul.msk.f32.vlgmr.msrb.gmra.mxu1 %vm358_vm1, %v3669_v51  ;;  %2831 = vmatmul.msk.f32.vlgmr.msra.gmra.mxu0 %vm358_vm1, %v3669_v51 }
 0x10c   :  { %765 = vmatmul.f32.gmra.mxu3 %v3688_v11  ;;  %835 = vmatmul.f32.gmra.mxu2 %v3688_v11 }
 0x10d   :  { %2826 = vmatmul.msk.f32.gmra.mxu1 %vm358_vm1, %v3679_v0  ;;  %2832 = vmatmul.msk.f32.gmra.mxu0 %vm358_vm1, %v3679_v0 }
 0x114   :  { %768 = vmatmul.f32.gmra.mxu3 %v3692_v25  ;;  %838 = vmatmul.f32.gmra.mxu2 %v3692_v25 }
 0x115   :  { %2827 = vmatmul.msk.f32.gmra.mxu1 %vm358_vm1, %v3694_v27  ;;  %2833 = vmatmul.msk.f32.gmra.mxu0 %vm358_vm1, %v3694_v27 }
 0x11c   :  { %771 = vmatmul.f32.gmra.mxu3 %v3702_v29  ;;  %841 = vmatmul.f32.gmra.mxu2 %v3702_v29 }
 0x11d   :  { %2828 = vmatmul.msk.f32.gmra.mxu1 %vm358_vm1, %v3704_v32  ;;  %2834 = vmatmul.msk.f32.gmra.mxu0 %vm358_vm1, %v3704_v32 }
 0x124   :  { %774 = vmatmul.f32.gmra.mxu3 %v3712_v37  ;;  %844 = vmatmul.f32.gmra.mxu2 %v3712_v37 }
 0x125   :  { %2829 = vmatmul.msk.f32.gmra.mxu1 %vm358_vm1, %v3714_v38  ;;  %2835 = vmatmul.msk.f32.gmra.mxu0 %vm358_vm1, %v3714_v38 }
 0x12c   :  { %777 = vmatmul.f32.gmra.mxu3 %v3722_v47  ;;  %847 = vmatmul.f32.gmra.mxu2 %v3722_v47 }
 0x12d   :  { %2830 = vmatmul.msk.f32.gmra.mxu1 %vm358_vm1, %v3724_v48  ;;  %2836 = vmatmul.msk.f32.gmra.mxu0 %vm358_vm1, %v3724_v48 }
 0x134   :  { %956 = vmatmul.f32.vlgmr.msra.gmra.mxu3 %v3675_v62  ;;  %1026 = vmatmul.f32.vlgmr.msrb.gmra.mxu2 %v3675_v62  ;;  %v3803_v62 = vld [vmem:[%s4885_s19 + $0x70] sm:$0xff] }
 0x135   :  { %2837 = vmatmul.msk.f32.vlgmr.msra.gmra.mxu1 %vm358_vm1, %v3669_v51  ;;  %2843 = vmatmul.msk.f32.vlgmr.msrb.gmra.mxu0 %vm358_vm1, %v3669_v51  ;;  %v3789_v51 = vld [vmem:[%s4885_s19 + $0x78] sm:$0xff] }
 0x136   :  { %1115 = vmatpush.msrb.mxu3 %v3789_v51  ;;  %1171 = vmatpush.msra.mxu2 %v3789_v51 }
 0x137   :  { %1227 = vmatpush.msra.mxu0 %v3789_v51 }
 0x138   :  { %1116 = vmatpush.msrb.mxu3 %v3803_v62  ;;  %1172 = vmatpush.msra.mxu2 %v3803_v62 }
 0x139   :  { %1228 = vmatpush.msra.mxu0 %v3803_v62 }
 0x13c   :  { %959 = vmatmul.f32.gmra.mxu3 %v3688_v11  ;;  %1029 = vmatmul.f32.gmra.mxu2 %v3688_v11  ;;  %v3813_v11 = vld [vmem:[%s4885_s19 + $0xb8] sm:$0xff] }
 0x13d   :  { %2838 = vmatmul.msk.f32.gmra.mxu1 %vm358_vm1, %v3679_v0  ;;  %2844 = vmatmul.msk.f32.gmra.mxu0 %vm358_vm1, %v3679_v0  ;;  %v3808_v0 = vld [vmem:[%s4885_s19 + $0x68] sm:$0xff] }
 0x13e   :  { %1146 = vmatpush.msrb.mxu1 %v3813_v11  ;;  %1117 = vmatpush.msrb.mxu3 %v3808_v0 }
 0x13f   :  { %1173 = vmatpush.msra.mxu2 %v3808_v0  ;;  %1229 = vmatpush.msra.mxu0 %v3808_v0 }
 0x140   :  { %1147 = vmatpush.msrb.mxu1 %v3849_v36 }
 0x142   :  { %1148 = vmatpush.msrb.mxu1 %v3887_v43 }
 0x144   :  { %962 = vmatmul.f32.gmra.mxu3 %v3692_v25  ;;  %1032 = vmatmul.f32.gmra.mxu2 %v3692_v25 }
 0x145   :  { %2839 = vmatmul.msk.f32.gmra.mxu1 %vm358_vm1, %v3694_v27  ;;  %2845 = vmatmul.msk.f32.gmra.mxu0 %vm358_vm1, %v3694_v27 }
 0x146   :  { %1149 = vmatpush.msrb.mxu1 %v3920_v50 }
 0x148   :  { %1150 = vmatpush.msrb.mxu1 %v3937_v54 }
 0x14a   :  { %1151 = vmatpush.msrb.mxu1 %v3966_v59 }
 0x14c   :  { %965 = vmatmul.f32.gmra.mxu3 %v3702_v29  ;;  %1035 = vmatmul.f32.gmra.mxu2 %v3702_v29  ;;  %v3815_v25 = vpop.f32.mrf.mxu1  ;;  %v3829_v29 = vld [vmem:[%s4885_s19 + $0x60] sm:$0xff] }
 0x14d   :  { %2840 = vmatmul.msk.f32.gmra.mxu1 %vm358_vm1, %v3704_v32  ;;  %2846 = vmatmul.msk.f32.gmra.mxu0 %vm358_vm1, %v3704_v32 }
 0x14e   :  { %1118 = vmatpush.msrb.mxu3 %v3829_v29  ;;  %1174 = vmatpush.msra.mxu2 %v3829_v29 }
 0x14f   :  { %1230 = vmatpush.msra.mxu0 %v3829_v29  ;;  %1152 = vmatpush.msrb.mxu1 %v3983_v1 }
 0x150   :  { %v3822_v27 = vpop.f32.mrf.mxu0  ;;  %1119 = vmatpush.msrb.mxu3 %v3844_v35  ;;  %1175 = vmatpush.msra.mxu2 %v3844_v35 }
 0x151   :  { %1231 = vmatpush.msra.mxu0 %v3844_v35  ;;  %1153 = vmatpush.msrb.mxu1 %v3997_v3  ;;  %v640_v23 = vadd.f32 %v3822_v27, %v531_v16 }
 0x152   :  { %v3831_v32 = vpop.f32.mrf.mxu3 }
 0x153   :  { %1258 = vmatpush.msra.mxu1 %v3813_v11 }
 0x154   :  { %968 = vmatmul.f32.gmra.mxu3 %v3712_v37  ;;  %1038 = vmatmul.f32.gmra.mxu2 %v3712_v37  ;;  %v3854_v37 = vld [vmem:[%s4885_s19 + $0x50] sm:$0xff]  ;;  %v3862_v39 = vpop.f32.mrf.mxu1 }
 0x155   :  { %2841 = vmatmul.msk.f32.gmra.mxu1 %vm358_vm1, %v3714_v38  ;;  %2847 = vmatmul.msk.f32.gmra.mxu0 %vm358_vm1, %v3714_v38 }
 0x156   :  { %v3858_v38 = vpop.f32.mrf.mxu2  ;;  %1120 = vmatpush.msrb.mxu3 %v3854_v37  ;;  %1176 = vmatpush.msra.mxu2 %v3854_v37 }
 0x157   :  { %1232 = vmatpush.msra.mxu0 %v3854_v37  ;;  %1259 = vmatpush.msra.mxu1 %v3849_v36  ;;  %v570_v30 = vadd.f32 %v3858_v38, %v530_v20 }
 0x158   :  { %1121 = vmatpush.msrb.mxu3 %v3872_v41  ;;  %1177 = vmatpush.msra.mxu2 %v3872_v41 }
 0x159   :  { %v3865_v40 = vpop.f32.mrf.mxu0  ;;  %1233 = vmatpush.msra.mxu0 %v3872_v41  ;;  %1260 = vmatpush.msra.mxu1 %v3887_v43 }
 0x15a   :  { %v3882_v42 = vpop.f32.mrf.mxu3  ;;  %1122 = vmatpush.msrb.mxu3 %v3892_v44  ;;  %1178 = vmatpush.msra.mxu2 %v3892_v44 }
 0x15b   :  { %1234 = vmatpush.msra.mxu0 %v3892_v44  ;;  %1261 = vmatpush.msra.mxu1 %v3920_v50 }
 0x15c   :  { %971 = vmatmul.f32.gmra.mxu3 %v3722_v47  ;;  %1041 = vmatmul.f32.gmra.mxu2 %v3722_v47  ;;  %v3909_v47 = vld [vmem:[%s4885_s19 + $0x30] sm:$0xff] }
 0x15d   :  { %2842 = vmatmul.msk.f32.gmra.mxu1 %vm358_vm1, %v3724_v48  ;;  %2848 = vmatmul.msk.f32.gmra.mxu0 %vm358_vm1, %v3724_v48 }
 0x15e   :  { %1123 = vmatpush.msrb.mxu3 %v3897_v45  ;;  %1179 = vmatpush.msra.mxu2 %v3897_v45 }
 0x15f   :  { %v3901_v46 = vpop.f32.mrf.mxu2  ;;  %1235 = vmatpush.msra.mxu0 %v3897_v45  ;;  %1262 = vmatpush.msra.mxu1 %v3937_v54 }
 0x160   :  { %1124 = vmatpush.msrb.mxu3 %v3909_v47  ;;  %1180 = vmatpush.msra.mxu2 %v3909_v47 }
 0x161   :  { %1236 = vmatpush.msra.mxu0 %v3909_v47  ;;  %1263 = vmatpush.msra.mxu1 %v3966_v59 }
 0x162   :  { %v3913_v48 = vpop.f32.mrf.mxu0  ;;  %v3915_v49 = vpop.f32.mrf.mxu1  ;;  %1125 = vmatpush.msrb.mxu3 %v3926_v52  ;;  %1181 = vmatpush.msra.mxu2 %v3926_v52 }
 0x163   :  { %1237 = vmatpush.msra.mxu0 %v3926_v52  ;;  %1264 = vmatpush.msra.mxu1 %v3983_v1  ;;  %v646_v24 = vadd.f32 %v3913_v48, %v531_v16 }
 0x164   :  { %1126 = vmatpush.msrb.mxu3 %v3932_v53  ;;  %1182 = vmatpush.msra.mxu2 %v3932_v53 }
 0x165   :  { %1238 = vmatpush.msra.mxu0 %v3932_v53  ;;  %1265 = vmatpush.msra.mxu1 %v3997_v3  ;;  %v4048_v17 = vadd.f32 %v3915_v49, %v646_v24 }
 0x166   :  { %1127 = vmatpush.msrb.mxu3 %v3953_v57  ;;  %1183 = vmatpush.msra.mxu2 %v3953_v57 }
 0x167   :  { %v3946_v55 = vpop.f32.mrf.mxu2  ;;  %v3948_v56 = vpop.f32.mrf.mxu3  ;;  %1239 = vmatpush.msra.mxu0 %v3953_v57 }
 0x168   :  { %1128 = vmatpush.msrb.mxu3 %v3961_v58  ;;  %1184 = vmatpush.msra.mxu2 %v3961_v58  ;;  %v576_v26 = vadd.f32 %v3946_v55, %v530_v20 }
 0x169   :  { %1240 = vmatpush.msra.mxu0 %v3961_v58  ;;  %v4056_v58 = vadd.f32 %v3831_v32, %v570_v30 }
 0x16a   :  { %v3969_v60 = vpop.f32.mrf.mxu0  ;;  %v3971_v61 = vpop.f32.mrf.mxu1  ;;  %1129 = vmatpush.msrb.mxu3 %v3978_v63  ;;  %1185 = vmatpush.msra.mxu2 %v3978_v63  ;;  %v4051_v27 = vadd.f32 %v3948_v56, %v576_v26 }
 0x16b   :  { %1241 = vmatpush.msra.mxu0 %v3978_v63  ;;  %v4045_v63 = vadd.f32 %v3815_v25, %v640_v23 }
 0x16c   :  { %1130 = vmatpush.msrb.mxu3 %v3992_v2  ;;  %1186 = vmatpush.msra.mxu2 %v3992_v2 }
 0x16d   :  { %1242 = vmatpush.msra.mxu0 %v3992_v2 }
 0x16e   :  { %1202 = vmatpush.msra.mxu3 %v3813_v11 }
 0x16f   :  { %v4003_v4 = vpop.f32.mrf.mxu2  ;;  %v4005_v5 = vpop.f32.mrf.mxu3 }
 0x170   :  { %1203 = vmatpush.msra.mxu3 %v3849_v36  ;;  %v579_v23 = vadd.f32 %v4003_v4, %v530_v20 }
 0x172   :  { %v651_v6 = vpop.f32.mrf.mxu0  ;;  %v686_v7 = vpop.f32.mrf.mxu1  ;;  %1204 = vmatpush.msra.mxu3 %v3887_v43  ;;  %v4091_v4 = vadd.f32 %v4005_v5, %v579_v23 }
 0x173   :  { %v652_v31 = vadd.f32 %v651_v6, %v531_v16 }
 0x174   :  { %1205 = vmatpush.msra.mxu3 %v3920_v50 }
 0x176   :  { %1206 = vmatpush.msra.mxu3 %v3937_v54 }
 0x177   :  { %v581_v8 = vpop.f32.mrf.mxu2  ;;  %v616_v9 = vpop.f32.mrf.mxu3 }
 0x178   :  { %1207 = vmatpush.msra.mxu3 %v3966_v59  ;;  %v582_v28 = vadd.f32 %v581_v8, %v530_v20 }
 0x17a   :  { %v654_v10 = vpop.f32.mrf.mxu0  ;;  %v689_v12 = vpop.f32.mrf.mxu1  ;;  %1208 = vmatpush.msra.mxu3 %v3983_v1  ;;  %v4053_v48 = vadd.f32 %v616_v9, %v582_v28 }
 0x17b   :  { %v655_v24 = vadd.f32 %v654_v10, %v531_v16 }
 0x17c   :  { %1209 = vmatpush.msra.mxu3 %v3997_v3 }
 0x17f   :  { %v584_v14 = vpop.f32.mrf.mxu2  ;;  %v619_v15 = vpop.f32.mrf.mxu3 }
 0x180   :  { %v585_v26 = vadd.f32 %v584_v14, %v530_v20 }
 0x182   :  { %v798_v18 = vpop.f32.mrf.mxu1  ;;  %v868_v19 = vpop.f32.mrf.mxu0 }
 0x187   :  { %v763_v33 = vpop.f32.mrf.mxu3  ;;  %v833_v34 = vpop.f32.mrf.mxu2 }
 0x188   :  { %v764_v2 = vadd.f32 %v763_v33, %v4034_v21  ;;  %v834_v13 = vadd.f32 %v833_v34, %v4036_v22  ;;  %v4058_v33 = vadd.f32 %v686_v7, %v652_v31 }
 0x18a   :  { %v799_v55 = vadd.f32 %v798_v18, %v764_v2  ;;  %v869_v38 = vadd.f32 %v868_v19, %v834_v13  ;;  %v801_v6 = vpop.f32.mrf.mxu1  ;;  %v871_v8 = vpop.f32.mrf.mxu0  ;;  %v643_v2 = vadd.f32 %v3865_v40, %v531_v16  ;;  %v573_v18 = vadd.f32 %v3901_v46, %v530_v20 }
 0x18b   :  { %v649_v19 = vadd.f32 %v3969_v60, %v531_v16  ;;  %v4093_v13 = vadd.f32 %v689_v12, %v655_v24 }
 0x18c   :  { %v4061_v25 = vmul.f32 %v799_v55, %v4051_v27  ;;  %v4064_v49 = vmul.f32 %v799_v55, %v4053_v48  ;;  %v1106_v56 = vmul.f32 %v869_v38, %v4045_v63  ;;  %v4068_v9 = vmul.f32 %v869_v38, %v4048_v17 }
 0x18d   :  { %v4073_v32 = vmul.f32 %v869_v38, %v4058_v33  ;;  %v1105_v7 = vmul.f32 %v799_v55, %v4056_v58  ;;  %v4082_v31 = vadd.f32 %v3862_v39, %v643_v2  ;;  %v4085_v34 = vadd.f32 %v3882_v42, %v573_v18 }
 0x18e   :  { %4915 = vst [vmem:[#allocation35_spill] sm:$0xff] %v4064_v49  ;;  %2849 = vmatmul.msk.f32.vlgmr.msrb.gmra.mxu1 %vm358_vm1, %v1106_v56  ;;  %v4088_v60 = vadd.f32 %v3971_v61, %v649_v19  ;;  %v4095_v55 = vadd.f32 %v619_v15, %v585_v26 }
 0x18f   :  { %4916 = vst [vmem:[#allocation36_spill] sm:$0xff] %v4073_v32  ;;  %1131 = vmatmul.f32.vlgmr.msrb.gmra.mxu3 %v1105_v7  ;;  %v766_v28 = vpop.f32.mrf.mxu3  ;;  %v836_v30 = vpop.f32.mrf.mxu2 }
 0x190   :  { %v767_v40 = vadd.f32 %v766_v28, %v4034_v21  ;;  %v837_v46 = vadd.f32 %v836_v30, %v4036_v22 }
 0x192   :  { %v802_v10 = vadd.f32 %v801_v6, %v767_v40  ;;  %v872_v14 = vadd.f32 %v871_v8, %v837_v46  ;;  %v804_v16 = vpop.f32.mrf.mxu1  ;;  %v874_v20 = vpop.f32.mrf.mxu0 }
 0x194   :  { %v1107_v39 = vmul.f32 %v802_v10, %v4085_v34  ;;  %v1108_v38 = vmul.f32 %v872_v14, %v4082_v31  ;;  %v4100_v42 = vmul.f32 %v802_v10, %v4091_v4  ;;  %v4103_v61 = vmul.f32 %v872_v14, %v4088_v60 }
 0x195   :  { %v4106_v5 = vmul.f32 %v802_v10, %v4095_v55  ;;  %v4109_v6 = vmul.f32 %v872_v14, %v4093_v13 }
 0x196   :  { %2850 = vmatmul.msk.f32.gmra.mxu1 %vm358_vm1, %v1108_v38 }
 0x197   :  { %4917 = vst [vmem:[#allocation37_spill] sm:$0xff] %v4106_v5  ;;  %1134 = vmatmul.f32.gmra.mxu3 %v1107_v39  ;;  %v769_v12 = vpop.f32.mrf.mxu3  ;;  %v839_v15 = vpop.f32.mrf.mxu2 }
 0x198   :  { %4918 = vst [vmem:[#allocation38_spill] sm:$0xff] %v4109_v6  ;;  %v770_v8 = vadd.f32 %v769_v12, %v4034_v21  ;;  %v840_v56 = vadd.f32 %v839_v15, %v4036_v22 }
 0x19a   :  { %v805_v2 = vadd.f32 %v804_v16, %v770_v8  ;;  %v875_v18 = vadd.f32 %v874_v20, %v840_v56  ;;  %v807_v26 = vpop.f32.mrf.mxu1  ;;  %v877_v28 = vpop.f32.mrf.mxu0 }
 0x19c   :  { %v4115_v7 = vmul.f32 %v805_v2, %v4051_v27  ;;  %v4118_v19 = vmul.f32 %v805_v2, %v4053_v48  ;;  %v1162_v23 = vmul.f32 %v875_v18, %v4045_v63  ;;  %v4122_v24 = vmul.f32 %v875_v18, %v4048_v17 }
 0x19d   :  { %v4125_v30 = vmul.f32 %v875_v18, %v4058_v33  ;;  %v1161_v40 = vmul.f32 %v805_v2, %v4056_v58 }
 0x19e   :  { %4919 = vst [vmem:[#allocation39_spill] sm:$0xff] %v4118_v19 }
 0x19f   :  { %4920 = vst [vmem:[#allocation40_spill] sm:$0xff] %v4125_v30  ;;  %1187 = vmatmul.f32.vlgmr.msra.gmra.mxu2 %v1161_v40  ;;  %2851 = vmatmul.msk.f32.vlgmr.msra.gmra.mxu3 %vm358_vm1, %v1162_v23  ;;  %v772_v46 = vpop.f32.mrf.mxu3  ;;  %v842_v10 = vpop.f32.mrf.mxu2 }
 0x1a0   :  { %v773_v14 = vadd.f32 %v772_v46, %v4034_v21  ;;  %v843_v16 = vadd.f32 %v842_v10, %v4036_v22 }
 0x1a2   :  { %v808_v20 = vadd.f32 %v807_v26, %v773_v14  ;;  %v878_v39 = vadd.f32 %v877_v28, %v843_v16  ;;  %v810_v18 = vpop.f32.mrf.mxu1  ;;  %v880_v23 = vpop.f32.mrf.mxu0 }
 0x1a4   :  { %v1163_v38 = vmul.f32 %v808_v20, %v4085_v34  ;;  %v1164_v12 = vmul.f32 %v878_v39, %v4082_v31  ;;  %v4134_v15 = vmul.f32 %v808_v20, %v4091_v4  ;;  %v4137_v8 = vmul.f32 %v878_v39, %v4088_v60 }
 0x1a5   :  { %v4140_v56 = vmul.f32 %v808_v20, %v4095_v55  ;;  %v4143_v2 = vmul.f32 %v878_v39, %v4093_v13 }
 0x1a7   :  { %4921 = vst [vmem:[#allocation41_spill] sm:$0xff] %v4140_v56  ;;  %1190 = vmatmul.f32.gmra.mxu2 %v1163_v38  ;;  %2852 = vmatmul.msk.f32.gmra.mxu3 %vm358_vm1, %v1164_v12  ;;  %v775_v26 = vpop.f32.mrf.mxu3  ;;  %v845_v28 = vpop.f32.mrf.mxu2 }
 0x1a8   :  { %4922 = vst [vmem:[#allocation42_spill] sm:$0xff] %v4143_v2  ;;  %v776_v40 = vadd.f32 %v775_v26, %v4034_v21  ;;  %v846_v46 = vadd.f32 %v845_v28, %v4036_v22 }
 0x1aa   :  { %v811_v10 = vadd.f32 %v810_v18, %v776_v40  ;;  %v881_v14 = vadd.f32 %v880_v23, %v846_v46  ;;  %v813_v28 = vpop.f32.mrf.mxu1  ;;  %v883_v40 = vpop.f32.mrf.mxu0 }
 0x1ac   :  { %v4149_v16 = vmul.f32 %v811_v10, %v4051_v27  ;;  %v4152_v20 = vmul.f32 %v811_v10, %v4053_v48  ;;  %v1218_v39 = vmul.f32 %v881_v14, %v4045_v63  ;;  %v4156_v38 = vmul.f32 %v881_v14, %v4048_v17 }
 0x1ad   :  { %v4159_v12 = vmul.f32 %v881_v14, %v4058_v33  ;;  %v1217_v26 = vmul.f32 %v811_v10, %v4056_v58 }
 0x1ae   :  { %4923 = vst [vmem:[#allocation43_spill] sm:$0xff] %v4152_v20  ;;  %2853 = vmatmul.msk.f32.vlgmr.msra.gmra.mxu1 %vm358_vm1, %v1218_v39 }
 0x1af   :  { %4924 = vst [vmem:[#allocation44_spill] sm:$0xff] %v4159_v12  ;;  %1243 = vmatmul.f32.vlgmr.msra.gmra.mxu0 %v1217_v26  ;;  %v778_v18 = vpop.f32.mrf.mxu3  ;;  %v848_v23 = vpop.f32.mrf.mxu2 }
 0x1b0   :  { %v779_v27 = vadd.f32 %v778_v18, %v4034_v21  ;;  %v849_v48 = vadd.f32 %v848_v23, %v4036_v22 }
 0x1b2   :  { %v814_v63 = vadd.f32 %v813_v28, %v779_v27  ;;  %v884_v46 = vadd.f32 %v883_v40, %v849_v48 }
 0x1b4   :  { %v1219_v17 = vmul.f32 %v814_v63, %v4085_v34  ;;  %v1220_v33 = vmul.f32 %v884_v46, %v4082_v31  ;;  %v4168_v14 = vmul.f32 %v814_v63, %v4091_v4  ;;  %v4171_v58 = vmul.f32 %v884_v46, %v4088_v60  ;;  %v4182_v34 = vpop.f32.mrf.mxu1 }
 0x1b5   :  { %v4174_v10 = vmul.f32 %v814_v63, %v4095_v55  ;;  %v4177_v21 = vmul.f32 %v884_v46, %v4093_v13  ;;  %v4192_v55 = vpop.f32.mrf.mxu0 }
 0x1b6   :  { %2854 = vmatmul.msk.f32.gmra.mxu1 %vm358_vm1, %v1220_v33 }
 0x1b7   :  { %4925 = vst [vmem:[#allocation45_spill] sm:$0xff] %v4174_v10  ;;  %1246 = vmatmul.f32.gmra.mxu0 %v1219_v17  ;;  %v4180_v22 = vpop.f32.mrf.mxu3  ;;  %v4188_v39 = vpop.f32.mrf.mxu2 }
 0x1b8   :  { %4926 = vst [vmem:[#allocation46_spill] sm:$0xff] %v4177_v21  ;;  %v4223_v21 = vld [vmem:[%s4886_s20] sm:$0xff] }
 0x1b9   :  { %4937 = vst [vmem:[#allocation57_spill] sm:$0xff] %v4223_v21 }
 0x1ba   :  { %1310 = vst [vmem:[#allocation1] ss:$2 sm:$0xff] %v4223_v21 }
 0x1bc   :  { %v4186_v4 = vpop.f32.mrf.mxu1 }
 0x1bd   :  { %4927 = vst [vmem:[#allocation47_spill] sm:$0xff] %v4186_v4  ;;  %v4200_v23 = vpop.f32.mrf.mxu0 }
 0x1be   :  { %4929 = vst [vmem:[#allocation49_spill] sm:$0xff] %v4200_v23 }
 0x1bf   :  { %v4184_v31 = vpop.f32.mrf.mxu3  ;;  %v4196_v13 = vpop.f32.mrf.mxu2 }
 0x1c1   :  { %v1311_v2 = vld.sshfl [vmem:[#allocation1] sm:$0xff pattern:$0x75316420]  ;;  %v1312_v32 = vld.sshfl [vmem:[#allocation1 + $0x8] sm:$0xff pattern:$0x75316420] }
 0x1c2   :  { %1381 = vst [vmem:[#allocation1] ss:$2 sm:$0xff] %v4223_v21  ;;  %2858 = vmatpush.msk.msrb.mxu3 %vm1320_vm3, %v1312_v32  ;;  %2855 = vmatpush.msk.msrb.mxu2 %vm1320_vm3, %v1311_v2 }
 0x1c4   :  { %v4194_v26 = vpop.f32.mrf.mxu1 }
 0x1c5   :  { %v4208_v40 = vpop.f32.mrf.mxu0 }
 0x1c7   :  { %v4190_v60 = vpop.f32.mrf.mxu3  ;;  %v4204_v48 = vpop.f32.mrf.mxu2 }
 0x1c9   :  { %v1382_v19 = vld.sshfl [vmem:[#allocation1] sm:$0xff pattern:$0x75316420]  ;;  %v1383_v49 = vld.sshfl [vmem:[#allocation1 + $0x8] sm:$0xff pattern:$0x75316420] }
 0x1ca   :  { %2861 = vmatpush.msk.msrb.mxu0 %vm1320_vm3, %v1382_v19  ;;  %2864 = vmatpush.msk.msrb.mxu1 %vm1320_vm3, %v1383_v49  ;;  %1450 = vst [vmem:[#allocation1] ss:$2 sm:$0xff] %v4223_v21 }
 0x1cc   :  { %v4202_v27 = vpop.f32.mrf.mxu1  ;;  %1527 = vmatpush.msra.mxu0 %v3789_v51  ;;  %1558 = vmatpush.msra.mxu1 %v3813_v11 }
 0x1cd   :  { %4930 = vst [vmem:[#allocation50_spill] sm:$0xff] %v4202_v27  ;;  %v4216_v33 = vpop.f32.mrf.mxu0 }
 0x1ce   :  { %4935 = vst [vmem:[#allocation55_spill] sm:$0xff] %v4216_v33  ;;  %1528 = vmatpush.msra.mxu0 %v3803_v62  ;;  %1559 = vmatpush.msra.mxu1 %v3849_v36 }
 0x1cf   :  { %v4198_v18 = vpop.f32.mrf.mxu3  ;;  %v4212_v46 = vpop.f32.mrf.mxu2 }
 0x1d0   :  { %4928 = vst [vmem:[#allocation48_spill] sm:$0xff] %v4198_v18  ;;  %1529 = vmatpush.msra.mxu0 %v3808_v0  ;;  %1560 = vmatpush.msra.mxu1 %v3887_v43 }
 0x1d1   :  { %4933 = vst [vmem:[#allocation53_spill] sm:$0xff] %v4212_v46  ;;  %v1452_v23 = vld.sshfl [vmem:[#allocation1 + $0x8] sm:$0xff pattern:$0x75316420] }
 0x1d2   :  { %1530 = vmatpush.msra.mxu0 %v3829_v29  ;;  %1561 = vmatpush.msra.mxu1 %v3920_v50 }
 0x1d3   :  { %2870 = vmatpush.msk.msra.mxu3 %vm1320_vm3, %v1452_v23 }
 0x1d4   :  { %v4210_v63 = vpop.f32.mrf.mxu1  ;;  %1531 = vmatpush.msra.mxu0 %v3844_v35  ;;  %1562 = vmatpush.msra.mxu1 %v3937_v54 }
 0x1d5   :  { %4932 = vst [vmem:[#allocation52_spill] sm:$0xff] %v4210_v63  ;;  %v4229_v30 = vpop.f32.mrf.mxu0 }
 0x1d6   :  { %4939 = vst [vmem:[#allocation59_spill] sm:$0xff] %v4229_v30  ;;  %1532 = vmatpush.msra.mxu0 %v3854_v37  ;;  %1563 = vmatpush.msra.mxu1 %v3966_v59 }
 0x1d7   :  { %v4206_v28 = vpop.f32.mrf.mxu3  ;;  %v4225_v20 = vpop.f32.mrf.mxu2 }
 0x1d8   :  { %4931 = vst [vmem:[#allocation51_spill] sm:$0xff] %v4206_v28  ;;  %1533 = vmatpush.msra.mxu0 %v3872_v41  ;;  %1564 = vmatpush.msra.mxu1 %v3983_v1 }
 0x1d9   :  { %4938 = vst [vmem:[#allocation58_spill] sm:$0xff] %v4225_v20 }
 0x1da   :  { %1534 = vmatpush.msra.mxu0 %v3892_v44  ;;  %1565 = vmatpush.msra.mxu1 %v3997_v3 }
 0x1dc   :  { %v4218_v10 = vpop.f32.mrf.mxu1  ;;  %1535 = vmatpush.msra.mxu0 %v3897_v45 }
 0x1dd   :  { %4936 = vst [vmem:[#allocation56_spill] sm:$0xff] %v4218_v10 }
 0x1de   :  { %1536 = vmatpush.msra.mxu0 %v3909_v47 }
 0x1df   :  { %v4214_v17 = vpop.f32.mrf.mxu3  ;;  %v4231_v5 = vpop.f32.mrf.mxu2 }
 0x1e0   :  { %4934 = vst [vmem:[#allocation54_spill] sm:$0xff] %v4214_v17  ;;  %1537 = vmatpush.msra.mxu0 %v3926_v52 }
 0x1e1   :  { %4940 = vst [vmem:[#allocation60_spill] sm:$0xff] %v4231_v5  ;;  %v4240_v5 = vpop.f32.mrf.mxu0 }
 0x1e2   :  { %4941 = vst [vmem:[#allocation61_spill] sm:$0xff] %v4240_v5  ;;  %1538 = vmatpush.msra.mxu0 %v3932_v53 }
 0x1e4   :  { %1539 = vmatpush.msra.mxu0 %v3953_v57 }
 0x20b   :  { %v1155_v6 = vpop.f32.mrf.mxu1 }
 0x212   :  { %v1132_v12 = vpop.f32.mrf.mxu3 }
 0x213   :  { %v1158_v10 = vpop.f32.mrf.mxu1  ;;  %v1156_v32 = vadd.f32 %v1155_v6, %v1132_v12  ;;  %v1451_v6 = vld.sshfl [vmem:[#allocation1] sm:$0xff pattern:$0x75316420] }
 0x214   :  { %2867 = vmatpush.msk.msra.mxu2 %vm1320_vm3, %v1451_v6  ;;  %1721 = vst [vmem:[#allocation1] ss:$2 sm:$0xff] %v4223_v21  ;;  %v4942_v21 = vld [vmem:[#allocation32_spill] sm:$0xff] }
 0x215   :  { %1540 = vmatpush.msra.mxu0 %v4942_v21 }
 0x21a   :  { %v1135_v56 = vpop.f32.mrf.mxu3 }
 0x222   :  { %v1188_v17 = vpop.f32.mrf.mxu2  ;;  %v1211_v63 = vpop.f32.mrf.mxu3 }
 0x223   :  { %v1212_v49 = vadd.f32 %v1211_v63, %v1188_v17 }
 0x225   :  { %v1273_v5 = vmax.f32 %v1156_v32, %v1212_v49 }
 0x22a   :  { %v1191_v30 = vpop.f32.mrf.mxu2  ;;  %v1214_v20 = vpop.f32.mrf.mxu3 }
 0x22b   :  { %v1267_v19 = vpop.f32.mrf.mxu1  ;;  %v1215_v17 = vadd.f32 %v1214_v20, %v1191_v30 }
 0x22c   :  { %v1244_v2 = vpop.f32.mrf.mxu0 }
 0x22d   :  { %v1268_v28 = vadd.f32 %v1267_v19, %v1244_v2 }
 0x22f   :  { %v1275_v63 = vmax.f32 %v1273_v5, %v1268_v28  ;;  %v1159_v5 = vadd.f32 %v1158_v10, %v1135_v56 }
 0x231   :  { %v1277_v12 = vsub.f32 %v1156_v32, %v1275_v63  ;;  %v1283_v33 = vsub.f32 %v1212_v49, %v1275_v63  ;;  %v1289_v27 = vsub.f32 %v1268_v28, %v1275_v63  ;;  %v1274_v28 = vmax.f32 %v1159_v5, %v1215_v17 }
 0x233   :  { %v1279_v19 = vmul.f32 1.442695, %v1277_v12  ;;  %v1285_v30 = vmul.f32 1.442695, %v1283_v33  ;;  %v1270_v20 = vpop.f32.mrf.mxu1  ;;  %v1291_v2 = vmul.f32 1.442695, %v1289_v27 }
 0x234   :  { %v1247_v4 = vpop.f32.mrf.mxu0 }
 0x235   :  { %2952 = vpow2.f32 %v1279_v19  ;;  %v1271_v49 = vadd.f32 %v1270_v20, %v1247_v4 }
 0x236   :  { %2954 = vpow2.f32 %v1285_v30  ;;  %v4943_v30 = vld [vmem:[#allocation33_spill] sm:$0xff] }
 0x237   :  { %v1276_v32 = vmax.f32 %v1274_v28, %v1271_v49  ;;  %2956 = vpow2.f32 %v1291_v2  ;;  %1541 = vmatpush.msra.mxu0 %v4943_v30 }
 0x239   :  { %v1278_v23 = vsub.f32 %v1159_v5, %v1276_v32  ;;  %v1284_v63 = vsub.f32 %v1215_v17, %v1276_v32  ;;  %v1290_v56 = vsub.f32 %v1271_v49, %v1276_v32  ;;  %v4944_v5 = vld [vmem:[#allocation34_spill] sm:$0xff] }
 0x23a   :  { %1542 = vmatpush.msra.mxu0 %v4944_v5 }
 0x23b   :  { %v2953_v10 = vpop.eup %2952  ;;  %v1281_v27 = vmul.f32 1.442695, %v1278_v23  ;;  %v1287_v33 = vmul.f32 1.442695, %v1284_v63  ;;  %v1293_v12 = vmul.f32 1.442695, %v1290_v56 }
 0x23c   :  { %v2955_v6 = vpop.eup %2954 }
 0x23d   :  { %v1295_v4 = vadd.f32 %v2955_v6, %v2953_v10  ;;  %2958 = vpow2.f32 %v1281_v27  ;;  %v2957_v19 = vpop.eup %2956 }
 0x23e   :  { %2960 = vpow2.f32 %v1287_v33 }
 0x23f   :  { %v1297_v20 = vadd.f32 %v2957_v19, %v1295_v4  ;;  %2962 = vpow2.f32 %v1293_v12  ;;  %v1722_v4 = vld.sshfl [vmem:[#allocation1] sm:$0xff pattern:$0x75316420] }
 0x241   :  { %2964 = vrcp.f32 %v1297_v20 }
 0x243   :  { %v2959_v17 = vpop.eup %2958 }
 0x244   :  { %v2961_v2 = vpop.eup %2960 }
 0x245   :  { %v1296_v28 = vadd.f32 %v2961_v2, %v2959_v17  ;;  %v2963_v49 = vpop.eup %2962 }
 0x247   :  { %v2965_v32 = vpop.eup %2964  ;;  %v1298_v23 = vadd.f32 %v2963_v49, %v1296_v28 }
 0x248   :  { %v1301_v63 = vmul.f32 %v2965_v32, %v1297_v20 }
 0x249   :  { %2966 = vrcp.f32 %v1298_v23 }
 0x24a   :  { %v1303_v56 = vsub.f32 2.0, %v1301_v63 }
 0x24c   :  { %v1305_v46 = vmul.f32 %v2965_v32, %v1303_v56 }
 0x24e   :  { %v1307_v27 = vmul.f32 %v2953_v10, %v1305_v46  ;;  %v1379_v33 = vmul.f32 %v2955_v6, %v1305_v46 }
 0x24f   :  { %v2967_v18 = vpop.eup %2966 }
 0x250   :  { %2856 = vmatmul.msk.f32.vlgmr.msrb.gmra.mxu2 %vm1313_vm4, %v1307_v27  ;;  %2859 = vmatmul.msk.f32.vlgmr.msrb.gmra.mxu3 %vm1313_vm4, %v1307_v27  ;;  %v1302_v12 = vmul.f32 %v2967_v18, %v1298_v23 }
 0x251   :  { %2862 = vmatmul.msk.f32.vlgmr.msrb.gmra.mxu0 %vm1313_vm4, %v1379_v33  ;;  %2865 = vmatmul.msk.f32.vlgmr.msrb.gmra.mxu1 %vm1313_vm4, %v1379_v33  ;;  %v4951_v33 = vld [vmem:[#allocation51_spill] sm:$0xff] }
 0x252   :  { %1583 = vmatpush.msrb.mxu2 %v3789_v51  ;;  %1639 = vmatpush.msrb.mxu1 %v3789_v51  ;;  %v1304_v20 = vsub.f32 2.0, %v1302_v12  ;;  %v1448_v51 = vmul.f32 %v2957_v19, %v1305_v46  ;;  %v4949_v46 = vld [vmem:[#allocation50_spill] sm:$0xff] }
 0x253   :  { %1614 = vmatpush.msrb.mxu3 %v3813_v11  ;;  %2879 = vmatpush.msk.msrb.mxu0 %vm1320_vm3, %v1722_v4  ;;  %v4952_v4 = vld [vmem:[#allocation58_spill] sm:$0xff] }
 0x254   :  { %1584 = vmatpush.msrb.mxu2 %v3803_v62  ;;  %1640 = vmatpush.msrb.mxu1 %v3803_v62  ;;  %v1306_v10 = vmul.f32 %v2967_v18, %v1304_v20 }
 0x255   :  { %1615 = vmatpush.msrb.mxu3 %v3849_v36 }
 0x256   :  { %1585 = vmatpush.msrb.mxu2 %v3808_v0  ;;  %1641 = vmatpush.msrb.mxu1 %v3808_v0  ;;  %v1308_v6 = vmul.f32 %v2959_v17, %v1306_v10  ;;  %v1380_v28 = vmul.f32 %v2961_v2, %v1306_v10  ;;  %v1449_v62 = vmul.f32 %v2963_v49, %v1306_v10  ;;  %v934_v0 = vld [vmem:[#allocation16] sm:$0x3]  ;;  %v4953_v10 = vld [vmem:[#allocation52_spill] sm:$0xff] }
 0x257   :  { %1616 = vmatpush.msrb.mxu3 %v3887_v43  ;;  %v4950_v17 = vld [vmem:[#allocation55_spill] sm:$0xff] }
 0x258   :  { %1586 = vmatpush.msrb.mxu2 %v3829_v29  ;;  %1642 = vmatpush.msrb.mxu1 %v3829_v29  ;;  %v937_v29 = vperm.slane %v934_v0, 1 }
 0x259   :  { %2857 = vmatmul.msk.f32.gmra.mxu2 %vm1313_vm4, %v1308_v6  ;;  %2860 = vmatmul.msk.f32.gmra.mxu3 %vm1313_vm4, %v1308_v6 }
 0x25a   :  { %2863 = vmatmul.msk.f32.gmra.mxu0 %vm1313_vm4, %v1380_v28  ;;  %2866 = vmatmul.msk.f32.gmra.mxu1 %vm1313_vm4, %v1380_v28  ;;  %v1040_v20 = vadd.f32 %v4952_v4, %v937_v29  ;;  %v4954_v28 = vld [vmem:[#allocation59_spill] sm:$0xff] }
 0x25b   :  { %1587 = vmatpush.msrb.mxu2 %v3844_v35  ;;  %1643 = vmatpush.msrb.mxu1 %v3844_v35 }
 0x25c   :  { %1617 = vmatpush.msrb.mxu3 %v3920_v50 }
 0x25d   :  { %1588 = vmatpush.msrb.mxu2 %v3854_v37  ;;  %1644 = vmatpush.msrb.mxu1 %v3854_v37 }
 0x25e   :  { %1618 = vmatpush.msrb.mxu3 %v3937_v54 }
 0x25f   :  { %1589 = vmatpush.msrb.mxu2 %v3872_v41  ;;  %1645 = vmatpush.msrb.mxu1 %v3872_v41 }
 0x260   :  { %1619 = vmatpush.msrb.mxu3 %v3966_v59 }
 0x261   :  { %1590 = vmatpush.msrb.mxu2 %v3892_v44  ;;  %1646 = vmatpush.msrb.mxu1 %v3892_v44 }
 0x262   :  { %2868 = vmatmul.msk.f32.vlgmr.msra.gmra.mxu2 %vm1313_vm4, %v1448_v51  ;;  %2871 = vmatmul.msk.f32.vlgmr.msra.gmra.mxu3 %vm1313_vm4, %v1448_v51  ;;  %v4392_v51 = vadd.f32 %v4954_v28, %v1040_v20 }
 0x263   :  { %1543 = vmatmul.f32.vlgmr.msra.gmra.mxu0 %v4061_v25  ;;  %2873 = vmatmul.msk.f32.vlgmr.msra.gmra.mxu1 %vm358_vm1, %v4068_v9 }
 0x264   :  { %1591 = vmatpush.msrb.mxu2 %v3897_v45  ;;  %1647 = vmatpush.msrb.mxu1 %v3897_v45 }
 0x265   :  { %1620 = vmatpush.msrb.mxu3 %v3983_v1 }
 0x266   :  { %1592 = vmatpush.msrb.mxu2 %v3909_v47  ;;  %1648 = vmatpush.msrb.mxu1 %v3909_v47 }
 0x267   :  { %1621 = vmatpush.msrb.mxu3 %v3997_v3 }
 0x268   :  { %1593 = vmatpush.msrb.mxu2 %v3926_v52  ;;  %1649 = vmatpush.msrb.mxu1 %v3926_v52 }
 0x269   :  { %1670 = vmatpush.msra.mxu3 %v3813_v11  ;;  %v936_v11 = vperm.slane %v934_v0, 0 }
 0x26a   :  { %1594 = vmatpush.msrb.mxu2 %v3932_v53  ;;  %1650 = vmatpush.msrb.mxu1 %v3932_v53 }
 0x26b   :  { %2869 = vmatmul.msk.f32.gmra.mxu2 %vm1313_vm4, %v1449_v62  ;;  %2872 = vmatmul.msk.f32.gmra.mxu3 %vm1313_vm4, %v1449_v62  ;;  %v958_v35 = vadd.f32 %v4180_v22, %v936_v11  ;;  %v964_v37 = vadd.f32 %v4190_v60, %v936_v11  ;;  %v970_v12 = vadd.f32 %v4951_v33, %v936_v11 }
 0x26c   :  { %1546 = vmatmul.f32.gmra.mxu0 %v4100_v42  ;;  %2874 = vmatmul.msk.f32.gmra.mxu1 %vm358_vm1, %v4103_v61 }
 0x26d   :  { %1595 = vmatpush.msrb.mxu2 %v3953_v57  ;;  %1651 = vmatpush.msrb.mxu1 %v3953_v57  ;;  %v4389_v6 = vadd.f32 %v4953_v10, %v970_v12 }
 0x26e   :  { %1671 = vmatpush.msra.mxu3 %v3849_v36  ;;  %v1028_v36 = vadd.f32 %v4188_v39, %v937_v29 }
 0x26f   :  { %1596 = vmatpush.msrb.mxu2 %v4942_v21  ;;  %1652 = vmatpush.msrb.mxu1 %v4942_v21 }
 0x270   :  { %1672 = vmatpush.msra.mxu3 %v3887_v43  ;;  %v1034_v43 = vadd.f32 %v4204_v48, %v937_v29  ;;  %v4948_v48 = vld [vmem:[#allocation49_spill] sm:$0xff] }
 0x271   :  { %1597 = vmatpush.msrb.mxu2 %v4943_v30  ;;  %1653 = vmatpush.msrb.mxu1 %v4943_v30 }
 0x272   :  { %1673 = vmatpush.msra.mxu3 %v3920_v50  ;;  %v4360_v25 = vadd.f32 %v4208_v40, %v1034_v43 }
 0x273   :  { %1598 = vmatpush.msrb.mxu2 %v4944_v5  ;;  %1654 = vmatpush.msrb.mxu1 %v4944_v5 }
 0x274   :  { %1599 = vmatmul.f32.vlgmr.msrb.gmra.mxu2 %v4115_v7  ;;  %2875 = vmatmul.msk.f32.vlgmr.msrb.gmra.mxu3 %vm358_vm1, %v4122_v24 }
 0x275   :  { %1655 = vmatmul.f32.vlgmr.msrb.gmra.mxu1 %v4149_v16  ;;  %1674 = vmatpush.msra.mxu3 %v3937_v54 }
 0x277   :  { %1675 = vmatpush.msra.mxu3 %v3966_v59  ;;  %v4351_v59 = vadd.f32 %v4182_v34, %v958_v35  ;;  %v4946_v34 = vld [vmem:[#allocation53_spill] sm:$0xff] }
 0x278   :  { %v1037_v39 = vadd.f32 %v4946_v34, %v937_v29 }
 0x279   :  { %1676 = vmatpush.msra.mxu3 %v3983_v1  ;;  %v4354_v1 = vadd.f32 %v4192_v55, %v1028_v36 }
 0x27a   :  { %v4380_v2 = vadd.f32 %v4950_v17, %v1037_v39 }
 0x27b   :  { %1677 = vmatpush.msra.mxu3 %v3997_v3  ;;  %v4357_v3 = vadd.f32 %v4194_v26, %v964_v37  ;;  %v4947_v26 = vld [vmem:[#allocation47_spill] sm:$0xff] }
 0x27c   :  { %1602 = vmatmul.f32.gmra.mxu2 %v4134_v15  ;;  %2876 = vmatmul.msk.f32.gmra.mxu3 %vm358_vm1, %v4137_v8 }
 0x27d   :  { %1658 = vmatmul.f32.gmra.mxu1 %v4168_v14  ;;  %v1031_v14 = vadd.f32 %v4196_v13, %v937_v29 }
 0x27f   :  { %v4374_v40 = vadd.f32 %v4948_v48, %v1031_v14  ;;  %v4428_v48 = vld [vmem:[%s4885_s19 + $0x70] sm:$0xff] }
 0x284   :  { %2877 = vmatmul.msk.f32.vlgmr.msra.gmra.mxu3 %vm358_vm1, %v4156_v38  ;;  %v961_v38 = vadd.f32 %v4184_v31, %v936_v11 }
 0x286   :  { %v4371_v18 = vadd.f32 %v4947_v26, %v961_v38  ;;  %v4959_v38 = vld [vmem:[#allocation61_spill] sm:$0xff] }
 0x28c   :  { %2878 = vmatmul.msk.f32.gmra.mxu3 %vm358_vm1, %v4171_v58  ;;  %v4945_v58 = vld [vmem:[#allocation48_spill] sm:$0xff] }
 0x28d   :  { %v967_v22 = vadd.f32 %v4945_v58, %v936_v11 }
 0x28f   :  { %v4377_v19 = vadd.f32 %v4949_v46, %v967_v22  ;;  %v4434_v46 = vld [vmem:[%s4885_s19 + $0x68] sm:$0xff] }
 0x2ce   :  { %v1411_v50 = vpop.f32.mrf.mxu0  ;;  %v1434_v54 = vpop.f32.mrf.mxu1 }
 0x2cf   :  { %v1440_v61 = vmul.f32 %v1411_v50, %v4357_v3  ;;  %v1441_v7 = vmul.f32 %v1434_v54, %v4360_v25  ;;  %v4955_v50 = vld [vmem:[#allocation54_spill] sm:$0xff] }
 0x2d0   :  { %v973_v54 = vadd.f32 %v4955_v50, %v936_v11 }
 0x2d3   :  { %v1342_v9 = vpop.f32.mrf.mxu2  ;;  %v1365_v42 = vpop.f32.mrf.mxu3 }
 0x2d4   :  { %v1371_v24 = vmul.f32 %v1342_v9, %v4351_v59  ;;  %v1372_v15 = vmul.f32 %v1365_v42, %v4354_v1  ;;  %v4956_v9 = vld [vmem:[#allocation60_spill] sm:$0xff] }
 0x2d5   :  { %v1043_v42 = vadd.f32 %v4956_v9, %v937_v29 }
 0x2d6   :  { %v1444_v8 = vadd.f32 %v1440_v61, %v1371_v24  ;;  %v1445_v16 = vadd.f32 %v1441_v7, %v1372_v15  ;;  %v1723_v61 = vld.sshfl [vmem:[#allocation1 + $0x8] sm:$0xff pattern:$0x75316420] }
 0x2d7   :  { %v1414_v60 = vpop.f32.mrf.mxu0  ;;  %v1437_v55 = vpop.f32.mrf.mxu1  ;;  %2882 = vmatpush.msk.msra.mxu2 %vm1320_vm3, %v1723_v61  ;;  %v4957_v7 = vld [vmem:[#allocation57_spill] sm:$0xff]  ;;  %v4958_v24 = vld [vmem:[#allocation56_spill] sm:$0xff]  ;;  %v4408_v14 = vadd.f32 %v4959_v38, %v1043_v42 }
 0x2d8   :  { %v1442_v49 = vmul.f32 %v1414_v60, %v4377_v19  ;;  %v1443_v32 = vmul.f32 %v1437_v55, %v4380_v2  ;;  %1790 = vst [vmem:[#allocation1] ss:$2 sm:$0xff] %v4957_v7  ;;  %v4405_v15 = vadd.f32 %v4958_v24, %v973_v54  ;;  %v4422_v55 = vld [vmem:[%s4885_s19 + $0x78] sm:$0xff]  ;;  %v4492_v38 = vld [vmem:[%s4885_s19 + $0x30] sm:$0xff] }
 0x2dc   :  { %v1345_v31 = vpop.f32.mrf.mxu2  ;;  %v1368_v13 = vpop.f32.mrf.mxu3 }
 0x2dd   :  { %v1373_v23 = vmul.f32 %v1345_v31, %v4371_v18  ;;  %v1374_v63 = vmul.f32 %v1368_v13, %v4374_v40  ;;  %v4440_v13 = vld [vmem:[%s4885_s19 + $0x60] sm:$0xff] }
 0x2df   :  { %v1446_v56 = vadd.f32 %v1442_v49, %v1373_v23  ;;  %v1447_v27 = vadd.f32 %v1443_v32, %v1374_v63  ;;  %v1791_v39 = vld.sshfl [vmem:[#allocation1] sm:$0xff pattern:$0x75316420]  ;;  %v1792_v60 = vld.sshfl [vmem:[#allocation1 + $0x8] sm:$0xff pattern:$0x75316420] }
 0x2e0   :  { %v1567_v11 = vpop.f32.mrf.mxu1  ;;  %2885 = vmatpush.msk.msrb.mxu3 %vm1320_vm3, %v1791_v39  ;;  %1859 = vst [vmem:[#allocation1] ss:$2 sm:$0xff] %v4957_v7  ;;  %2888 = vmatpush.msk.msra.mxu0 %vm1320_vm3, %v1792_v60  ;;  %v4448_v49 = vld [vmem:[%s4885_s19 + $0x58] sm:$0xff]  ;;  %v4455_v63 = vld [vmem:[%s4885_s19 + $0x50] sm:$0xff] }
 0x2e1   :  { %v4513_v60 = vld [vmem:[%s4885_s19 + $0x18] sm:$0xff] }
 0x2e2   :  { %1936 = vmatpush.msra.mxu3 %v4422_v55 }
 0x2e4   :  { %1937 = vmatpush.msra.mxu3 %v4428_v48 }
 0x2e5   :  { %v1480_v62 = vpop.f32.mrf.mxu2  ;;  %v1503_v0 = vpop.f32.mrf.mxu3 }
 0x2e6   :  { %v1509_v35 = vmul.f32 %v1480_v62, %v4389_v6  ;;  %v1510_v36 = vmul.f32 %v1503_v0, %v4392_v51  ;;  %1938 = vmatpush.msra.mxu3 %v4434_v46  ;;  %v4476_v62 = vld [vmem:[%s4885_s19 + $0x40] sm:$0xff] }
 0x2e7   :  { %v1860_v31 = vld.sshfl [vmem:[#allocation1] sm:$0xff pattern:$0x75316420]  ;;  %v1861_v50 = vld.sshfl [vmem:[#allocation1 + $0x8] sm:$0xff pattern:$0x75316420] }
 0x2e8   :  { %v4396_v37 = vadd.f32 %v1509_v35, %v1444_v8  ;;  %v4398_v43 = vadd.f32 %v1510_v36, %v1445_v16  ;;  %1939 = vmatpush.msra.mxu3 %v4440_v13  ;;  %2891 = vmatpush.msk.msra.mxu1 %vm1320_vm3, %v1860_v31  ;;  %2130 = vst [vmem:[#allocation1] ss:$2 sm:$0xff] %v4957_v7 }
 0x2e9   :  { %v1570_v17 = vpop.f32.mrf.mxu1  ;;  %2894 = vmatpush.msk.msrb.mxu2 %vm1320_vm3, %v1861_v50 }
 0x2ea   :  { %1992 = vmatpush.msrb.mxu1 %v4422_v55  ;;  %1940 = vmatpush.msra.mxu3 %v4448_v49 }
 0x2ec   :  { %1993 = vmatpush.msrb.mxu1 %v4428_v48  ;;  %1941 = vmatpush.msra.mxu3 %v4455_v63 }
 0x2ee   :  { %v1483_v58 = vpop.f32.mrf.mxu2  ;;  %v1506_v8 = vpop.f32.mrf.mxu3  ;;  %1994 = vmatpush.msrb.mxu1 %v4434_v46  ;;  %1942 = vmatpush.msra.mxu3 %v3872_v41  ;;  %v4469_v41 = vld [vmem:[%s4885_s19 + $0x48] sm:$0xff] }
 0x2ef   :  { %v1511_v16 = vmul.f32 %v1483_v58, %v4405_v15  ;;  %v1512_v22 = vmul.f32 %v1506_v8, %v4408_v14  ;;  %v4499_v8 = vld [vmem:[%s4885_s19 + $0x28] sm:$0xff] }
 0x2f0   :  { %1995 = vmatpush.msrb.mxu1 %v4440_v13  ;;  %1943 = vmatpush.msra.mxu3 %v3892_v44 }
 0x2f1   :  { %v4412_v34 = vadd.f32 %v1511_v16, %v1446_v56  ;;  %v4414_v29 = vadd.f32 %v1512_v22, %v1447_v27  ;;  %v1544_v56 = vpop.f32.mrf.mxu0  ;;  %v4506_v22 = vld [vmem:[%s4885_s19 + $0x20] sm:$0xff] }
 0x2f2   :  { %v1656_v33 = vpop.f32.mrf.mxu1  ;;  %1996 = vmatpush.msrb.mxu1 %v4448_v49  ;;  %1944 = vmatpush.msra.mxu3 %v3897_v45  ;;  %v1568_v12 = vadd.f32 %v1567_v11, %v1544_v56 }
 0x2f4   :  { %1997 = vmatpush.msrb.mxu1 %v4455_v63  ;;  %1945 = vmatpush.msra.mxu3 %v3909_v47 }
 0x2f6   :  { %1998 = vmatpush.msrb.mxu1 %v4469_v41  ;;  %1946 = vmatpush.msra.mxu3 %v3926_v52  ;;  %v4483_v52 = vld [vmem:[%s4885_s19 + $0x38] sm:$0xff] }
 0x2f7   :  { %v1623_v26 = vpop.f32.mrf.mxu3  ;;  %v1600_v32 = vpop.f32.mrf.mxu2 }
 0x2f8   :  { %v1624_v27 = vadd.f32 %v1623_v26, %v1600_v32  ;;  %1999 = vmatpush.msrb.mxu1 %v4476_v62  ;;  %1947 = vmatpush.msra.mxu3 %v3932_v53 }
 0x2f9   :  { %v1547_v45 = vpop.f32.mrf.mxu0 }
 0x2fa   :  { %v1685_v20 = vmax.f32 %v1568_v12, %v1624_v27  ;;  %2000 = vmatpush.msrb.mxu1 %v4483_v52  ;;  %1948 = vmatpush.msra.mxu3 %v3953_v57  ;;  %v1571_v54 = vadd.f32 %v1570_v17, %v1547_v45  ;;  %v1659_v53 = vpop.f32.mrf.mxu1 }
 0x2fc   :  { %2001 = vmatpush.msrb.mxu1 %v4492_v38  ;;  %1949 = vmatpush.msra.mxu3 %v4942_v21 }
 0x2fe   :  { %2002 = vmatpush.msrb.mxu1 %v4499_v8  ;;  %1950 = vmatpush.msra.mxu3 %v4943_v30 }
 0x2ff   :  { %v1626_v23 = vpop.f32.mrf.mxu3  ;;  %v1603_v28 = vpop.f32.mrf.mxu2 }
 0x300   :  { %v1627_v47 = vadd.f32 %v1626_v23, %v1603_v28  ;;  %2003 = vmatpush.msrb.mxu1 %v4506_v22  ;;  %1951 = vmatpush.msra.mxu3 %v4944_v5  ;;  %v4519_v23 = vld [vmem:[%s4885_s19 + $0x10] sm:$0xff] }
 0x302   :  { %v1686_v57 = vmax.f32 %v1571_v54, %v1627_v47  ;;  %2004 = vmatpush.msrb.mxu1 %v4513_v60 }
 0x304   :  { %2005 = vmatpush.msrb.mxu1 %v4519_v23 }
 0x307   :  { %v1679_v4 = vpop.f32.mrf.mxu3 }
 0x308   :  { %v1680_v10 = vadd.f32 %v1679_v4, %v1656_v33 }
 0x30a   :  { %v1687_v44 = vmax.f32 %v1685_v20, %v1680_v10 }
 0x30c   :  { %v1689_v0 = vsub.f32 %v1568_v12, %v1687_v44  ;;  %v1695_v35 = vsub.f32 %v1624_v27, %v1687_v44  ;;  %v1701_v36 = vsub.f32 %v1680_v10, %v1687_v44  ;;  %v4525_v27 = vld [vmem:[%s4885_s19 + $0x8] sm:$0xff]  ;;  %v4531_v12 = vld [vmem:[%s4885_s19] sm:$0xff] }
 0x30d   :  { %2006 = vmatpush.msrb.mxu1 %v4525_v27 }
 0x30e   :  { %v1691_v9 = vmul.f32 1.442695, %v1689_v0  ;;  %v1697_v42 = vmul.f32 1.442695, %v1695_v35  ;;  %v1703_v61 = vmul.f32 1.442695, %v1701_v36 }
 0x30f   :  { %v1682_v24 = vpop.f32.mrf.mxu3  ;;  %2007 = vmatpush.msrb.mxu1 %v4531_v12 }
 0x310   :  { %2968 = vpow2.f32 %v1691_v9  ;;  %v1683_v58 = vadd.f32 %v1682_v24, %v1659_v53  ;;  %v3031_v24 = vld [vmem:[%s4885_s19 + $0xb0] sm:$0xff] }
 0x311   :  { %2970 = vpow2.f32 %v1697_v42 }
 0x312   :  { %v1688_v16 = vmax.f32 %v1686_v57, %v1683_v58  ;;  %2972 = vpow2.f32 %v1703_v61  ;;  %v3030_v61 = vld [vmem:[%s4885_s19 + $0xb8] sm:$0xff] }
 0x314   :  { %v1690_v21 = vsub.f32 %v1571_v54, %v1688_v16  ;;  %v1696_v11 = vsub.f32 %v1627_v47, %v1688_v16  ;;  %v1702_v39 = vsub.f32 %v1683_v58, %v1688_v16  ;;  %v3032_v58 = vld [vmem:[%s4885_s19 + $0xa8] sm:$0xff] }
 0x316   :  { %v2969_v30 = vpop.eup %2968  ;;  %v1693_v26 = vmul.f32 1.442695, %v1690_v21  ;;  %v1699_v17 = vmul.f32 1.442695, %v1696_v11  ;;  %v1705_v32 = vmul.f32 1.442695, %v1702_v39 }
 0x317   :  { %v2971_v31 = vpop.eup %2970  ;;  %v3033_v39 = vld [vmem:[%s4885_s19 + $0xa0] sm:$0xff] }
 0x318   :  { %v1707_v5 = vadd.f32 %v2971_v31, %v2969_v30  ;;  %2974 = vpow2.f32 %v1693_v26  ;;  %v2973_v56 = vpop.eup %2972  ;;  %v3035_v26 = vld [vmem:[%s4885_s19 + $0x90] sm:$0xff] }
 0x319   :  { %2976 = vpow2.f32 %v1699_v17  ;;  %v3036_v17 = vld [vmem:[%s4885_s19 + $0x88] sm:$0xff] }
 0x31a   :  { %v1709_v33 = vadd.f32 %v2973_v56, %v1707_v5  ;;  %2978 = vpow2.f32 %v1705_v32  ;;  %v3037_v32 = vld [vmem:[%s4885_s19 + $0x80] sm:$0xff] }
 0x31b   :  { %v4961_v5 = vld [vmem:[#allocation39_spill] sm:$0xff] }
 0x31c   :  { %2980 = vrcp.f32 %v1709_v33 }
 0x31e   :  { %v2975_v4 = vpop.eup %2974 }
 0x31f   :  { %v2977_v20 = vpop.eup %2976 }
 0x320   :  { %v1708_v10 = vadd.f32 %v2977_v20, %v2975_v4  ;;  %v2979_v28 = vpop.eup %2978 }
 0x322   :  { %v2981_v44 = vpop.eup %2980  ;;  %v1710_v45 = vadd.f32 %v2979_v28, %v1708_v10 }
 0x323   :  { %v1713_v47 = vmul.f32 %v2981_v44, %v1709_v33  ;;  %v4963_v33 = vld [vmem:[#allocation41_spill] sm:$0xff] }
 0x324   :  { %2982 = vrcp.f32 %v1710_v45 }
 0x325   :  { %v1715_v0 = vsub.f32 2.0, %v1713_v47 }
 0x327   :  { %v1717_v35 = vmul.f32 %v2981_v44, %v1715_v0 }
 0x329   :  { %v1719_v36 = vmul.f32 %v2969_v30, %v1717_v35  ;;  %v1788_v50 = vmul.f32 %v2971_v31, %v1717_v35  ;;  %v1857_v54 = vmul.f32 %v2973_v56, %v1717_v35  ;;  %v3034_v30 = vld [vmem:[%s4885_s19 + $0x98] sm:$0xff]  ;;  %v4962_v56 = vld [vmem:[#allocation37_spill] sm:$0xff]  ;;  %s3408_s19 = smov [#allocation23]  }
 0x32a   :  { %v2983_v9 = vpop.eup %2982  ;;  %v4960_v31 = vld [vmem:[#allocation35_spill] sm:$0xff]  ;;  %s2780_s6 = sshll.u32 %s3408_s19, 4  ;;  %s2781_s6 = int_to_ptr.vmem [resolvable:$true] %s2780_s6 }
 0x32b   :  { %v1714_v42 = vmul.f32 %v2983_v9, %v1710_v45  ;;  %2880 = vmatmul.msk.f32.vlgmr.msrb.gmra.mxu0 %vm1313_vm4, %v1719_v36  ;;  %2883 = vmatmul.msk.f32.vlgmr.msra.gmra.mxu2 %vm1313_vm4, %v1719_v36 }
 0x32c   :  { %2886 = vmatmul.msk.f32.vlgmr.msrb.gmra.mxu3 %vm1313_vm4, %v1788_v50  ;;  %2892 = vmatmul.msk.f32.vlgmr.msra.gmra.mxu1 %vm1313_vm4, %v1857_v54 }
 0x32d   :  { %v1716_v53 = vsub.f32 2.0, %v1714_v42  ;;  %1967 = vmatpush.msrb.mxu0 %v3030_v61  ;;  %2023 = vmatpush.msra.mxu2 %v3030_v61 }
 0x32f   :  { %1968 = vmatpush.msrb.mxu0 %v3031_v24  ;;  %v1718_v57 = vmul.f32 %v2983_v9, %v1716_v53  ;;  %2024 = vmatpush.msra.mxu2 %v3031_v24 }
 0x331   :  { %1969 = vmatpush.msrb.mxu0 %v3032_v58  ;;  %v1720_v16 = vmul.f32 %v2975_v4, %v1718_v57  ;;  %v1789_v21 = vmul.f32 %v2977_v20, %v1718_v57  ;;  %v1858_v11 = vmul.f32 %v2979_v28, %v1718_v57  ;;  %2025 = vmatpush.msra.mxu2 %v3032_v58 }
 0x333   :  { %2881 = vmatmul.msk.f32.gmra.mxu0 %vm1313_vm4, %v1720_v16  ;;  %2884 = vmatmul.msk.f32.gmra.mxu2 %vm1313_vm4, %v1720_v16  ;;  %v2132_v16 = vld.sshfl [vmem:[#allocation1 + $0x8] sm:$0xff pattern:$0x75316420] }
 0x334   :  { %2887 = vmatmul.msk.f32.gmra.mxu3 %vm1313_vm4, %v1789_v21  ;;  %2893 = vmatmul.msk.f32.gmra.mxu1 %vm1313_vm4, %v1858_v11 }
 0x335   :  { %1970 = vmatpush.msrb.mxu0 %v3033_v39  ;;  %2026 = vmatpush.msra.mxu2 %v3033_v39 }
 0x336   :  { %2906 = vmatpush.msk.msra.mxu1 %vm1320_vm3, %v2132_v16  ;;  %v2350_v16 = vld [vmem:[#allocation17 + $0x78] sm:$0xff] }
 0x337   :  { %1971 = vmatpush.msrb.mxu0 %v3034_v30  ;;  %2027 = vmatpush.msra.mxu2 %v3034_v30 }
 0x339   :  { %1972 = vmatpush.msrb.mxu0 %v3035_v26  ;;  %2028 = vmatpush.msra.mxu2 %v3035_v26 }
 0x33b   :  { %1973 = vmatpush.msrb.mxu0 %v3036_v17  ;;  %2895 = vmatmul.msk.f32.vlgmr.msrb.gmra.mxu2 %vm1313_vm4, %v1857_v54 }
 0x33c   :  { %2889 = vmatmul.msk.f32.vlgmr.msra.gmra.mxu0 %vm1313_vm4, %v1788_v50  ;;  %1952 = vmatmul.f32.vlgmr.msra.gmra.mxu3 %v4960_v31 }
 0x33d   :  { %1974 = vmatpush.msrb.mxu0 %v3037_v32  ;;  %2008 = vmatmul.f32.vlgmr.msrb.gmra.mxu1 %v4961_v5 }
 0x33e   :  { %2029 = vmatpush.msra.mxu2 %v3036_v17 }
 0x33f   :  { %2048 = vmatpush.msra.mxu0 %v4422_v55  ;;  %v4964_v55 = vld [vmem:[#allocation40_spill] sm:$0xff] }
 0x340   :  { %2030 = vmatpush.msra.mxu2 %v3037_v32 }
 0x341   :  { %2049 = vmatpush.msra.mxu0 %v4428_v48  ;;  %v4965_v48 = vld [vmem:[#allocation36_spill] sm:$0xff] }
 0x342   :  { %2079 = vmatpush.msrb.mxu2 %v3030_v61 }
 0x343   :  { %2050 = vmatpush.msra.mxu0 %v4434_v46  ;;  %2896 = vmatmul.msk.f32.gmra.mxu2 %vm1313_vm4, %v1858_v11  ;;  %v4966_v46 = vld [vmem:[#allocation42_spill] sm:$0xff] }
 0x344   :  { %1955 = vmatmul.f32.gmra.mxu3 %v4962_v56  ;;  %2890 = vmatmul.msk.f32.gmra.mxu0 %vm1313_vm4, %v1789_v21 }
 0x345   :  { %2051 = vmatpush.msra.mxu0 %v4440_v13  ;;  %2011 = vmatmul.f32.gmra.mxu1 %v4963_v33  ;;  %v4967_v13 = vld [vmem:[#allocation38_spill] sm:$0xff] }
 0x346   :  { %2080 = vmatpush.msrb.mxu2 %v3031_v24 }
 0x347   :  { %2052 = vmatpush.msra.mxu0 %v4448_v49  ;;  %v4968_v49 = vld [vmem:[#allocation44_spill] sm:$0xff] }
 0x348   :  { %2081 = vmatpush.msrb.mxu2 %v3032_v58  ;;  %v2131_v58 = vld.sshfl [vmem:[#allocation1] sm:$0xff pattern:$0x75316420] }
 0x349   :  { %2053 = vmatpush.msra.mxu0 %v4455_v63  ;;  %v4969_v63 = vld [vmem:[#allocation43_spill] sm:$0xff]  ;;  %2903 = vmatpush.msk.msrb.mxu3 %vm1320_vm3, %v2131_v58  ;;  %2199 = vst [vmem:[#allocation1] ss:$2 sm:$0xff] %v4957_v7  ;;  %v2349_v58 = vld [vmem:[#allocation17 + $0x70] sm:$0xff] }
 0x34a   :  { %2082 = vmatpush.msrb.mxu2 %v3033_v39 }
 0x34b   :  { %2054 = vmatpush.msra.mxu0 %v4469_v41  ;;  %2899 = vmatmul.msk.f32.vlgmr.msra.gmra.mxu2 %vm358_vm1, %v4964_v55  ;;  %v4970_v41 = vld [vmem:[#allocation46_spill] sm:$0xff] }
 0x34c   :  { %2083 = vmatpush.msrb.mxu2 %v3034_v30  ;;  %2897 = vmatmul.msk.f32.vlgmr.msrb.gmra.mxu0 %vm358_vm1, %v4965_v48  ;;  %v2365_v48 = vld [vmem:[#allocation17 + $0xf0] sm:$0xff] }
 0x34d   :  { %2055 = vmatpush.msra.mxu0 %v4476_v62  ;;  %v4971_v62 = vld [vmem:[#allocation45_spill] sm:$0xff] }
 0x34e   :  { %2084 = vmatpush.msrb.mxu2 %v3035_v26 }
 0x34f   :  { %2056 = vmatpush.msra.mxu0 %v4483_v52 }
 0x350   :  { %2085 = vmatpush.msrb.mxu2 %v3036_v17  ;;  %v2200_v5 = vld.sshfl [vmem:[#allocation1] sm:$0xff pattern:$0x75316420] }
 0x351   :  { %2057 = vmatpush.msra.mxu0 %v4492_v38 }
 0x352   :  { %2086 = vmatpush.msrb.mxu2 %v3037_v32  ;;  %v2201_v32 = vld.sshfl [vmem:[#allocation1 + $0x8] sm:$0xff pattern:$0x75316420] }
 0x353   :  { %2058 = vmatpush.msra.mxu0 %v4499_v8  ;;  %2900 = vmatmul.msk.f32.gmra.mxu2 %vm358_vm1, %v4966_v46  ;;  %2268 = vst [vmem:[#allocation1] ss:$2 sm:$0xff] %v4957_v7  ;;  %v2366_v46 = vld [vmem:[#allocation17 + $0xf8] sm:$0xff]  ;;  %v2359_v7 = vld [vmem:[#allocation17 + $0xc0] sm:$0xff] }
 0x354   :  { %2898 = vmatmul.msk.f32.gmra.mxu0 %vm358_vm1, %v4967_v13  ;;  %2909 = vmatpush.msk.msra.mxu2 %vm1320_vm3, %v2200_v5  ;;  %v2363_v13 = vld [vmem:[#allocation17 + $0xe0] sm:$0xff] }
 0x355   :  { %2059 = vmatpush.msra.mxu0 %v4506_v22  ;;  %2912 = vmatpush.msk.msra.mxu3 %vm1320_vm3, %v2201_v32  ;;  %v2345_v32 = vld [vmem:[#allocation17 + $0x50] sm:$0xff] }
 0x357   :  { %2060 = vmatpush.msra.mxu0 %v4513_v60 }
 0x359   :  { %2061 = vmatpush.msra.mxu0 %v4519_v23 }
 0x35a   :  { %v2269_v55 = vld.sshfl [vmem:[#allocation1] sm:$0xff pattern:$0x75316420] }
 0x35b   :  { %2062 = vmatpush.msra.mxu0 %v4525_v27  ;;  %2901 = vmatmul.msk.f32.vlgmr.msrb.gmra.mxu2 %vm358_vm1, %v4968_v49  ;;  %v2364_v49 = vld [vmem:[#allocation17 + $0xe8] sm:$0xff] }
 0x35c   :  { %2407 = vmatpush.msrb.mxu2 %v2365_v48  ;;  %v2346_v48 = vld [vmem:[#allocation17 + $0x58] sm:$0xff] }
 0x35d   :  { %2063 = vmatpush.msra.mxu0 %v4531_v12 }
 0x35e   :  { %2064 = vmatmul.f32.vlgmr.msra.gmra.mxu0 %v4969_v63  ;;  %2408 = vmatpush.msrb.mxu2 %v2363_v13 }
 0x35f   :  { %2915 = vmatpush.msk.msrb.mxu0 %vm1320_vm3, %v2269_v55 }
 0x361   :  { %2477 = vmatpush.msra.mxu0 %v2366_v46 }
 0x363   :  { %2902 = vmatmul.msk.f32.gmra.mxu2 %vm358_vm1, %v4970_v41  ;;  %2478 = vmatpush.msra.mxu0 %v2364_v49  ;;  %v2361_v41 = vld [vmem:[#allocation17 + $0xd0] sm:$0xff]  ;;  %v2343_v49 = vld [vmem:[#allocation17 + $0x40] sm:$0xff] }
 0x364   :  { %2409 = vmatpush.msrb.mxu2 %v2361_v41 }
 0x366   :  { %2067 = vmatmul.f32.gmra.mxu0 %v4971_v62  ;;  %v2362_v62 = vld [vmem:[#allocation17 + $0xd8] sm:$0xff]  ;;  %2410 = vmatpush.msrb.mxu2 %v2359_v7  ;;  %v2270_v7 = vld.sshfl [vmem:[#allocation1 + $0x8] sm:$0xff pattern:$0x75316420] }
 0x367   :  { %2479 = vmatpush.msra.mxu0 %v2362_v62  ;;  %2918 = vmatpush.msk.msrb.mxu1 %vm1320_vm3, %v2270_v7  ;;  %v2373_v7 = vld [vmem:[#allocation17 + $0x130] sm:$0xff] }
 0x3a8   :  { %v1751_v52 = vpop.f32.mrf.mxu0 }
 0x3a9   :  { %v1889_v38 = vpop.f32.mrf.mxu1  ;;  %v1780_v60 = vmul.f32 %v1751_v52, %v4351_v59 }
 0x3aa   :  { %v1918_v4 = vmul.f32 %v1889_v38, %v4389_v6  ;;  %v2360_v38 = vld [vmem:[#allocation17 + $0xc8] sm:$0xff] }
 0x3ab   :  { %2480 = vmatpush.msra.mxu0 %v2360_v38  ;;  %v2341_v38 = vld [vmem:[#allocation17 + $0x30] sm:$0xff] }
 0x3ae   :  { %v1774_v8 = vpop.f32.mrf.mxu2 }
 0x3af   :  { %v1820_v22 = vpop.f32.mrf.mxu3  ;;  %v1781_v35 = vmul.f32 %v1774_v8, %v4354_v1 }
 0x3b0   :  { %v1849_v23 = vmul.f32 %v1820_v22, %v4357_v3  ;;  %v1754_v27 = vpop.f32.mrf.mxu0 }
 0x3b1   :  { %v1892_v28 = vpop.f32.mrf.mxu1  ;;  %v1782_v45 = vmul.f32 %v1754_v27, %v4371_v18 }
 0x3b2   :  { %v1853_v20 = vadd.f32 %v1849_v23, %v1780_v60  ;;  %v1920_v36 = vmul.f32 %v1892_v28, %v4405_v15  ;;  %v2357_v60 = vld [vmem:[#allocation17 + $0xb0] sm:$0xff]  ;;  %v2358_v23 = vld [vmem:[#allocation17 + $0xb8] sm:$0xff] }
 0x3b3   :  { %2411 = vmatpush.msrb.mxu2 %v2357_v60  ;;  %2481 = vmatpush.msra.mxu0 %v2358_v23  ;;  %v2340_v60 = vld [vmem:[#allocation17 + $0x28] sm:$0xff] }
 0x3b4   :  { %v4607_v12 = vadd.f32 %v1918_v4, %v1853_v20  ;;  %v2355_v20 = vld [vmem:[#allocation17 + $0xa0] sm:$0xff] }
 0x3b5   :  { %2412 = vmatpush.msrb.mxu2 %v2355_v20  ;;  %v2337_v20 = vld [vmem:[#allocation17 + $0x10] sm:$0xff] }
 0x3b6   :  { %v1777_v10 = vpop.f32.mrf.mxu2 }
 0x3b7   :  { %v1823_v44 = vpop.f32.mrf.mxu3  ;;  %v1783_v21 = vmul.f32 %v1777_v10, %v4374_v40  ;;  %v2356_v10 = vld [vmem:[#allocation17 + $0xa8] sm:$0xff] }
 0x3b8   :  { %v1851_v47 = vmul.f32 %v1823_v44, %v4377_v19  ;;  %2482 = vmatpush.msra.mxu0 %v2356_v10 }
 0x3b9   :  { %v1843_v0 = vpop.f32.mrf.mxu0 }
 0x3ba   :  { %v1855_v50 = vadd.f32 %v1851_v47, %v1782_v45  ;;  %v1850_v54 = vmul.f32 %v1843_v0, %v4360_v25  ;;  %v2009_v52 = vpop.f32.mrf.mxu1  ;;  %v2353_v47 = vld [vmem:[#allocation17 + $0x90] sm:$0xff]  ;;  %v2354_v0 = vld [vmem:[#allocation17 + $0x98] sm:$0xff] }
 0x3bb   :  { %2413 = vmatpush.msrb.mxu2 %v2353_v47  ;;  %2483 = vmatpush.msra.mxu0 %v2354_v0  ;;  %v2335_v47 = vld [vmem:[#allocation17] sm:$0xff] }
 0x3bc   :  { %v1854_v9 = vadd.f32 %v1850_v54, %v1781_v35  ;;  %v4614_v42 = vadd.f32 %v1920_v36, %v1855_v50  ;;  %v2351_v36 = vld [vmem:[#allocation17 + $0x80] sm:$0xff]  ;;  %v2352_v50 = vld [vmem:[#allocation17 + $0x88] sm:$0xff] }
 0x3bd   :  { %2414 = vmatpush.msrb.mxu2 %v2351_v36  ;;  %2484 = vmatpush.msra.mxu0 %v2352_v50 }
 0x3be   :  { %v1912_v53 = vpop.f32.mrf.mxu2 }
 0x3bf   :  { %v1919_v61 = vmul.f32 %v1912_v53, %v4392_v51  ;;  %v1953_v8 = vpop.f32.mrf.mxu3  ;;  %2415 = vmatpush.msrb.mxu2 %v2349_v58  ;;  %2485 = vmatpush.msra.mxu0 %v2350_v16 }
 0x3c1   :  { %v4617_v24 = vadd.f32 %v1919_v61, %v1854_v9  ;;  %v1846_v57 = vpop.f32.mrf.mxu0 }
 0x3c2   :  { %v1852_v11 = vmul.f32 %v1846_v57, %v4380_v2  ;;  %v2012_v54 = vpop.f32.mrf.mxu1 }
 0x3c4   :  { %v1856_v39 = vadd.f32 %v1852_v11, %v1783_v21  ;;  %v2347_v11 = vld [vmem:[#allocation17 + $0x60] sm:$0xff] }
 0x3c5   :  { %2416 = vmatpush.msrb.mxu2 %v2347_v11 }
 0x3c6   :  { %v1915_v30 = vpop.f32.mrf.mxu2 }
 0x3c7   :  { %v1921_v26 = vmul.f32 %v1915_v30, %v4408_v14  ;;  %v1956_v21 = vpop.f32.mrf.mxu3  ;;  %2417 = vmatpush.msrb.mxu2 %v2345_v32  ;;  %v2382_v32 = vld [vmem:[#allocation17 + $0x178] sm:$0xff] }
 0x3c9   :  { %v4625_v17 = vadd.f32 %v1921_v26, %v1856_v39  ;;  %v1976_v31 = vpop.f32.mrf.mxu0  ;;  %v2348_v39 = vld [vmem:[#allocation17 + $0x68] sm:$0xff]  ;;  %2418 = vmatpush.msrb.mxu2 %v2343_v49 }
 0x3ca   :  { %v1977_v4 = vadd.f32 %v1976_v31, %v1953_v8  ;;  %2486 = vmatpush.msra.mxu0 %v2348_v39  ;;  %v2342_v8 = vld [vmem:[#allocation17 + $0x38] sm:$0xff] }
 0x3cb   :  { %2419 = vmatpush.msrb.mxu2 %v2341_v38  ;;  %v2374_v38 = vld [vmem:[#allocation17 + $0x138] sm:$0xff] }
 0x3cc   :  { %2487 = vmatpush.msra.mxu0 %v2346_v48 }
 0x3ce   :  { %v2032_v56 = vpop.f32.mrf.mxu2 }
 0x3cf   :  { %v2033_v22 = vadd.f32 %v2032_v56, %v2009_v52 }
 0x3d1   :  { %v1979_v33 = vpop.f32.mrf.mxu0  ;;  %v2094_v44 = vmax.f32 %v1977_v4, %v2033_v22 }
 0x3d2   :  { %v1980_v30 = vadd.f32 %v1979_v33, %v1956_v21 }
 0x3d6   :  { %v2035_v63 = vpop.f32.mrf.mxu2 }
 0x3d7   :  { %v2036_v9 = vadd.f32 %v2035_v63, %v2012_v54  ;;  %v2344_v63 = vld [vmem:[#allocation17 + $0x48] sm:$0xff] }
 0x3d8   :  { %2488 = vmatpush.msra.mxu0 %v2344_v63 }
 0x3d9   :  { %v2095_v46 = vmax.f32 %v1980_v30, %v2036_v9 }
 0x3da   :  { %2489 = vmatpush.msra.mxu0 %v2342_v8  ;;  %v2371_v8 = vld [vmem:[#allocation17 + $0x120] sm:$0xff] }
 0x3db   :  { %v2065_v27 = vpop.f32.mrf.mxu0 }
 0x3dc   :  { %2490 = vmatpush.msra.mxu0 %v2340_v60  ;;  %v2369_v60 = vld [vmem:[#allocation17 + $0x110] sm:$0xff] }
 0x3de   :  { %v2088_v28 = vpop.f32.mrf.mxu2 }
 0x3df   :  { %v2089_v45 = vadd.f32 %v2088_v28, %v2065_v27 }
 0x3e1   :  { %v2096_v35 = vmax.f32 %v2094_v44, %v2089_v45  ;;  %v2338_v44 = vld [vmem:[#allocation17 + $0x18] sm:$0xff] }
 0x3e2   :  { %2491 = vmatpush.msra.mxu0 %v2338_v44 }
 0x3e3   :  { %v2098_v53 = vsub.f32 %v1977_v4, %v2096_v35  ;;  %v2104_v61 = vsub.f32 %v2033_v22, %v2096_v35  ;;  %v2110_v57 = vsub.f32 %v2089_v45, %v2096_v35  ;;  %v2068_v56 = vpop.f32.mrf.mxu0  ;;  %v2339_v22 = vld [vmem:[#allocation17 + $0x20] sm:$0xff]  ;;  %v2336_v35 = vld [vmem:[#allocation17 + $0x8] sm:$0xff] }
 0x3e4   :  { %2420 = vmatpush.msrb.mxu2 %v2339_v22  ;;  %2492 = vmatpush.msra.mxu0 %v2336_v35  ;;  %v2372_v22 = vld [vmem:[#allocation17 + $0x128] sm:$0xff] }
 0x3e5   :  { %v2100_v26 = vmul.f32 1.442695, %v2098_v53  ;;  %v2106_v31 = vmul.f32 1.442695, %v2104_v61  ;;  %v2112_v5 = vmul.f32 1.442695, %v2110_v57 }
 0x3e6   :  { %v2091_v55 = vpop.f32.mrf.mxu2  ;;  %2421 = vmatpush.msrb.mxu2 %v2337_v20 }
 0x3e7   :  { %2984 = vpow2.f32 %v2100_v26  ;;  %v2092_v13 = vadd.f32 %v2091_v55, %v2068_v56  ;;  %v2379_v56 = vld [vmem:[#allocation17 + $0x160] sm:$0xff]  ;;  %v2380_v55 = vld [vmem:[#allocation17 + $0x168] sm:$0xff] }
 0x3e8   :  { %2986 = vpow2.f32 %v2106_v31  ;;  %2422 = vmatpush.msrb.mxu2 %v2335_v47  ;;  %v2381_v31 = vld [vmem:[#allocation17 + $0x170] sm:$0xff] }
 0x3e9   :  { %v2097_v41 = vmax.f32 %v2095_v46, %v2092_v13  ;;  %2988 = vpow2.f32 %v2112_v5  ;;  %v2377_v46 = vld [vmem:[#allocation17 + $0x150] sm:$0xff] }
 0x3eb   :  { %v2099_v33 = vsub.f32 %v1980_v30, %v2097_v41  ;;  %v2105_v62 = vsub.f32 %v2036_v9, %v2097_v41  ;;  %v2111_v52 = vsub.f32 %v2092_v13, %v2097_v41  ;;  %v2378_v13 = vld [vmem:[#allocation17 + $0x158] sm:$0xff] }
 0x3ed   :  { %v2985_v23 = vpop.eup %2984  ;;  %v2102_v27 = vmul.f32 1.442695, %v2099_v33  ;;  %v2108_v4 = vmul.f32 1.442695, %v2105_v62  ;;  %v2114_v28 = vmul.f32 1.442695, %v2111_v52 }
 0x3ee   :  { %v2987_v10 = vpop.eup %2986  ;;  %v2375_v62 = vld [vmem:[#allocation17 + $0x140] sm:$0xff]  ;;  %v2376_v52 = vld [vmem:[#allocation17 + $0x148] sm:$0xff] }
 0x3ef   :  { %v2116_v45 = vadd.f32 %v2987_v10, %v2985_v23  ;;  %2990 = vpow2.f32 %v2102_v27  ;;  %v2989_v0 = vpop.eup %2988  ;;  %v2367_v27 = vld [vmem:[#allocation17 + $0x100] sm:$0xff] }
 0x3f0   :  { %2992 = vpow2.f32 %v2108_v4  ;;  %v2368_v4 = vld [vmem:[#allocation17 + $0x108] sm:$0xff] }
 0x3f1   :  { %v2118_v36 = vadd.f32 %v2989_v0, %v2116_v45  ;;  %2994 = vpow2.f32 %v2114_v28 }
 0x3f3   :  { %2996 = vrcp.f32 %v2118_v36 }
 0x3f5   :  { %v2991_v50 = vpop.eup %2990 }
 0x3f6   :  { %v2993_v54 = vpop.eup %2992 }
 0x3f7   :  { %v2117_v9 = vadd.f32 %v2993_v54, %v2991_v50  ;;  %v2995_v53 = vpop.eup %2994 }
 0x3f9   :  { %v2997_v61 = vpop.eup %2996  ;;  %v2119_v57 = vadd.f32 %v2995_v53, %v2117_v9 }
 0x3fa   :  { %v2122_v58 = vmul.f32 %v2997_v61, %v2118_v36 }
 0x3fb   :  { %2998 = vrcp.f32 %v2119_v57 }
 0x3fc   :  { %v2124_v16 = vsub.f32 2.0, %v2122_v58 }
 0x3fe   :  { %v2126_v21 = vmul.f32 %v2997_v61, %v2124_v16 }
 0x400   :  { %v2128_v11 = vmul.f32 %v2985_v23, %v2126_v21  ;;  %v2197_v39 = vmul.f32 %v2987_v10, %v2126_v21  ;;  %v2266_v30 = vmul.f32 %v2989_v0, %v2126_v21  ;;  %v2370_v23 = vld [vmem:[#allocation17 + $0x118] sm:$0xff] }
 0x401   :  { %v2999_v26 = vpop.eup %2998 }
 0x402   :  { %v2123_v5 = vmul.f32 %v2999_v26, %v2119_v57  ;;  %2904 = vmatmul.msk.f32.vlgmr.msrb.gmra.mxu3 %vm1313_vm4, %v2128_v11  ;;  %2907 = vmatmul.msk.f32.vlgmr.msra.gmra.mxu1 %vm1313_vm4, %v2128_v11  ;;  %v2383_v57 = vld [vmem:[#allocation19] sm:$0x3] }
 0x403   :  { %2910 = vmatmul.msk.f32.vlgmr.msra.gmra.mxu2 %vm1313_vm4, %v2197_v39  ;;  %2916 = vmatmul.msk.f32.vlgmr.msrb.gmra.mxu0 %vm1313_vm4, %v2266_v30 }
 0x404   :  { %v2125_v48 = vsub.f32 2.0, %v2123_v5  ;;  %2450 = vmatpush.msrb.mxu3 %v2381_v31  ;;  %2520 = vmatpush.msra.mxu1 %v2382_v32 }
 0x406   :  { %v2127_v49 = vmul.f32 %v2999_v26, %v2125_v48  ;;  %2451 = vmatpush.msrb.mxu3 %v2379_v56  ;;  %2521 = vmatpush.msra.mxu1 %v2380_v55 }
 0x408   :  { %v2129_v63 = vmul.f32 %v2991_v50, %v2127_v49  ;;  %v2198_v41 = vmul.f32 %v2993_v54, %v2127_v49  ;;  %v2267_v33 = vmul.f32 %v2995_v53, %v2127_v49  ;;  %2452 = vmatpush.msrb.mxu3 %v2377_v46  ;;  %2522 = vmatpush.msra.mxu1 %v2378_v13 }
 0x40a   :  { %2905 = vmatmul.msk.f32.gmra.mxu3 %vm1313_vm4, %v2129_v63  ;;  %2908 = vmatmul.msk.f32.gmra.mxu1 %vm1313_vm4, %v2129_v63 }
 0x40b   :  { %2911 = vmatmul.msk.f32.gmra.mxu2 %vm1313_vm4, %v2198_v41  ;;  %2917 = vmatmul.msk.f32.gmra.mxu0 %vm1313_vm4, %v2267_v33 }
 0x40c   :  { %2453 = vmatpush.msrb.mxu3 %v2375_v62  ;;  %2523 = vmatpush.msra.mxu1 %v2376_v52 }
 0x40e   :  { %2454 = vmatpush.msrb.mxu3 %v2373_v7  ;;  %2524 = vmatpush.msra.mxu1 %v2374_v38 }
 0x410   :  { %2455 = vmatpush.msrb.mxu3 %v2371_v8  ;;  %2525 = vmatpush.msra.mxu1 %v2372_v22 }
 0x412   :  { %2913 = vmatmul.msk.f32.vlgmr.msra.gmra.mxu3 %vm1313_vm4, %v2197_v39  ;;  %2919 = vmatmul.msk.f32.vlgmr.msrb.gmra.mxu1 %vm1313_vm4, %v2266_v30 }
 0x413   :  { %2423 = vmatmul.f32.vlgmr.msrb.gmra.mxu2 %v4396_v37  ;;  %2493 = vmatmul.f32.vlgmr.msra.gmra.mxu0 %v4396_v37 }
 0x414   :  { %2456 = vmatpush.msrb.mxu3 %v2369_v60  ;;  %2526 = vmatpush.msra.mxu1 %v2370_v23 }
 0x416   :  { %2457 = vmatpush.msrb.mxu3 %v2367_v27  ;;  %2527 = vmatpush.msra.mxu1 %v2368_v4 }
 0x41a   :  { %2914 = vmatmul.msk.f32.gmra.mxu3 %vm1313_vm4, %v2198_v41  ;;  %2920 = vmatmul.msk.f32.gmra.mxu1 %vm1313_vm4, %v2267_v33 }
 0x41b   :  { %2426 = vmatmul.f32.gmra.mxu2 %v4412_v34  ;;  %2496 = vmatmul.f32.gmra.mxu0 %v4412_v34 }
 0x422   :  { %2921 = vmatmul.msk.f32.vlgmr.msrb.gmra.mxu3 %vm358_vm1, %v4398_v43  ;;  %2927 = vmatmul.msk.f32.vlgmr.msra.gmra.mxu1 %vm358_vm1, %v4398_v43 }
 0x423   :  { %2429 = vmatmul.f32.gmra.mxu2 %v4607_v12  ;;  %2499 = vmatmul.f32.gmra.mxu0 %v4607_v12 }
 0x42a   :  { %2922 = vmatmul.msk.f32.gmra.mxu3 %vm358_vm1, %v4414_v29  ;;  %2928 = vmatmul.msk.f32.gmra.mxu1 %vm358_vm1, %v4414_v29 }
 0x42b   :  { %2432 = vmatmul.f32.gmra.mxu2 %v4614_v42  ;;  %2502 = vmatmul.f32.gmra.mxu0 %v4614_v42 }
 0x432   :  { %2923 = vmatmul.msk.f32.gmra.mxu3 %vm358_vm1, %v4617_v24  ;;  %2929 = vmatmul.msk.f32.gmra.mxu1 %vm358_vm1, %v4617_v24 }
 0x43a   :  { %2924 = vmatmul.msk.f32.gmra.mxu3 %vm358_vm1, %v4625_v17  ;;  %2930 = vmatmul.msk.f32.gmra.mxu1 %vm358_vm1, %v4625_v17 }
 0x47f   :  { %v2183_v37 = vpop.f32.mrf.mxu1 }
 0x480   :  { %v2298_v43 = vpop.f32.mrf.mxu0 }
 0x481   :  { %v2327_v10 = vmul.f32 %v2298_v43, %v4389_v6  ;;  %v2190_v6 = vmul.f32 %v2183_v37, %v4354_v1 }
 0x485   :  { %v2160_v34 = vpop.f32.mrf.mxu3 }
 0x486   :  { %v2189_v29 = vmul.f32 %v2160_v34, %v4351_v59  ;;  %v2229_v12 = vpop.f32.mrf.mxu2 }
 0x487   :  { %v2258_v42 = vmul.f32 %v2229_v12, %v4357_v3  ;;  %v2186_v20 = vpop.f32.mrf.mxu1 }
 0x488   :  { %v2301_v24 = vpop.f32.mrf.mxu0  ;;  %v2192_v21 = vmul.f32 %v2186_v20, %v4374_v40 }
 0x489   :  { %v2262_v28 = vadd.f32 %v2258_v42, %v2189_v29  ;;  %v2329_v59 = vmul.f32 %v2301_v24, %v4405_v15  ;;  %v4679_v15 = vperm.slane %v2383_v57, 1 }
 0x48b   :  { %v2331_v44 = vadd.f32 %v2327_v10, %v2262_v28 }
 0x48d   :  { %2435 = vmatmul.f32.gmra.mxu2 %v2331_v44  ;;  %2505 = vmatmul.f32.gmra.mxu0 %v2331_v44  ;;  %v2163_v45 = vpop.f32.mrf.mxu3 }
 0x48e   :  { %v2191_v47 = vmul.f32 %v2163_v45, %v4371_v18  ;;  %v2232_v17 = vpop.f32.mrf.mxu2 }
 0x48f   :  { %v2260_v0 = vmul.f32 %v2232_v17, %v4377_v19  ;;  %v2321_v35 = vpop.f32.mrf.mxu1 }
 0x490   :  { %v2494_v54 = vpop.f32.mrf.mxu0  ;;  %v2328_v61 = vmul.f32 %v2321_v35, %v4392_v51 }
 0x491   :  { %v2264_v36 = vadd.f32 %v2260_v0, %v2191_v47  ;;  %v2495_v26 = vadd.f32 %v2494_v54, %v4679_v15 }
 0x493   :  { %v2333_v50 = vadd.f32 %v2329_v59, %v2264_v36 }
 0x495   :  { %2438 = vmatmul.f32.gmra.mxu2 %v2333_v50  ;;  %2508 = vmatmul.f32.gmra.mxu0 %v2333_v50  ;;  %v2252_v3 = vpop.f32.mrf.mxu3 }
 0x496   :  { %v2259_v9 = vmul.f32 %v2252_v3, %v4360_v25  ;;  %v2424_v19 = vpop.f32.mrf.mxu2  ;;  %v4683_v25 = vperm.slane %v2383_v57, 0 }
 0x497   :  { %v2324_v53 = vpop.f32.mrf.mxu1 }
 0x498   :  { %v2263_v18 = vadd.f32 %v2259_v9, %v2190_v6  ;;  %v2330_v51 = vmul.f32 %v2324_v53, %v4408_v14  ;;  %v2497_v39 = vpop.f32.mrf.mxu0  ;;  %v2425_v5 = vadd.f32 %v2424_v19, %v4683_v25 }
 0x499   :  { %v2498_v55 = vadd.f32 %v2497_v39, %v4679_v15 }
 0x49a   :  { %v2332_v58 = vadd.f32 %v2328_v61, %v2263_v18 }
 0x49c   :  { %2925 = vmatmul.msk.f32.gmra.mxu3 %vm358_vm1, %v2332_v58  ;;  %2931 = vmatmul.msk.f32.gmra.mxu1 %vm358_vm1, %v2332_v58  ;;  %v3407_v58 = vmov 192.0  }
 0x49d   :  { %v2255_v16 = vpop.f32.mrf.mxu3  ;;  %3000 = vrcp.f32 %v3407_v58 }
 0x49e   :  { %v2261_v1 = vmul.f32 %v2255_v16, %v4380_v2  ;;  %v2427_v40 = vpop.f32.mrf.mxu2 }
 0x49f   :  { %v2529_v11 = vpop.f32.mrf.mxu1  ;;  %v2428_v41 = vadd.f32 %v2427_v40, %v4683_v25 }
 0x4a0   :  { %v2265_v30 = vadd.f32 %v2261_v1, %v2192_v21  ;;  %v4687_v32 = vadd.f32 %v2529_v11, %v2495_v26  ;;  %v2500_v49 = vpop.f32.mrf.mxu0 }
 0x4a1   :  { %v2501_v38 = vadd.f32 %v2500_v49, %v4679_v15 }
 0x4a2   :  { %v2334_v31 = vadd.f32 %v2330_v51, %v2265_v30  ;;  %v2547_v48 = vsel %vm358_vm1, %v4687_v32, 0.0  ;;  %v2585_v63 = vmul.f32 %v4687_v32, %v4687_v32 }
 0x4a3   :  { %v3001_v19 = vpop.eup %3000 }
 0x4a4   :  { %2926 = vmatmul.msk.f32.gmra.mxu3 %vm358_vm1, %v2334_v31  ;;  %2932 = vmatmul.msk.f32.gmra.mxu1 %vm358_vm1, %v2334_v31  ;;  %v2596_v60 = vsel %vm358_vm1, %v2585_v63, 0.0  ;;  %v2572_v16 = vmul.f32 192.0, %v3001_v19  ;;  %vm2576_vm5 = vweird.f32 %v3001_v19 }
 0x4a5   :  { %v2459_v2 = vpop.f32.mrf.mxu3 }
 0x4a6   :  { %v4692_v56 = vadd.f32 %v2459_v2, %v2425_v5  ;;  %v2430_v8 = vpop.f32.mrf.mxu2  ;;  %v2573_v21 = vsub.f32 1.0, %v2572_v16 }
 0x4a7   :  { %v2532_v14 = vpop.f32.mrf.mxu1  ;;  %v2431_v34 = vadd.f32 %v2430_v8, %v4683_v25 }
 0x4a8   :  { %v2548_v46 = vadd.f32 %v2547_v48, %v4692_v56  ;;  %v4698_v13 = vadd.f32 %v2532_v14, %v2498_v55  ;;  %v2584_v33 = vmul.f32 %v4692_v56, %v4692_v56  ;;  %v2503_v29 = vpop.f32.mrf.mxu0  ;;  %v2574_v11 = vmul.f32 %v3001_v19, %v2573_v21 }
 0x4a9   :  { %v2504_v10 = vadd.f32 %v2503_v29, %v4679_v15 }
 0x4aa   :  { %2549 = vadd.xlane.f32.xlu0 %v2548_v46  ;;  %v2587_v52 = vmul.f32 %v4698_v13, %v4698_v13  ;;  %v2597_v23 = vadd.f32 %v2596_v60, %v2584_v33  ;;  %v2551_v44 = vsel %vm358_vm1, %v4698_v13, 0.0  ;;  %v2575_v31 = vadd.f32 %v3001_v19, %v2574_v11 }
 0x4ac   :  { %v2600_v37 = vsel %vm358_vm1, %v2587_v52, 0.0  ;;  %v4748_v2 = vsel %vm2576_vm5, %v3001_v19, %v2575_v31  ;;  %v2746_v31 = vld [vmem:[#allocation22] sm:$0x3] }
 0x4ad   :  { %v2462_v62 = vpop.f32.mrf.mxu3 }
 0x4ae   :  { %v4707_v7 = vadd.f32 %v2462_v62, %v2428_v41  ;;  %v2433_v47 = vpop.f32.mrf.mxu2 }
 0x4af   :  { %v2535_v22 = vpop.f32.mrf.mxu1  ;;  %v2434_v50 = vadd.f32 %v2433_v47, %v4683_v25 }
 0x4b0   :  { %v2586_v27 = vmul.f32 %v4707_v7, %v4707_v7  ;;  %v4713_v4 = vadd.f32 %v2535_v22, %v2501_v38  ;;  %v2552_v24 = vadd.f32 %v2551_v44, %v4707_v7 }
 0x4b2   :  { %2598 = vadd.xlane.f32.xlu0 %v2597_v23  ;;  %v2601_v43 = vadd.f32 %v2600_v37, %v2586_v27  ;;  %v2589_v42 = vmul.f32 %v4713_v4, %v4713_v4  ;;  %v2555_v35 = vsel %vm358_vm1, %v4713_v4, 0.0 }
 0x4b4   :  { %2602 = vadd.xlane.f32.xlu1 %v2601_v43  ;;  %v2604_v0 = vsel %vm358_vm1, %v2589_v42, 0.0 }
 0x4b5   :  { %v2465_v12 = vpop.f32.mrf.mxu3 }
 0x4b6   :  { %v4719_v20 = vadd.f32 %v2465_v12, %v2431_v34 }
 0x4b7   :  { %v2538_v28 = vpop.f32.mrf.mxu1 }
 0x4b8   :  { %v2588_v45 = vmul.f32 %v4719_v20, %v4719_v20  ;;  %v4727_v17 = vadd.f32 %v2538_v28, %v2504_v10  ;;  %v2556_v36 = vadd.f32 %v2555_v35, %v4719_v20 }
 0x4ba   :  { %2553 = vadd.xlane.f32.xlu0 %v2552_v24  ;;  %v2605_v59 = vadd.f32 %v2604_v0, %v2588_v45  ;;  %v2591_v6 = vmul.f32 %v4727_v17, %v4727_v17  ;;  %v2559_v53 = vsel %vm358_vm1, %v4727_v17, 0.0 }
 0x4bc   :  { %2606 = vadd.xlane.f32.xlu2 %v2605_v59  ;;  %2557 = vadd.xlane.f32.xlu1 %v2556_v36  ;;  %v2608_v61 = vsel %vm358_vm1, %v2591_v6, 0.0 }
 0x4bd   :  { %v2468_v3 = vpop.f32.mrf.mxu3 }
 0x4be   :  { %v4736_v54 = vadd.f32 %v2468_v3, %v2434_v50 }
 0x4c0   :  { %v2590_v9 = vmul.f32 %v4736_v54, %v4736_v54  ;;  %v2560_v18 = vadd.f32 %v2559_v53, %v4736_v54 }
 0x4c2   :  { %v2609_v57 = vadd.f32 %v2608_v61, %v2590_v9 }
 0x4c4   :  { %2561 = vadd.xlane.f32.xlu1 %v2560_v18  ;;  %2610 = vadd.xlane.f32.xlu0 %v2609_v57 }
 0x50a   :  { %v2506_v1 = vpop.f32.mrf.mxu0 }
 0x50b   :  { %v2507_v51 = vadd.f32 %v2506_v1, %v4679_v15 }
 0x510   :  { %v2436_v39 = vpop.f32.mrf.mxu2 }
 0x511   :  { %v2437_v40 = vadd.f32 %v2436_v39, %v4683_v25 }
 0x512   :  { %v2509_v48 = vpop.f32.mrf.mxu0 }
 0x513   :  { %v2510_v52 = vadd.f32 %v2509_v48, %v4679_v15 }
 0x518   :  { %v2439_v38 = vpop.f32.mrf.mxu2 }
 0x519   :  { %v2541_v30 = vpop.f32.mrf.mxu1  ;;  %v2440_v27 = vadd.f32 %v2439_v38, %v4683_v25 }
 0x51a   :  { %v4745_v26 = vadd.f32 %v2541_v30, %v2507_v51  ;;  %v2728_v51 = vld [vmem:[#allocation20] sm:$0x3] }
 0x51c   :  { %v2593_v14 = vmul.f32 %v4745_v26, %v4745_v26  ;;  %v2563_v49 = vsel %vm358_vm1, %v4745_v26, 0.0 }
 0x51d   :  { %v2550_v5 = vpop.xlane.xlu0 %2549 }
 0x51e   :  { %v4757_v63 = vmul.f32 %v4748_v2, %v2550_v5  ;;  %v2612_v8 = vsel %vm358_vm1, %v2593_v14, 0.0 }
 0x51f   :  { %v2471_v55 = vpop.f32.mrf.mxu3 }
 0x520   :  { %v4752_v46 = vadd.f32 %v2471_v55, %v2437_v40  ;;  %v2626_v37 = vmul.f32 %v4757_v63, %v4757_v63  ;;  %v4798_v55 = vperm.slane %v2728_v51, 0 }
 0x521   :  { %v2544_v41 = vpop.f32.mrf.mxu1 }
 0x522   :  { %v2564_v33 = vadd.f32 %v2563_v49, %v4752_v46  ;;  %v2592_v62 = vmul.f32 %v4752_v46, %v4752_v46  ;;  %v4764_v60 = vadd.f32 %v2544_v41, %v2510_v52  ;;  %v2638_v49 = vsub.f32 %v4692_v56, %v4757_v63 }
 0x523   :  { %v2639_v41 = vsub.f32 %v4687_v32, %v4757_v63  ;;  %v4806_v52 = vperm.slane %v2746_v31, 0 }
 0x524   :  { %2565 = vadd.xlane.f32.xlu2 %v2564_v33  ;;  %v2613_v22 = vadd.f32 %v2612_v8, %v2592_v62  ;;  %v2567_v42 = vsel %vm358_vm1, %v4764_v60, 0.0  ;;  %v2595_v44 = vmul.f32 %v4764_v60, %v4764_v60  ;;  %v4804_v33 = vperm.slane %v2728_v51, 1 }
 0x525   :  { %v2599_v23 = vpop.xlane.xlu0 %2598 }
 0x526   :  { %v2620_v43 = vmul.f32 %v2599_v23, %v4748_v2  ;;  %2614 = vadd.xlane.f32.xlu1 %v2613_v22  ;;  %v2616_v50 = vsel %vm358_vm1, %v2595_v44, 0.0  ;;  %v4808_v22 = vperm.slane %v2746_v31, 1 }
 0x527   :  { %v2474_v34 = vpop.f32.mrf.mxu3  ;;  %v2603_v29 = vpop.xlane.xlu1 %2602 }
 0x528   :  { %v2632_v12 = vsub.f32 %v2620_v43, %v2626_v37  ;;  %v4770_v15 = vadd.f32 %v2474_v34, %v2440_v27  ;;  %v2621_v0 = vmul.f32 %v2603_v29, %v4748_v2 }
 0x52a   :  { %v2650_v10 = vadd.f32 1e-05, %v2632_v12  ;;  %v2568_v28 = vadd.f32 %v2567_v42, %v4770_v15  ;;  %v2594_v45 = vmul.f32 %v4770_v15, %v4770_v15 }
 0x52c   :  { %3002 = vrsqrt.f32 %v2650_v10  ;;  %2569 = vadd.xlane.f32.xlu2 %v2568_v28  ;;  %v2617_v9 = vadd.f32 %v2616_v50, %v2594_v45  ;;  %vm2662_vm7 = vweird.f32 %v2650_v10 }
 0x52d   :  { %v2554_v25 = vpop.xlane.xlu0 %2553 }
 0x52e   :  { %v4778_v24 = vmul.f32 %v4748_v2, %v2554_v25 }
 0x52f   :  { %v2558_v47 = vpop.xlane.xlu1 %2557  ;;  %v2607_v59 = vpop.xlane.xlu2 %2606 }
 0x530   :  { %v2627_v35 = vmul.f32 %v4778_v24, %v4778_v24  ;;  %v4786_v36 = vmul.f32 %v4748_v2, %v2558_v47  ;;  %v2622_v61 = vmul.f32 %v2607_v59, %v4748_v2  ;;  %v2640_v45 = vsub.f32 %v4707_v7, %v4778_v24 }
 0x531   :  { %v2641_v47 = vsub.f32 %v4698_v13, %v4778_v24 }
 0x532   :  { %v3003_v3 = vpop.eup %3002  ;;  %v2633_v6 = vsub.f32 %v2621_v0, %v2627_v35  ;;  %v2628_v18 = vmul.f32 %v4786_v36, %v4786_v36 }
 0x533   :  { %v2657_v53 = vmul.f32 %v3003_v3, %v2650_v10  ;;  %vm2663_vm6 = vweird.f32 %v3003_v3 }
 0x534   :  { %v2651_v57 = vadd.f32 1e-05, %v2633_v6  ;;  %2618 = vadd.xlane.f32.xlu2 %v2617_v9  ;;  %v2634_v19 = vsub.f32 %v2622_v61, %v2628_v18  ;;  %vm2664_vm8 = vmor %vm2662_vm7, %vm2663_vm6  ;;  %v2643_v61 = vsub.f32 %v4713_v4, %v4786_v36 }
 0x535   :  { %v2658_v58 = vmul.f32 %v3003_v3, %v2657_v53  ;;  %v2642_v53 = vsub.f32 %v4719_v20, %v4786_v36 }
 0x536   :  { %3004 = vrsqrt.f32 %v2651_v57  ;;  %v2652_v21 = vadd.f32 1e-05, %v2634_v19  ;;  %vm2672_vm10 = vweird.f32 %v2651_v57 }
 0x537   :  { %v2659_v16 = vmul.f32 0.5, %v2658_v58  ;;  %v2562_v1 = vpop.xlane.xlu1 %2561  ;;  %v2611_v11 = vpop.xlane.xlu0 %2610 }
 0x538   :  { %v4793_v39 = vmul.f32 %v4748_v2, %v2562_v1  ;;  %3006 = vrsqrt.f32 %v2652_v21  ;;  %v2623_v40 = vmul.f32 %v2611_v11, %v4748_v2  ;;  %vm2682_vm13 = vweird.f32 %v2652_v21 }
 0x539   :  { %v2660_v30 = vsub.f32 1.5, %v2659_v16 }
 0x53a   :  { %v2629_v5 = vmul.f32 %v4793_v39, %v4793_v39  ;;  %v2645_v31 = vsub.f32 %v4727_v17, %v4793_v39 }
 0x53b   :  { %v2661_v14 = vmul.f32 %v3003_v3, %v2660_v30  ;;  %v2644_v30 = vsub.f32 %v4736_v54, %v4793_v39 }
 0x53c   :  { %v3005_v48 = vpop.eup %3004  ;;  %v2635_v62 = vsub.f32 %v2623_v40, %v2629_v5 }
 0x53d   :  { %v2665_v38 = vsel %vm2664_vm8, %v3003_v3, %v2661_v14  ;;  %v2667_v8 = vmul.f32 %v3005_v48, %v2651_v57  ;;  %vm2673_vm9 = vweird.f32 %v3005_v48 }
 0x53e   :  { %v2716_v23 = vmul.f32 %v2665_v38, %v2638_v49  ;;  %v2717_v27 = vmul.f32 %v2665_v38, %v2639_v41  ;;  %v2653_v37 = vadd.f32 1e-05, %v2635_v62  ;;  %v3007_v43 = vpop.eup %3006  ;;  %vm2674_vm11 = vmor %vm2672_vm10, %vm2673_vm9 }
 0x53f   :  { %v2668_v34 = vmul.f32 %v3005_v48, %v2667_v8  ;;  %v2677_v32 = vmul.f32 %v3007_v43, %v2652_v21  ;;  %vm2683_vm12 = vweird.f32 %v3007_v43 }
 0x540   :  { %v2734_v56 = vmul.f32 %v4798_v55, %v2716_v23  ;;  %v2735_v29 = vmul.f32 %v4804_v33, %v2717_v27  ;;  %3008 = vrsqrt.f32 %v2653_v37  ;;  %vm2684_vm14 = vmor %vm2682_vm13, %vm2683_vm12  ;;  %vm2692_vm0 = vweird.f32 %v2653_v37 }
 0x541   :  { %v2669_v63 = vmul.f32 0.5, %v2668_v34  ;;  %v2678_v10 = vmul.f32 %v3007_v43, %v2677_v32 }
 0x542   :  { %v2752_v12 = vadd.f32 %v4806_v52, %v2734_v56  ;;  %v2753_v42 = vadd.f32 %v4808_v22, %v2735_v29 }
 0x543   :  { %v2670_v28 = vsub.f32 1.5, %v2669_v63  ;;  %v2679_v25 = vmul.f32 0.5, %v2678_v10 }
 0x544   :  { %2764 = vst [vmem:[#allocation23] sm:$0xff] %v2752_v12 }
 0x545   :  { %2765 = vst.msk [vmem:[#allocation23 + $0x8] sm:$0xff] %vm358_vm1, %v2753_v42  ;;  %v2671_v44 = vmul.f32 %v3005_v48, %v2670_v28  ;;  %v2680_v0 = vsub.f32 1.5, %v2679_v25 }
 0x546   :  { %v3009_v35 = vpop.eup %3008 }
 0x547   :  { %v2675_v59 = vsel %vm2674_vm11, %v3005_v48, %v2671_v44  ;;  %v2681_v6 = vmul.f32 %v3007_v43, %v2680_v0  ;;  %v2687_v9 = vmul.f32 %v3009_v35, %v2653_v37  ;;  %vm2693_vm15 = vweird.f32 %v3009_v35 }
 0x548   :  { %v2718_v50 = vmul.f32 %v2675_v59, %v2640_v45  ;;  %v2719_v3 = vmul.f32 %v2675_v59, %v2641_v47  ;;  %vm2694_vm2 = vmor %vm2692_vm0, %vm2693_vm15 }
 0x549   :  { %v2685_v24 = vsel %vm2684_vm14, %v3007_v43, %v2681_v6  ;;  %v2688_v18 = vmul.f32 %v3009_v35, %v2687_v9 }
 0x54a   :  { %v2736_v7 = vmul.f32 %v4798_v55, %v2718_v50  ;;  %v2737_v13 = vmul.f32 %v4804_v33, %v2719_v3  ;;  %v2720_v57 = vmul.f32 %v2685_v24, %v2642_v53  ;;  %v2721_v58 = vmul.f32 %v2685_v24, %v2643_v61 }
 0x54b   :  { %v2689_v21 = vmul.f32 0.5, %v2688_v18 }
 0x54c   :  { %v2754_v19 = vadd.f32 %v4806_v52, %v2736_v7  ;;  %v2755_v16 = vadd.f32 %v4808_v22, %v2737_v13  ;;  %v2738_v1 = vmul.f32 %v4798_v55, %v2720_v57  ;;  %v2739_v20 = vmul.f32 %v4804_v33, %v2721_v58 }
 0x54d   :  { %v2690_v4 = vsub.f32 1.5, %v2689_v21 }
 0x54e   :  { %2766 = vst [vmem:[#allocation23 + $0x10] sm:$0xff] %v2754_v19  ;;  %v2756_v36 = vadd.f32 %v4806_v52, %v2738_v1  ;;  %v2757_v11 = vadd.f32 %v4808_v22, %v2739_v20 }
 0x54f   :  { %2767 = vst.msk [vmem:[#allocation23 + $0x18] sm:$0xff] %vm358_vm1, %v2755_v16  ;;  %v2691_v51 = vmul.f32 %v3009_v35, %v2690_v4 }
 0x550   :  { %2768 = vst [vmem:[#allocation23 + $0x20] sm:$0xff] %v2756_v36 }
 0x551   :  { %2769 = vst.msk [vmem:[#allocation23 + $0x28] sm:$0xff] %vm358_vm1, %v2757_v11  ;;  %v2695_v5 = vsel %vm2694_vm2, %v3009_v35, %v2691_v51 }
 0x552   :  { %v2722_v40 = vmul.f32 %v2695_v5, %v2644_v30  ;;  %v2723_v14 = vmul.f32 %v2695_v5, %v2645_v31 }
 0x554   :  { %v2740_v48 = vmul.f32 %v4798_v55, %v2722_v40  ;;  %v2741_v49 = vmul.f32 %v4804_v33, %v2723_v14 }
 0x556   :  { %v2758_v41 = vadd.f32 %v4806_v52, %v2740_v48  ;;  %v2759_v62 = vadd.f32 %v4808_v22, %v2741_v49 }
 0x558   :  { %2770 = vst [vmem:[#allocation23 + $0x30] sm:$0xff] %v2758_v41 }
 0x559   :  { %2771 = vst.msk [vmem:[#allocation23 + $0x38] sm:$0xff] %vm358_vm1, %v2759_v62 }
 0x597   :  { %v2566_v54 = vpop.xlane.xlu2 %2565 }
 0x598   :  { %v2582_v17 = vmul.f32 %v4748_v2, %v2566_v54 }
 0x599   :  { %v2615_v39 = vpop.xlane.xlu1 %2614 }
 0x59a   :  { %v2630_v38 = vmul.f32 %v2582_v17, %v2582_v17  ;;  %v2624_v8 = vmul.f32 %v2615_v39, %v4748_v2  ;;  %v2646_v45 = vsub.f32 %v4752_v46, %v2582_v17  ;;  %v2647_v47 = vsub.f32 %v4745_v26, %v2582_v17 }
 0x59c   :  { %v2636_v23 = vsub.f32 %v2624_v8, %v2630_v38 }
 0x59e   :  { %v2654_v27 = vadd.f32 1e-05, %v2636_v23 }
 0x59f   :  { %v2570_v37 = vpop.xlane.xlu2 %2569 }
 0x5a0   :  { %3010 = vrsqrt.f32 %v2654_v27  ;;  %v2583_v43 = vmul.f32 %v4748_v2, %v2570_v37  ;;  %vm2702_vm4 = vweird.f32 %v2654_v27 }
 0x5a2   :  { %v2631_v32 = vmul.f32 %v2583_v43, %v2583_v43  ;;  %v2648_v13 = vsub.f32 %v4770_v15, %v2583_v43  ;;  %v2649_v24 = vsub.f32 %v4764_v60, %v2583_v43 }
 0x5a6   :  { %v3011_v34 = vpop.eup %3010 }
 0x5a7   :  { %v2697_v56 = vmul.f32 %v3011_v34, %v2654_v27  ;;  %v2619_v29 = vpop.xlane.xlu2 %2618  ;;  %vm2703_vm3 = vweird.f32 %v3011_v34 }
 0x5a8   :  { %v2625_v63 = vmul.f32 %v2619_v29, %v4748_v2  ;;  %vm2704_vm5 = vmor %vm2702_vm4, %vm2703_vm3 }
 0x5a9   :  { %v2698_v12 = vmul.f32 %v3011_v34, %v2697_v56 }
 0x5aa   :  { %v2637_v42 = vsub.f32 %v2625_v63, %v2631_v32 }
 0x5ab   :  { %v2699_v10 = vmul.f32 0.5, %v2698_v12 }
 0x5ac   :  { %v2655_v28 = vadd.f32 1e-05, %v2637_v42 }
 0x5ad   :  { %v2700_v25 = vsub.f32 1.5, %v2699_v10 }
 0x5ae   :  { %3012 = vrsqrt.f32 %v2655_v28  ;;  %vm2712_vm7 = vweird.f32 %v2655_v28 }
 0x5af   :  { %v2701_v44 = vmul.f32 %v3011_v34, %v2700_v25 }
 0x5b1   :  { %v2705_v0 = vsel %vm2704_vm5, %v3011_v34, %v2701_v44 }
 0x5b2   :  { %v2724_v35 = vmul.f32 %v2705_v0, %v2646_v45  ;;  %v2725_v59 = vmul.f32 %v2705_v0, %v2647_v47 }
 0x5b4   :  { %v3013_v50 = vpop.eup %3012  ;;  %v2742_v2 = vmul.f32 %v4798_v55, %v2724_v35  ;;  %v2743_v3 = vmul.f32 %v4804_v33, %v2725_v59 }
 0x5b5   :  { %v2707_v6 = vmul.f32 %v3013_v50, %v2655_v28  ;;  %vm2713_vm6 = vweird.f32 %v3013_v50 }
 0x5b6   :  { %v2760_v9 = vadd.f32 %v4806_v52, %v2742_v2  ;;  %v2761_v53 = vadd.f32 %v4808_v22, %v2743_v3  ;;  %vm2714_vm8 = vmor %vm2712_vm7, %vm2713_vm6 }
 0x5b7   :  { %v2708_v61 = vmul.f32 %v3013_v50, %v2707_v6 }
 0x5b8   :  { %2772 = vst [vmem:[#allocation23 + $0x40] sm:$0xff] %v2760_v9 }
 0x5b9   :  { %2773 = vst.msk [vmem:[#allocation23 + $0x48] sm:$0xff] %vm358_vm1, %v2761_v53  ;;  %v2709_v46 = vmul.f32 0.5, %v2708_v61 }
 0x5bb   :  { %v2710_v26 = vsub.f32 1.5, %v2709_v46 }
 0x5bd   :  { %v2711_v7 = vmul.f32 %v3013_v50, %v2710_v26 }
 0x5bf   :  { %v2715_v18 = vsel %vm2714_vm8, %v3013_v50, %v2711_v7 }
 0x5c0   :  { %v2726_v57 = vmul.f32 %v2715_v18, %v2648_v13  ;;  %v2727_v58 = vmul.f32 %v2715_v18, %v2649_v24 }
 0x5c2   :  { %v2744_v19 = vmul.f32 %v4798_v55, %v2726_v57  ;;  %v2745_v16 = vmul.f32 %v4804_v33, %v2727_v58 }
 0x5c4   :  { %v2762_v21 = vadd.f32 %v4806_v52, %v2744_v19  ;;  %v2763_v15 = vadd.f32 %v4808_v22, %v2745_v16 }
 0x5c6   :  { %2774 = vst [vmem:[#allocation23 + $0x50] sm:$0xff] %v2762_v21 }
 0x5c7   :  { %2775 = vst.msk [vmem:[#allocation23 + $0x58] sm:$0xff] %vm358_vm1, %v2763_v15 }
 0x5c8   :  { %2788 = dma.vmem_to_hbm [thread:$0]  %s2781_s6, 1536, %s2783_s11, [#allocation4], %s3394_s24, %s3394_s24, %s3395_s2  }
 0x5c9   :  { %3388 = dma.done.wait [#allocation4], 1536  }
 0x5ca   :  { %3389 = vsyncadd [#allocation4], 4294965760 }
 0x5cb   :  { %2793 = vsyncpa [#allocation3], 1 }
 0x5cc   :  { %2794 = vsyncpa [#allocation6], 1 }
 0x5cd   :  { %2795 = vsyncpa [#allocation9], 1 }
 0x5ce   :  { %2796 = vsyncpa [#allocation12], 1 }
 0x5cf   :  { %2797 = vsyncpa [#allocation15], 1 }
 0x5d0   :  { %2798 = vsyncpa [#allocation18], 1 }
 0x5d1   :  { %2799 = vsyncpa [#allocation21], 1 }
 0x5d2   :  { %2800 = vsyncpa [#allocation4], 1 }

</bundles_post_ra>
